<compile_context>
chip_gen: v5e
topology: v5e:2x2
jax: 0.10.0
libtpu: 0.0.40
codegen_flags: <defaults>
</compile_context>

<pallas_src>
import functools

import jax
import jax.numpy as jnp
from jax.experimental import pallas as pl
from jax.experimental.pallas import tpu as pltpu

LEAKY_SLOPE = 0.01   # nn.LeakyReLU default negative_slope
IN_EPS = 1e-5        # nn.InstanceNorm2d default eps


def _round_up(x, m):
    return (x + m - 1) // m * m


# ------------------------------------------------------ tiled GEMM (+ bias, + optional LeakyReLU)

def _gemm_kernel(a_ref, b_ref, bias_ref, o_ref, acc_ref, *, apply_leaky, slope):
    k = pl.program_id(2)

    @pl.when(k == 0)
    def _():
        acc_ref[...] = jnp.zeros_like(acc_ref)

    acc_ref[...] += jnp.dot(a_ref[...], b_ref[...],
                            preferred_element_type=jnp.float32)

    @pl.when(k == pl.num_programs(2) - 1)
    def _():
        y = acc_ref[...] + bias_ref[...]
        if apply_leaky:
            y = jnp.where(y >= 0, y, slope * y)
        o_ref[...] = y.astype(o_ref.dtype)


def matmul_bias_act(a, b, bias, *, apply_leaky, slope=LEAKY_SLOPE):
    """(M, K) @ (K, OC) + bias, optional fused LeakyReLU.  Tiled, pipelined Pallas GEMM."""
    M, K = a.shape
    K2, OC = b.shape
    assert K == K2 and bias.shape == (OC,)

    tm = min(256, _round_up(M, 8))
    tn = 128
    Kp = _round_up(K, 128)
    tk = 512 if Kp % 512 == 0 else (256 if Kp % 256 == 0 else 128)
    Mp = _round_up(M, tm)
    Np = _round_up(OC, tn)

    a_p = a if (Mp == M and Kp == K) else jnp.pad(a, ((0, Mp - M), (0, Kp - K)))
    b_p = b if (Kp == K and Np == OC) else jnp.pad(b, ((0, Kp - K), (0, Np - OC)))
    bias_p = bias.reshape(1, OC)
    if Np != OC:
        bias_p = jnp.pad(bias_p, ((0, 0), (0, Np - OC)))

    grid = (Mp // tm, Np // tn, Kp // tk)
    kernel = functools.partial(_gemm_kernel, apply_leaky=apply_leaky, slope=slope)

    out = pl.pallas_call(
        kernel,
        out_shape=jax.ShapeDtypeStruct((Mp, Np), jnp.float32),
        grid_spec=pltpu.PrefetchScalarGridSpec(
            num_scalar_prefetch=0,
            grid=grid,
            in_specs=[pl.BlockSpec((tm, tk), lambda i, j, k: (i, k)),
                      pl.BlockSpec((tk, tn), lambda i, j, k: (k, j)),
                      pl.BlockSpec((1, tn), lambda i, j, k: (0, j))],
            out_specs=pl.BlockSpec((tm, tn), lambda i, j, k: (i, j)),
            scratch_shapes=[pltpu.VMEM((tm, tn), jnp.float32)]),
        compiler_params=pltpu.CompilerParams(
            dimension_semantics=("parallel", "parallel", "arbitrary"),
            vmem_limit_bytes=32 * 1024 * 1024),
        cost_estimate=pl.CostEstimate(
            flops=2 * Mp * Np * Kp,
            transcendentals=0,
            bytes_accessed=4 * (Mp * Kp + Kp * Np + Mp * Np)),
    )(a_p, b_p, bias_p)
    return out[:M, :OC]


# ------------------------------------------------------ fused InstanceNorm2d(affine=False) + LeakyReLU

def _inorm_leaky_kernel(x_ref, o_ref, *, eps, slope):
    x = x_ref[...]                                        # (1, L, C): rows=spatial, lanes=channels
    mean = jnp.mean(x, axis=1, keepdims=True)
    cent = x - mean
    var = jnp.mean(cent * cent, axis=1, keepdims=True)    # biased variance, like PyTorch
    y = cent * jax.lax.rsqrt(var + eps)
    o_ref[...] = jnp.where(y >= 0, y, slope * y)


def instance_norm_leaky_relu(x_nhwc, *, eps=IN_EPS, slope=LEAKY_SLOPE):
    N, H, W, C = x_nhwc.shape
    L = H * W
    x3 = x_nhwc.reshape(N, L, C)
    kernel = functools.partial(_inorm_leaky_kernel, eps=eps, slope=slope)
    out = pl.pallas_call(
        kernel,
        out_shape=jax.ShapeDtypeStruct((N, L, C), jnp.float32),
        grid_spec=pltpu.PrefetchScalarGridSpec(
            num_scalar_prefetch=0,
            grid=(N,),
            in_specs=[pl.BlockSpec((1, L, C), lambda n: (n, 0, 0))],
            out_specs=pl.BlockSpec((1, L, C), lambda n: (n, 0, 0))),
        compiler_params=pltpu.CompilerParams(
            dimension_semantics=("parallel",),
            vmem_limit_bytes=32 * 1024 * 1024),
    )(x3)
    return out.reshape(N, H, W, C)


# ------------------------------------------------------ conv layer = refl-pad + im2col + Pallas GEMM

def _im2col_nhwc(xp, k, stride):
    N, Hp, Wp, C = xp.shape
    OH = (Hp - k) // stride + 1
    OW = (Wp - k) // stride + 1
    cols = jnp.stack(
        [xp[:, i:i + stride * OH:stride, j:j + stride * OW:stride, :]
         for i in range(k) for j in range(k)],
        axis=3)                                           # (N, OH, OW, k*k, C)
    return cols.reshape(N * OH * OW, k * k * C), OH, OW


def leaky_relu_conv2d(x_nhwc, w, b, *, stride, padding, instance_norm, apply_leaky):
    """ReflectionPad2d(padding) -> Conv2d(bias=True) -> [InstanceNorm2d] -> [LeakyReLU(0.01)]."""
    N = x_nhwc.shape[0]
    OC, IC, kh, kw = w.shape
    assert kh == kw
    if padding > 0:
        x_nhwc = jnp.pad(x_nhwc, ((0, 0), (padding, padding), (padding, padding), (0, 0)),
                         mode="reflect")
    cols, OH, OW = _im2col_nhwc(x_nhwc, kh, stride)
    # K-dim ordering (kh, kw, IC) matches the im2col ordering above.
    wm = jnp.transpose(w, (2, 3, 1, 0)).reshape(kh * kw * IC, OC)
    fuse_act = apply_leaky and not instance_norm          # LeakyReLU fused in the GEMM epilogue
    y = matmul_bias_act(cols, wm, b, apply_leaky=fuse_act)
    y = y.reshape(N, OH, OW, OC)
    if instance_norm:
        y = instance_norm_leaky_relu(y)                   # norm + LeakyReLU fused
    return y


# ------------------------------------------------------ Dis_content forward

def dis_content_forward(x_nchw, params):
    x = jnp.transpose(x_nchw, (0, 2, 3, 1))               # NCHW -> NHWC (channels on lanes)
    for i in range(3):
        x = leaky_relu_conv2d(x, params[f"w{i}"], params[f"b{i}"],
                              stride=2, padding=1, instance_norm=True, apply_leaky=True)
    x = leaky_relu_conv2d(x, params["w3"], params["b3"],
                          stride=1, padding=0, instance_norm=False, apply_leaky=True)
    x = leaky_relu_conv2d(x, params["w4"], params["b4"],
                          stride=1, padding=0, instance_norm=False, apply_leaky=False)
    out = jnp.transpose(x, (0, 3, 1, 2)).reshape(-1)      # matches PyTorch NCHW .view(-1)
    return [out]


# ------------------------------------------------------ main

if __name__ == "__main__":
    key = jax.random.PRNGKey(0)
    ndf = 32                  # small stand-in for the default ndf=256
    N, H, W = 2, 64, 64       # spatial must survive 3x (refl-pad1, 7x7 s2) + a 4x4 valid conv

    ks = jax.random.split(key, 11)

    def wgt(k, oc, ic, ksz):
        return 0.05 * jax.random.normal(k, (oc, ic, ksz, ksz), jnp.float32)

    def bias(k, oc):
        return 0.01 * jax.random.normal(k, (oc,), jnp.float32)

    params = {
        "w0": wgt(ks[0], ndf, ndf, 7), "b0": bias(ks[1], ndf),
        "w1": wgt(ks[2], ndf, ndf, 7), "b1": bias(ks[3], ndf),
        "w2": wgt(ks[4], ndf, ndf, 7), "b2": bias(ks[5], ndf),
        "w3": wgt(ks[6], ndf, ndf, 4), "b3": bias(ks[7], ndf),
        "w4": wgt(ks[8], 1, ndf, 1),   "b4": bias(ks[9], 1),
    }
    x = jax.random.normal(ks[10], (N, ndf, H, W), jnp.float32)

    outs = jax.jit(dis_content_forward)(x, params)
    jax.block_until_ready(outs)

    # spatial: 64 -> 30 -> 13 -> 5 (refl-pad1, 7x7 s2) -> 2 (4x4 valid) -> 2 (1x1)
    assert len(outs) == 1 and outs[0].shape == (N * 1 * 2 * 2,)
    assert bool(jnp.all(jnp.isfinite(outs[0])))
    print("KERNEL_OK")
</pallas_src>

<mosaic_0001>
module attributes {stable_mosaic.version = 11 : i64} {
  func.func @_gemm_kernel(%arg0: i32, %arg1: i32, %arg2: i32, %arg3: memref<256x128xf32, #tpu.memory_space<vmem>>, %arg4: memref<128x128xf32, #tpu.memory_space<vmem>>, %arg5: memref<1x128xf32, #tpu.memory_space<vmem>>, %arg6: memref<256x128xf32, #tpu.memory_space<vmem>>, %arg7: memref<256x128xf32, #tpu.memory_space<vmem>>) attributes {dimension_semantics = [#tpu.dimension_semantics<parallel>, #tpu.dimension_semantics<parallel>, #tpu.dimension_semantics<arbitrary>], iteration_bounds = array<i64: 8, 1, 13>, scalar_prefetch = 0 : i64, scratch_operands = 1 : i64, tpu.core_type = #tpu.core_type<tc>, window_params = [{transform_indices = @transform_0, window_bounds = array<i64: 256, 128>}, {transform_indices = @transform_1, window_bounds = array<i64: 128, 128>}, {transform_indices = @transform_2, window_bounds = array<i64: 1, 128>}, {transform_indices = @transform_3, window_bounds = array<i64: 256, 128>}]} {
    %c0_i32 = arith.constant 0 : i32
    %0 = arith.cmpi eq, %arg2, %c0_i32 : i32
    %1 = arith.extui %0 : i1 to i32
    %c0_i32_0 = arith.constant 0 : i32
    %2 = arith.cmpi ne, %1, %c0_i32_0 : i32
    scf.if %2 {
      %cst_9 = arith.constant 0.000000e+00 : f32
      %12 = vector.broadcast %cst_9 : f32 to vector<256x128xf32>
      %c0_10 = arith.constant 0 : index
      %c0_11 = arith.constant 0 : index
      %13 = vector.load %arg7[%c0_10, %c0_11] : memref<256x128xf32, #tpu.memory_space<vmem>>, vector<256x128xf32>
      tpu.vector_store %arg7[%c0_10, %c0_11], %12 {strides = array<i32>} : memref<256x128xf32, #tpu.memory_space<vmem>>, vector<256x128xf32>,
    } else {
    }
    %c0 = arith.constant 0 : index
    %c0_1 = arith.constant 0 : index
    %3 = vector.load %arg7[%c0, %c0_1] : memref<256x128xf32, #tpu.memory_space<vmem>>, vector<256x128xf32>
    %c0_2 = arith.constant 0 : index
    %c0_3 = arith.constant 0 : index
    %4 = vector.load %arg3[%c0_2, %c0_3] : memref<256x128xf32, #tpu.memory_space<vmem>>, vector<256x128xf32>
    %c0_4 = arith.constant 0 : index
    %c0_5 = arith.constant 0 : index
    %5 = vector.load %arg4[%c0_4, %c0_5] : memref<128x128xf32, #tpu.memory_space<vmem>>, vector<128x128xf32>
    %cst = arith.constant dense<0.000000e+00> : vector<256x128xf32>
    %6 = tpu.matmul %4, %5, %cst {dimension_numbers = #tpu.dot_dimension_numbers<[1], [0], [0], [1], [0, 0, 1, 1], [], []>} : vector<256x128xf32>, vector<128x128xf32>, vector<256x128xf32> -> vector<256x128xf32>
    %7 = arith.addf %3, %6 : vector<256x128xf32>
    %c0_6 = arith.constant 0 : index
    %c0_7 = arith.constant 0 : index
    %8 = vector.load %arg7[%c0_6, %c0_7] : memref<256x128xf32, #tpu.memory_space<vmem>>, vector<256x128xf32>
    tpu.vector_store %arg7[%c0_6, %c0_7], %7 {strides = array<i32>} : memref<256x128xf32, #tpu.memory_space<vmem>>, vector<256x128xf32>,
    %c12_i32 = arith.constant 12 : i32
    %9 = arith.cmpi eq, %arg2, %c12_i32 : i32
    %10 = arith.extui %9 : i1 to i32
    %c0_i32_8 = arith.constant 0 : i32
    %11 = arith.cmpi ne, %10, %c0_i32_8 : i32
    scf.if %11 {
      %c0_9 = arith.constant 0 : index
      %c0_10 = arith.constant 0 : index
      %12 = vector.load %arg7[%c0_9, %c0_10] : memref<256x128xf32, #tpu.memory_space<vmem>>, vector<256x128xf32>
      %c0_11 = arith.constant 0 : index
      %c0_12 = arith.constant 0 : index
      %13 = vector.load %arg5[%c0_11, %c0_12] : memref<1x128xf32, #tpu.memory_space<vmem>>, vector<1x128xf32>
      %14 = vector.broadcast %13 : vector<1x128xf32> to vector<256x128xf32>
      %15 = arith.addf %12, %14 : vector<256x128xf32>
      %c0_13 = arith.constant 0 : index
      %c0_14 = arith.constant 0 : index
      %16 = vector.load %arg6[%c0_13, %c0_14] : memref<256x128xf32, #tpu.memory_space<vmem>>, vector<256x128xf32>
      tpu.vector_store %arg6[%c0_13, %c0_14], %15 {strides = array<i32>} : memref<256x128xf32, #tpu.memory_space<vmem>>, vector<256x128xf32>,
    } else {
    }
    return
  }
  func.func @transform_0(%arg0: i32, %arg1: i32, %arg2: i32) -> (i32, i32) {
    %c0_i32 = arith.constant 0 : i32
    return %arg0, %arg2 : i32, i32
  }
  func.func @transform_1(%arg0: i32, %arg1: i32, %arg2: i32) -> (i32, i32) {
    %c0_i32 = arith.constant 0 : i32
    return %arg2, %arg1 : i32, i32
  }
  func.func @transform_2(%arg0: i32, %arg1: i32, %arg2: i32) -> (i32, i32) {
    %c0_i32 = arith.constant 0 : i32
    %c0_i32_0 = arith.constant 0 : i32
    return %c0_i32, %arg1 : i32, i32
  }
  func.func @transform_3(%arg0: i32, %arg1: i32, %arg2: i32) -> (i32, i32) {
    %c0_i32 = arith.constant 0 : i32
    return %arg0, %arg1 : i32, i32
  }
}

module attributes {stable_mosaic.version = 11 : i64} {
  func.func @_inorm_leaky_kernel(%arg0: i32, %arg1: memref<1x900x32xf32, #tpu.memory_space<vmem>>, %arg2: memref<1x900x32xf32, #tpu.memory_space<vmem>>) attributes {dimension_semantics = [#tpu.dimension_semantics<parallel>], iteration_bounds = array<i64: 2>, scalar_prefetch = 0 : i64, scratch_operands = 0 : i64, tpu.core_type = #tpu.core_type<tc>, window_params = [{transform_indices = @transform_0, window_bounds = array<i64: 1, 900, 32>}, {transform_indices = @transform_1, window_bounds = array<i64: 1, 900, 32>}]} {
    %c0 = arith.constant 0 : index
    %c0_0 = arith.constant 0 : index
    %c0_1 = arith.constant 0 : index
    %0 = vector.load %arg1[%c0, %c0_0, %c0_1] : memref<1x900x32xf32, #tpu.memory_space<vmem>>, vector<1x900x32xf32>
    %cst = arith.constant dense<0.000000e+00> : vector<1x32xf32>
    %1 = vector.multi_reduction <add>, %0, %cst [1] : vector<1x900x32xf32> to vector<1x32xf32>
    %2 = vector.shape_cast %1 : vector<1x32xf32> to vector<1x1x32xf32>
    %cst_2 = arith.constant 9.000000e+02 : f32
    %3 = vector.broadcast %cst_2 : f32 to vector<1x1x32xf32>
    %4 = arith.divf %2, %3 : vector<1x1x32xf32>
    %5 = vector.broadcast %4 : vector<1x1x32xf32> to vector<1x900x32xf32>
    %6 = arith.subf %0, %5 : vector<1x900x32xf32>
    %7 = arith.mulf %6, %6 : vector<1x900x32xf32>
    %cst_3 = arith.constant dense<0.000000e+00> : vector<1x32xf32>
    %8 = vector.multi_reduction <add>, %7, %cst_3 [1] : vector<1x900x32xf32> to vector<1x32xf32>
    %9 = vector.shape_cast %8 : vector<1x32xf32> to vector<1x1x32xf32>
    %cst_4 = arith.constant 9.000000e+02 : f32
    %10 = vector.broadcast %cst_4 : f32 to vector<1x1x32xf32>
    %11 = arith.divf %9, %10 : vector<1x1x32xf32>
    %cst_5 = arith.constant 9.99999974E-6 : f32
    %12 = vector.broadcast %cst_5 : f32 to vector<1x1x32xf32>
    %13 = arith.addf %11, %12 : vector<1x1x32xf32>
    %14 = math.rsqrt %13 : vector<1x1x32xf32>
    %15 = vector.broadcast %14 : vector<1x1x32xf32> to vector<1x900x32xf32>
    %16 = arith.mulf %6, %15 : vector<1x900x32xf32>
    %cst_6 = arith.constant 0.000000e+00 : f32
    %17 = vector.broadcast %cst_6 : f32 to vector<1x900x32xf32>
    %18 = arith.cmpf oge, %16, %17 : vector<1x900x32xf32>
    %cst_7 = arith.constant 0.00999999977 : f32
    %19 = vector.broadcast %cst_7 : f32 to vector<1x900x32xf32>
    %20 = arith.mulf %19, %16 : vector<1x900x32xf32>
    %21 = arith.select %18, %16, %20 : vector<1x900x32xi1>, vector<1x900x32xf32>
    %c0_8 = arith.constant 0 : index
    %c0_9 = arith.constant 0 : index
    %c0_10 = arith.constant 0 : index
    %22 = vector.load %arg2[%c0_8, %c0_9, %c0_10] : memref<1x900x32xf32, #tpu.memory_space<vmem>>, vector<1x900x32xf32>
    tpu.vector_store %arg2[%c0_8, %c0_9, %c0_10], %21 {strides = array<i32>} : memref<1x900x32xf32, #tpu.memory_space<vmem>>, vector<1x900x32xf32>,
    return
  }
  func.func @transform_0(%arg0: i32) -> (i32, i32, i32) {
    %c0_i32 = arith.constant 0 : i32
    %c0_i32_0 = arith.constant 0 : i32
    %c0_i32_1 = arith.constant 0 : i32
    return %arg0, %c0_i32, %c0_i32_0 : i32, i32, i32
  }
  func.func @transform_1(%arg0: i32) -> (i32, i32, i32) {
    %c0_i32 = arith.constant 0 : i32
    %c0_i32_0 = arith.constant 0 : i32
    %c0_i32_1 = arith.constant 0 : i32
    return %arg0, %c0_i32, %c0_i32_0 : i32, i32, i32
  }
}

module attributes {stable_mosaic.version = 11 : i64} {
  func.func @_gemm_kernel(%arg0: i32, %arg1: i32, %arg2: i32, %arg3: memref<256x128xf32, #tpu.memory_space<vmem>>, %arg4: memref<128x128xf32, #tpu.memory_space<vmem>>, %arg5: memref<1x128xf32, #tpu.memory_space<vmem>>, %arg6: memref<256x128xf32, #tpu.memory_space<vmem>>, %arg7: memref<256x128xf32, #tpu.memory_space<vmem>>) attributes {dimension_semantics = [#tpu.dimension_semantics<parallel>, #tpu.dimension_semantics<parallel>, #tpu.dimension_semantics<arbitrary>], iteration_bounds = array<i64: 2, 1, 13>, scalar_prefetch = 0 : i64, scratch_operands = 1 : i64, tpu.core_type = #tpu.core_type<tc>, window_params = [{transform_indices = @transform_0, window_bounds = array<i64: 256, 128>}, {transform_indices = @transform_1, window_bounds = array<i64: 128, 128>}, {transform_indices = @transform_2, window_bounds = array<i64: 1, 128>}, {transform_indices = @transform_3, window_bounds = array<i64: 256, 128>}]} {
    %c0_i32 = arith.constant 0 : i32
    %0 = arith.cmpi eq, %arg2, %c0_i32 : i32
    %1 = arith.extui %0 : i1 to i32
    %c0_i32_0 = arith.constant 0 : i32
    %2 = arith.cmpi ne, %1, %c0_i32_0 : i32
    scf.if %2 {
      %cst_9 = arith.constant 0.000000e+00 : f32
      %12 = vector.broadcast %cst_9 : f32 to vector<256x128xf32>
      %c0_10 = arith.constant 0 : index
      %c0_11 = arith.constant 0 : index
      %13 = vector.load %arg7[%c0_10, %c0_11] : memref<256x128xf32, #tpu.memory_space<vmem>>, vector<256x128xf32>
      tpu.vector_store %arg7[%c0_10, %c0_11], %12 {strides = array<i32>} : memref<256x128xf32, #tpu.memory_space<vmem>>, vector<256x128xf32>,
    } else {
    }
    %c0 = arith.constant 0 : index
    %c0_1 = arith.constant 0 : index
    %3 = vector.load %arg7[%c0, %c0_1] : memref<256x128xf32, #tpu.memory_space<vmem>>, vector<256x128xf32>
    %c0_2 = arith.constant 0 : index
    %c0_3 = arith.constant 0 : index
    %4 = vector.load %arg3[%c0_2, %c0_3] : memref<256x128xf32, #tpu.memory_space<vmem>>, vector<256x128xf32>
    %c0_4 = arith.constant 0 : index
    %c0_5 = arith.constant 0 : index
    %5 = vector.load %arg4[%c0_4, %c0_5] : memref<128x128xf32, #tpu.memory_space<vmem>>, vector<128x128xf32>
    %cst = arith.constant dense<0.000000e+00> : vector<256x128xf32>
    %6 = tpu.matmul %4, %5, %cst {dimension_numbers = #tpu.dot_dimension_numbers<[1], [0], [0], [1], [0, 0, 1, 1], [], []>} : vector<256x128xf32>, vector<128x128xf32>, vector<256x128xf32> -> vector<256x128xf32>
    %7 = arith.addf %3, %6 : vector<256x128xf32>
    %c0_6 = arith.constant 0 : index
    %c0_7 = arith.constant 0 : index
    %8 = vector.load %arg7[%c0_6, %c0_7] : memref<256x128xf32, #tpu.memory_space<vmem>>, vector<256x128xf32>
    tpu.vector_store %arg7[%c0_6, %c0_7], %7 {strides = array<i32>} : memref<256x128xf32, #tpu.memory_space<vmem>>, vector<256x128xf32>,
    %c12_i32 = arith.constant 12 : i32
    %9 = arith.cmpi eq, %arg2, %c12_i32 : i32
    %10 = arith.extui %9 : i1 to i32
    %c0_i32_8 = arith.constant 0 : i32
    %11 = arith.cmpi ne, %10, %c0_i32_8 : i32
    scf.if %11 {
      %c0_9 = arith.constant 0 : index
      %c0_10 = arith.constant 0 : index
      %12 = vector.load %arg7[%c0_9, %c0_10] : memref<256x128xf32, #tpu.memory_space<vmem>>, vector<256x128xf32>
      %c0_11 = arith.constant 0 : index
      %c0_12 = arith.constant 0 : index
      %13 = vector.load %arg5[%c0_11, %c0_12] : memref<1x128xf32, #tpu.memory_space<vmem>>, vector<1x128xf32>
      %14 = vector.broadcast %13 : vector<1x128xf32> to vector<256x128xf32>
      %15 = arith.addf %12, %14 : vector<256x128xf32>
      %c0_13 = arith.constant 0 : index
      %c0_14 = arith.constant 0 : index
      %16 = vector.load %arg6[%c0_13, %c0_14] : memref<256x128xf32, #tpu.memory_space<vmem>>, vector<256x128xf32>
      tpu.vector_store %arg6[%c0_13, %c0_14], %15 {strides = array<i32>} : memref<256x128xf32, #tpu.memory_space<vmem>>, vector<256x128xf32>,
    } else {
    }
    return
  }
  func.func @transform_0(%arg0: i32, %arg1: i32, %arg2: i32) -> (i32, i32) {
    %c0_i32 = arith.constant 0 : i32
    return %arg0, %arg2 : i32, i32
  }
  func.func @transform_1(%arg0: i32, %arg1: i32, %arg2: i32) -> (i32, i32) {
    %c0_i32 = arith.constant 0 : i32
    return %arg2, %arg1 : i32, i32
  }
  func.func @transform_2(%arg0: i32, %arg1: i32, %arg2: i32) -> (i32, i32) {
    %c0_i32 = arith.constant 0 : i32
    %c0_i32_0 = arith.constant 0 : i32
    return %c0_i32, %arg1 : i32, i32
  }
  func.func @transform_3(%arg0: i32, %arg1: i32, %arg2: i32) -> (i32, i32) {
    %c0_i32 = arith.constant 0 : i32
    return %arg0, %arg1 : i32, i32
  }
}

module attributes {stable_mosaic.version = 11 : i64} {
  func.func @_inorm_leaky_kernel(%arg0: i32, %arg1: memref<1x169x32xf32, #tpu.memory_space<vmem>>, %arg2: memref<1x169x32xf32, #tpu.memory_space<vmem>>) attributes {dimension_semantics = [#tpu.dimension_semantics<parallel>], iteration_bounds = array<i64: 2>, scalar_prefetch = 0 : i64, scratch_operands = 0 : i64, tpu.core_type = #tpu.core_type<tc>, window_params = [{transform_indices = @transform_0, window_bounds = array<i64: 1, 169, 32>}, {transform_indices = @transform_1, window_bounds = array<i64: 1, 169, 32>}]} {
    %c0 = arith.constant 0 : index
    %c0_0 = arith.constant 0 : index
    %c0_1 = arith.constant 0 : index
    %0 = vector.load %arg1[%c0, %c0_0, %c0_1] : memref<1x169x32xf32, #tpu.memory_space<vmem>>, vector<1x169x32xf32>
    %cst = arith.constant dense<0.000000e+00> : vector<1x32xf32>
    %1 = vector.multi_reduction <add>, %0, %cst [1] : vector<1x169x32xf32> to vector<1x32xf32>
    %2 = vector.shape_cast %1 : vector<1x32xf32> to vector<1x1x32xf32>
    %cst_2 = arith.constant 1.690000e+02 : f32
    %3 = vector.broadcast %cst_2 : f32 to vector<1x1x32xf32>
    %4 = arith.divf %2, %3 : vector<1x1x32xf32>
    %5 = vector.broadcast %4 : vector<1x1x32xf32> to vector<1x169x32xf32>
    %6 = arith.subf %0, %5 : vector<1x169x32xf32>
    %7 = arith.mulf %6, %6 : vector<1x169x32xf32>
    %cst_3 = arith.constant dense<0.000000e+00> : vector<1x32xf32>
    %8 = vector.multi_reduction <add>, %7, %cst_3 [1] : vector<1x169x32xf32> to vector<1x32xf32>
    %9 = vector.shape_cast %8 : vector<1x32xf32> to vector<1x1x32xf32>
    %cst_4 = arith.constant 1.690000e+02 : f32
    %10 = vector.broadcast %cst_4 : f32 to vector<1x1x32xf32>
    %11 = arith.divf %9, %10 : vector<1x1x32xf32>
    %cst_5 = arith.constant 9.99999974E-6 : f32
    %12 = vector.broadcast %cst_5 : f32 to vector<1x1x32xf32>
    %13 = arith.addf %11, %12 : vector<1x1x32xf32>
    %14 = math.rsqrt %13 : vector<1x1x32xf32>
    %15 = vector.broadcast %14 : vector<1x1x32xf32> to vector<1x169x32xf32>
    %16 = arith.mulf %6, %15 : vector<1x169x32xf32>
    %cst_6 = arith.constant 0.000000e+00 : f32
    %17 = vector.broadcast %cst_6 : f32 to vector<1x169x32xf32>
    %18 = arith.cmpf oge, %16, %17 : vector<1x169x32xf32>
    %cst_7 = arith.constant 0.00999999977 : f32
    %19 = vector.broadcast %cst_7 : f32 to vector<1x169x32xf32>
    %20 = arith.mulf %19, %16 : vector<1x169x32xf32>
    %21 = arith.select %18, %16, %20 : vector<1x169x32xi1>, vector<1x169x32xf32>
    %c0_8 = arith.constant 0 : index
    %c0_9 = arith.constant 0 : index
    %c0_10 = arith.constant 0 : index
    %22 = vector.load %arg2[%c0_8, %c0_9, %c0_10] : memref<1x169x32xf32, #tpu.memory_space<vmem>>, vector<1x169x32xf32>
    tpu.vector_store %arg2[%c0_8, %c0_9, %c0_10], %21 {strides = array<i32>} : memref<1x169x32xf32, #tpu.memory_space<vmem>>, vector<1x169x32xf32>,
    return
  }
  func.func @transform_0(%arg0: i32) -> (i32, i32, i32) {
    %c0_i32 = arith.constant 0 : i32
    %c0_i32_0 = arith.constant 0 : i32
    %c0_i32_1 = arith.constant 0 : i32
    return %arg0, %c0_i32, %c0_i32_0 : i32, i32, i32
  }
  func.func @transform_1(%arg0: i32) -> (i32, i32, i32) {
    %c0_i32 = arith.constant 0 : i32
    %c0_i32_0 = arith.constant 0 : i32
    %c0_i32_1 = arith.constant 0 : i32
    return %arg0, %c0_i32, %c0_i32_0 : i32, i32, i32
  }
}

module attributes {stable_mosaic.version = 11 : i64} {
  func.func @_gemm_kernel(%arg0: i32, %arg1: i32, %arg2: i32, %arg3: memref<56x128xf32, #tpu.memory_space<vmem>>, %arg4: memref<128x128xf32, #tpu.memory_space<vmem>>, %arg5: memref<1x128xf32, #tpu.memory_space<vmem>>, %arg6: memref<56x128xf32, #tpu.memory_space<vmem>>, %arg7: memref<56x128xf32, #tpu.memory_space<vmem>>) attributes {dimension_semantics = [#tpu.dimension_semantics<parallel>, #tpu.dimension_semantics<parallel>, #tpu.dimension_semantics<arbitrary>], iteration_bounds = array<i64: 1, 1, 13>, scalar_prefetch = 0 : i64, scratch_operands = 1 : i64, tpu.core_type = #tpu.core_type<tc>, window_params = [{transform_indices = @transform_0, window_bounds = array<i64: 56, 128>}, {transform_indices = @transform_1, window_bounds = array<i64: 128, 128>}, {transform_indices = @transform_2, window_bounds = array<i64: 1, 128>}, {transform_indices = @transform_3, window_bounds = array<i64: 56, 128>}]} {
    %c0_i32 = arith.constant 0 : i32
    %0 = arith.cmpi eq, %arg2, %c0_i32 : i32
    %1 = arith.extui %0 : i1 to i32
    %c0_i32_0 = arith.constant 0 : i32
    %2 = arith.cmpi ne, %1, %c0_i32_0 : i32
    scf.if %2 {
      %cst_9 = arith.constant 0.000000e+00 : f32
      %12 = vector.broadcast %cst_9 : f32 to vector<56x128xf32>
      %c0_10 = arith.constant 0 : index
      %c0_11 = arith.constant 0 : index
      %13 = vector.load %arg7[%c0_10, %c0_11] : memref<56x128xf32, #tpu.memory_space<vmem>>, vector<56x128xf32>
      tpu.vector_store %arg7[%c0_10, %c0_11], %12 {strides = array<i32>} : memref<56x128xf32, #tpu.memory_space<vmem>>, vector<56x128xf32>,
    } else {
    }
    %c0 = arith.constant 0 : index
    %c0_1 = arith.constant 0 : index
    %3 = vector.load %arg7[%c0, %c0_1] : memref<56x128xf32, #tpu.memory_space<vmem>>, vector<56x128xf32>
    %c0_2 = arith.constant 0 : index
    %c0_3 = arith.constant 0 : index
    %4 = vector.load %arg3[%c0_2, %c0_3] : memref<56x128xf32, #tpu.memory_space<vmem>>, vector<56x128xf32>
    %c0_4 = arith.constant 0 : index
    %c0_5 = arith.constant 0 : index
    %5 = vector.load %arg4[%c0_4, %c0_5] : memref<128x128xf32, #tpu.memory_space<vmem>>, vector<128x128xf32>
    %cst = arith.constant dense<0.000000e+00> : vector<56x128xf32>
    %6 = tpu.matmul %4, %5, %cst {dimension_numbers = #tpu.dot_dimension_numbers<[1], [0], [0], [1], [0, 0, 1, 1], [], []>} : vector<56x128xf32>, vector<128x128xf32>, vector<56x128xf32> -> vector<56x128xf32>
    %7 = arith.addf %3, %6 : vector<56x128xf32>
    %c0_6 = arith.constant 0 : index
    %c0_7 = arith.constant 0 : index
    %8 = vector.load %arg7[%c0_6, %c0_7] : memref<56x128xf32, #tpu.memory_space<vmem>>, vector<56x128xf32>
    tpu.vector_store %arg7[%c0_6, %c0_7], %7 {strides = array<i32>} : memref<56x128xf32, #tpu.memory_space<vmem>>, vector<56x128xf32>,
    %c12_i32 = arith.constant 12 : i32
    %9 = arith.cmpi eq, %arg2, %c12_i32 : i32
    %10 = arith.extui %9 : i1 to i32
    %c0_i32_8 = arith.constant 0 : i32
    %11 = arith.cmpi ne, %10, %c0_i32_8 : i32
    scf.if %11 {
      %c0_9 = arith.constant 0 : index
      %c0_10 = arith.constant 0 : index
      %12 = vector.load %arg7[%c0_9, %c0_10] : memref<56x128xf32, #tpu.memory_space<vmem>>, vector<56x128xf32>
      %c0_11 = arith.constant 0 : index
      %c0_12 = arith.constant 0 : index
      %13 = vector.load %arg5[%c0_11, %c0_12] : memref<1x128xf32, #tpu.memory_space<vmem>>, vector<1x128xf32>
      %14 = vector.broadcast %13 : vector<1x128xf32> to vector<56x128xf32>
      %15 = arith.addf %12, %14 : vector<56x128xf32>
      %c0_13 = arith.constant 0 : index
      %c0_14 = arith.constant 0 : index
      %16 = vector.load %arg6[%c0_13, %c0_14] : memref<56x128xf32, #tpu.memory_space<vmem>>, vector<56x128xf32>
      tpu.vector_store %arg6[%c0_13, %c0_14], %15 {strides = array<i32>} : memref<56x128xf32, #tpu.memory_space<vmem>>, vector<56x128xf32>,
    } else {
    }
    return
  }
  func.func @transform_0(%arg0: i32, %arg1: i32, %arg2: i32) -> (i32, i32) {
    %c0_i32 = arith.constant 0 : i32
    return %arg0, %arg2 : i32, i32
  }
  func.func @transform_1(%arg0: i32, %arg1: i32, %arg2: i32) -> (i32, i32) {
    %c0_i32 = arith.constant 0 : i32
    return %arg2, %arg1 : i32, i32
  }
  func.func @transform_2(%arg0: i32, %arg1: i32, %arg2: i32) -> (i32, i32) {
    %c0_i32 = arith.constant 0 : i32
    %c0_i32_0 = arith.constant 0 : i32
    return %c0_i32, %arg1 : i32, i32
  }
  func.func @transform_3(%arg0: i32, %arg1: i32, %arg2: i32) -> (i32, i32) {
    %c0_i32 = arith.constant 0 : i32
    return %arg0, %arg1 : i32, i32
  }
}

module attributes {stable_mosaic.version = 11 : i64} {
  func.func @_inorm_leaky_kernel(%arg0: i32, %arg1: memref<1x25x32xf32, #tpu.memory_space<vmem>>, %arg2: memref<1x25x32xf32, #tpu.memory_space<vmem>>) attributes {dimension_semantics = [#tpu.dimension_semantics<parallel>], iteration_bounds = array<i64: 2>, scalar_prefetch = 0 : i64, scratch_operands = 0 : i64, tpu.core_type = #tpu.core_type<tc>, window_params = [{transform_indices = @transform_0, window_bounds = array<i64: 1, 25, 32>}, {transform_indices = @transform_1, window_bounds = array<i64: 1, 25, 32>}]} {
    %c0 = arith.constant 0 : index
    %c0_0 = arith.constant 0 : index
    %c0_1 = arith.constant 0 : index
    %0 = vector.load %arg1[%c0, %c0_0, %c0_1] : memref<1x25x32xf32, #tpu.memory_space<vmem>>, vector<1x25x32xf32>
    %cst = arith.constant dense<0.000000e+00> : vector<1x32xf32>
    %1 = vector.multi_reduction <add>, %0, %cst [1] : vector<1x25x32xf32> to vector<1x32xf32>
    %2 = vector.shape_cast %1 : vector<1x32xf32> to vector<1x1x32xf32>
    %cst_2 = arith.constant 2.500000e+01 : f32
    %3 = vector.broadcast %cst_2 : f32 to vector<1x1x32xf32>
    %4 = arith.divf %2, %3 : vector<1x1x32xf32>
    %5 = vector.broadcast %4 : vector<1x1x32xf32> to vector<1x25x32xf32>
    %6 = arith.subf %0, %5 : vector<1x25x32xf32>
    %7 = arith.mulf %6, %6 : vector<1x25x32xf32>
    %cst_3 = arith.constant dense<0.000000e+00> : vector<1x32xf32>
    %8 = vector.multi_reduction <add>, %7, %cst_3 [1] : vector<1x25x32xf32> to vector<1x32xf32>
    %9 = vector.shape_cast %8 : vector<1x32xf32> to vector<1x1x32xf32>
    %cst_4 = arith.constant 2.500000e+01 : f32
    %10 = vector.broadcast %cst_4 : f32 to vector<1x1x32xf32>
    %11 = arith.divf %9, %10 : vector<1x1x32xf32>
    %cst_5 = arith.constant 9.99999974E-6 : f32
    %12 = vector.broadcast %cst_5 : f32 to vector<1x1x32xf32>
    %13 = arith.addf %11, %12 : vector<1x1x32xf32>
    %14 = math.rsqrt %13 : vector<1x1x32xf32>
    %15 = vector.broadcast %14 : vector<1x1x32xf32> to vector<1x25x32xf32>
    %16 = arith.mulf %6, %15 : vector<1x25x32xf32>
    %cst_6 = arith.constant 0.000000e+00 : f32
    %17 = vector.broadcast %cst_6 : f32 to vector<1x25x32xf32>
    %18 = arith.cmpf oge, %16, %17 : vector<1x25x32xf32>
    %cst_7 = arith.constant 0.00999999977 : f32
    %19 = vector.broadcast %cst_7 : f32 to vector<1x25x32xf32>
    %20 = arith.mulf %19, %16 : vector<1x25x32xf32>
    %21 = arith.select %18, %16, %20 : vector<1x25x32xi1>, vector<1x25x32xf32>
    %c0_8 = arith.constant 0 : index
    %c0_9 = arith.constant 0 : index
    %c0_10 = arith.constant 0 : index
    %22 = vector.load %arg2[%c0_8, %c0_9, %c0_10] : memref<1x25x32xf32, #tpu.memory_space<vmem>>, vector<1x25x32xf32>
    tpu.vector_store %arg2[%c0_8, %c0_9, %c0_10], %21 {strides = array<i32>} : memref<1x25x32xf32, #tpu.memory_space<vmem>>, vector<1x25x32xf32>,
    return
  }
  func.func @transform_0(%arg0: i32) -> (i32, i32, i32) {
    %c0_i32 = arith.constant 0 : i32
    %c0_i32_0 = arith.constant 0 : i32
    %c0_i32_1 = arith.constant 0 : i32
    return %arg0, %c0_i32, %c0_i32_0 : i32, i32, i32
  }
  func.func @transform_1(%arg0: i32) -> (i32, i32, i32) {
    %c0_i32 = arith.constant 0 : i32
    %c0_i32_0 = arith.constant 0 : i32
    %c0_i32_1 = arith.constant 0 : i32
    return %arg0, %c0_i32, %c0_i32_0 : i32, i32, i32
  }
}

module attributes {stable_mosaic.version = 11 : i64} {
  func.func @_gemm_kernel(%arg0: i32, %arg1: i32, %arg2: i32, %arg3: memref<8x512xf32, #tpu.memory_space<vmem>>, %arg4: memref<512x128xf32, #tpu.memory_space<vmem>>, %arg5: memref<1x128xf32, #tpu.memory_space<vmem>>, %arg6: memref<8x128xf32, #tpu.memory_space<vmem>>, %arg7: memref<8x128xf32, #tpu.memory_space<vmem>>) attributes {dimension_semantics = [#tpu.dimension_semantics<parallel>, #tpu.dimension_semantics<parallel>, #tpu.dimension_semantics<arbitrary>], iteration_bounds = array<i64: 1, 1, 1>, scalar_prefetch = 0 : i64, scratch_operands = 1 : i64, tpu.core_type = #tpu.core_type<tc>, window_params = [{transform_indices = @transform_0, window_bounds = array<i64: 8, 512>}, {transform_indices = @transform_1, window_bounds = array<i64: 512, 128>}, {transform_indices = @transform_2, window_bounds = array<i64: 1, 128>}, {transform_indices = @transform_3, window_bounds = array<i64: 8, 128>}]} {
    %c0_i32 = arith.constant 0 : i32
    %0 = arith.cmpi eq, %arg2, %c0_i32 : i32
    %1 = arith.extui %0 : i1 to i32
    %c0_i32_0 = arith.constant 0 : i32
    %2 = arith.cmpi ne, %1, %c0_i32_0 : i32
    scf.if %2 {
      %cst_10 = arith.constant 0.000000e+00 : f32
      %12 = vector.broadcast %cst_10 : f32 to vector<8x128xf32>
      %c0_11 = arith.constant 0 : index
      %c0_12 = arith.constant 0 : index
      %13 = vector.load %arg7[%c0_11, %c0_12] : memref<8x128xf32, #tpu.memory_space<vmem>>, vector<8x128xf32>
      tpu.vector_store %arg7[%c0_11, %c0_12], %12 {strides = array<i32>} : memref<8x128xf32, #tpu.memory_space<vmem>>, vector<8x128xf32>,
    } else {
    }
    %c0 = arith.constant 0 : index
    %c0_1 = arith.constant 0 : index
    %3 = vector.load %arg7[%c0, %c0_1] : memref<8x128xf32, #tpu.memory_space<vmem>>, vector<8x128xf32>
    %c0_2 = arith.constant 0 : index
    %c0_3 = arith.constant 0 : index
    %4 = vector.load %arg3[%c0_2, %c0_3] : memref<8x512xf32, #tpu.memory_space<vmem>>, vector<8x512xf32>
    %c0_4 = arith.constant 0 : index
    %c0_5 = arith.constant 0 : index
    %5 = vector.load %arg4[%c0_4, %c0_5] : memref<512x128xf32, #tpu.memory_space<vmem>>, vector<512x128xf32>
    %cst = arith.constant dense<0.000000e+00> : vector<8x128xf32>
    %6 = tpu.matmul %4, %5, %cst {dimension_numbers = #tpu.dot_dimension_numbers<[1], [0], [0], [1], [0, 0, 1, 1], [], []>} : vector<8x512xf32>, vector<512x128xf32>, vector<8x128xf32> -> vector<8x128xf32>
    %7 = arith.addf %3, %6 : vector<8x128xf32>
    %c0_6 = arith.constant 0 : index
    %c0_7 = arith.constant 0 : index
    %8 = vector.load %arg7[%c0_6, %c0_7] : memref<8x128xf32, #tpu.memory_space<vmem>>, vector<8x128xf32>
    tpu.vector_store %arg7[%c0_6, %c0_7], %7 {strides = array<i32>} : memref<8x128xf32, #tpu.memory_space<vmem>>, vector<8x128xf32>,
    %c0_i32_8 = arith.constant 0 : i32
    %9 = arith.cmpi eq, %arg2, %c0_i32_8 : i32
    %10 = arith.extui %9 : i1 to i32
    %c0_i32_9 = arith.constant 0 : i32
    %11 = arith.cmpi ne, %10, %c0_i32_9 : i32
    scf.if %11 {
      %c0_10 = arith.constant 0 : index
      %c0_11 = arith.constant 0 : index
      %12 = vector.load %arg7[%c0_10, %c0_11] : memref<8x128xf32, #tpu.memory_space<vmem>>, vector<8x128xf32>
      %c0_12 = arith.constant 0 : index
      %c0_13 = arith.constant 0 : index
      %13 = vector.load %arg5[%c0_12, %c0_13] : memref<1x128xf32, #tpu.memory_space<vmem>>, vector<1x128xf32>
      %14 = vector.broadcast %13 : vector<1x128xf32> to vector<8x128xf32>
      %15 = arith.addf %12, %14 : vector<8x128xf32>
      %cst_14 = arith.constant 0.000000e+00 : f32
      %16 = vector.broadcast %cst_14 : f32 to vector<8x128xf32>
      %17 = arith.cmpf oge, %15, %16 : vector<8x128xf32>
      %cst_15 = arith.constant 0.00999999977 : f32
      %18 = vector.broadcast %cst_15 : f32 to vector<8x128xf32>
      %19 = arith.mulf %18, %15 : vector<8x128xf32>
      %20 = arith.select %17, %15, %19 : vector<8x128xi1>, vector<8x128xf32>
      %c0_16 = arith.constant 0 : index
      %c0_17 = arith.constant 0 : index
      %21 = vector.load %arg6[%c0_16, %c0_17] : memref<8x128xf32, #tpu.memory_space<vmem>>, vector<8x128xf32>
      tpu.vector_store %arg6[%c0_16, %c0_17], %20 {strides = array<i32>} : memref<8x128xf32, #tpu.memory_space<vmem>>, vector<8x128xf32>,
    } else {
    }
    return
  }
  func.func @transform_0(%arg0: i32, %arg1: i32, %arg2: i32) -> (i32, i32) {
    %c0_i32 = arith.constant 0 : i32
    return %arg0, %arg2 : i32, i32
  }
  func.func @transform_1(%arg0: i32, %arg1: i32, %arg2: i32) -> (i32, i32) {
    %c0_i32 = arith.constant 0 : i32
    return %arg2, %arg1 : i32, i32
  }
  func.func @transform_2(%arg0: i32, %arg1: i32, %arg2: i32) -> (i32, i32) {
    %c0_i32 = arith.constant 0 : i32
    %c0_i32_0 = arith.constant 0 : i32
    return %c0_i32, %arg1 : i32, i32
  }
  func.func @transform_3(%arg0: i32, %arg1: i32, %arg2: i32) -> (i32, i32) {
    %c0_i32 = arith.constant 0 : i32
    return %arg0, %arg1 : i32, i32
  }
}

module attributes {stable_mosaic.version = 11 : i64} {
  func.func @_gemm_kernel(%arg0: i32, %arg1: i32, %arg2: i32, %arg3: memref<8x128xf32, #tpu.memory_space<vmem>>, %arg4: memref<128x128xf32, #tpu.memory_space<vmem>>, %arg5: memref<1x128xf32, #tpu.memory_space<vmem>>, %arg6: memref<8x128xf32, #tpu.memory_space<vmem>>, %arg7: memref<8x128xf32, #tpu.memory_space<vmem>>) attributes {dimension_semantics = [#tpu.dimension_semantics<parallel>, #tpu.dimension_semantics<parallel>, #tpu.dimension_semantics<arbitrary>], iteration_bounds = array<i64: 1, 1, 1>, scalar_prefetch = 0 : i64, scratch_operands = 1 : i64, tpu.core_type = #tpu.core_type<tc>, window_params = [{transform_indices = @transform_0, window_bounds = array<i64: 8, 128>}, {transform_indices = @transform_1, window_bounds = array<i64: 128, 128>}, {transform_indices = @transform_2, window_bounds = array<i64: 1, 128>}, {transform_indices = @transform_3, window_bounds = array<i64: 8, 128>}]} {
    %c0_i32 = arith.constant 0 : i32
    %0 = arith.cmpi eq, %arg2, %c0_i32 : i32
    %1 = arith.extui %0 : i1 to i32
    %c0_i32_0 = arith.constant 0 : i32
    %2 = arith.cmpi ne, %1, %c0_i32_0 : i32
    scf.if %2 {
      %cst_10 = arith.constant 0.000000e+00 : f32
      %12 = vector.broadcast %cst_10 : f32 to vector<8x128xf32>
      %c0_11 = arith.constant 0 : index
      %c0_12 = arith.constant 0 : index
      %13 = vector.load %arg7[%c0_11, %c0_12] : memref<8x128xf32, #tpu.memory_space<vmem>>, vector<8x128xf32>
      tpu.vector_store %arg7[%c0_11, %c0_12], %12 {strides = array<i32>} : memref<8x128xf32, #tpu.memory_space<vmem>>, vector<8x128xf32>,
    } else {
    }
    %c0 = arith.constant 0 : index
    %c0_1 = arith.constant 0 : index
    %3 = vector.load %arg7[%c0, %c0_1] : memref<8x128xf32, #tpu.memory_space<vmem>>, vector<8x128xf32>
    %c0_2 = arith.constant 0 : index
    %c0_3 = arith.constant 0 : index
    %4 = vector.load %arg3[%c0_2, %c0_3] : memref<8x128xf32, #tpu.memory_space<vmem>>, vector<8x128xf32>
    %c0_4 = arith.constant 0 : index
    %c0_5 = arith.constant 0 : index
    %5 = vector.load %arg4[%c0_4, %c0_5] : memref<128x128xf32, #tpu.memory_space<vmem>>, vector<128x128xf32>
    %cst = arith.constant dense<0.000000e+00> : vector<8x128xf32>
    %6 = tpu.matmul %4, %5, %cst {dimension_numbers = #tpu.dot_dimension_numbers<[1], [0], [0], [1], [0, 0, 1, 1], [], []>} : vector<8x128xf32>, vector<128x128xf32>, vector<8x128xf32> -> vector<8x128xf32>
    %7 = arith.addf %3, %6 : vector<8x128xf32>
    %c0_6 = arith.constant 0 : index
    %c0_7 = arith.constant 0 : index
    %8 = vector.load %arg7[%c0_6, %c0_7] : memref<8x128xf32, #tpu.memory_space<vmem>>, vector<8x128xf32>
    tpu.vector_store %arg7[%c0_6, %c0_7], %7 {strides = array<i32>} : memref<8x128xf32, #tpu.memory_space<vmem>>, vector<8x128xf32>,
    %c0_i32_8 = arith.constant 0 : i32
    %9 = arith.cmpi eq, %arg2, %c0_i32_8 : i32
    %10 = arith.extui %9 : i1 to i32
    %c0_i32_9 = arith.constant 0 : i32
    %11 = arith.cmpi ne, %10, %c0_i32_9 : i32
    scf.if %11 {
      %c0_10 = arith.constant 0 : index
      %c0_11 = arith.constant 0 : index
      %12 = vector.load %arg7[%c0_10, %c0_11] : memref<8x128xf32, #tpu.memory_space<vmem>>, vector<8x128xf32>
      %c0_12 = arith.constant 0 : index
      %c0_13 = arith.constant 0 : index
      %13 = vector.load %arg5[%c0_12, %c0_13] : memref<1x128xf32, #tpu.memory_space<vmem>>, vector<1x128xf32>
      %14 = vector.broadcast %13 : vector<1x128xf32> to vector<8x128xf32>
      %15 = arith.addf %12, %14 : vector<8x128xf32>
      %c0_14 = arith.constant 0 : index
      %c0_15 = arith.constant 0 : index
      %16 = vector.load %arg6[%c0_14, %c0_15] : memref<8x128xf32, #tpu.memory_space<vmem>>, vector<8x128xf32>
      tpu.vector_store %arg6[%c0_14, %c0_15], %15 {strides = array<i32>} : memref<8x128xf32, #tpu.memory_space<vmem>>, vector<8x128xf32>,
    } else {
    }
    return
  }
  func.func @transform_0(%arg0: i32, %arg1: i32, %arg2: i32) -> (i32, i32) {
    %c0_i32 = arith.constant 0 : i32
    return %arg0, %arg2 : i32, i32
  }
  func.func @transform_1(%arg0: i32, %arg1: i32, %arg2: i32) -> (i32, i32) {
    %c0_i32 = arith.constant 0 : i32
    return %arg2, %arg1 : i32, i32
  }
  func.func @transform_2(%arg0: i32, %arg1: i32, %arg2: i32) -> (i32, i32) {
    %c0_i32 = arith.constant 0 : i32
    %c0_i32_0 = arith.constant 0 : i32
    return %c0_i32, %arg1 : i32, i32
  }
  func.func @transform_3(%arg0: i32, %arg1: i32, %arg2: i32) -> (i32, i32) {
    %c0_i32 = arith.constant 0 : i32
    return %arg0, %arg1 : i32, i32
  }
}

</mosaic_0001>

<bundles_post_ra>
// kernel: dis_content_forward.8
= control target key start
LH: loop header
LB: loop body
LE: loop exit
PB: predicated region body
PF: predicated region fallthrough
CT: control target
= control target key end

     0   :  { %s1127_s12 = smov 0   ;;  %s1129_s13 = smov 0   ;;  %s1412_s0 = inlined_call_operand.vmem [shape: f32[2048,1664], index: 0, kind: input, shape index: {}]   ;;  %s1413_s1 = inlined_call_operand.vmem [shape: f32[1664,128], index: 1, kind: input, shape index: {}]   ;;  %s1414_s2 = inlined_call_operand.vmem [shape: f32[1,128], index: 2, kind: input, shape index: {}]   ;;  %s1415_s3 = inlined_call_operand.vmem [shape: f32[2048,128], index: 3, kind: output, shape index: {}]  }
   0x1   :  { %s1131_s14 = smov 0   ;;  %s1133_s15 = smov 0  }
   0x2   :  { %s1135_s16 = smov 0   ;;  %s1137_s17 = smov 0  }
   0x3   :  { %s1139_s18 = smov 0  }
   0x4 LB: > { %s25_s19 = sadd.s32 1, %s1096_s16  ;;  %s32_s20 = sadd.s32 1, %s1100_s17  ;;  %s1104_s18 = sphi %s1139_s18, %s13_s18   ;;  %s1100_s17 = sphi %s1137_s17, %s1421_s17   ;;  %s1096_s16 = sphi %s1135_s16, %s1420_s16   ;;  %s1092_s15 = sphi %s1133_s15, %s1419_s15   ;;  %s1088_s14 = sphi %s1131_s14, %s1418_s14   ;;  %s1084_s13 = sphi %s1129_s13, %s1417_s13   ;;  %s1080_s12 = sphi %s1127_s12, %s1416_s12  }
   0x5   : > { %p26_p0 = scmp.ge.s32.totalorder %s25_s19, 13  ;;  %p48_p1 = scmp.ne.s32.totalorder %s1084_s13, %s1080_s12 }
   0x6   : > { %p49_p2 = scmp.eq.s32.totalorder %s1104_s18, 0  ;;  %s41_s24 = sadd.s32 1, %s1084_s13 }
   0x7   : > { %s1423_s19 = smov (%p26_p0, %s25_s19), 0  ;;  %s1425_s20 = smov (!%p26_p0, %s32_s20), %s1100_s17 }
   0x8   : > { %p50_p3 = por %p49_p2, %p48_p1  ;;  %p34_p4 = scmp.ge.s32.totalorder %s1425_s20, 8 }
   0x9   : > { %s37_s21 = ssub.s32 %s1096_s16, %s1423_s19  ;;  %p928_p6 = scmp.ge.s32.totalorder %s1104_s18, 104 }
   0xa   : > { %s1427_s20 = smov (%p34_p4, %s1425_s20), 0 }
   0xb   : > { %s36_s22 = ssub.s32 %s1100_s17, %s1427_s20  ;;  %162 = sbr.rel (%p928_p6) target bundleno = 55 (0x37), region = 20 }
   0xc   : > { %s38_s23 = sor.u32 %s37_s21, %s36_s22 }
   0xd   : > { %p39_p5 = scmp.eq.s32.totalorder %s38_s23, 0 }
   0xf   : > { %s1178_s25 = scalar_select %p39_p5, %s1084_s13, %s41_s24  }
  0x10   : > { %165 = sbr.rel (!%p50_p3) target bundleno = 55 (0x37), region = 24  ;;  %s167_s26 = sand.u32 (%p50_p3), 1, %s1084_s13  }
  0x11   : > { %s991_s27 = smul.u32 (%p50_p3), 416, %s1100_s17  ;;  %s929_s28 = sshll.u32 (%p50_p3), %s167_s26, 8 }
  0x12   : > { %s1192_s7 = scalar_lea.vmem (%p50_p3), [#allocation3], %s929_s28 }
  0x13   : > { %s172_s29 = sadd.s32 (%p50_p3), %s1096_s16, %s991_s27 }
  0x14   : > { %s932_s30 = sshll.u32 (%p50_p3), %s172_s29, 3 }
  0x15   : > { %s1187_s6 = scalar_lea.vmem %s1412_s0, %s932_s30 }
  0x16   : > { %v265_v0 = vld [vmem:[%s1187_s6] sm:$0xff]  ;;  %v267_v1 = vld [vmem:[%s1187_s6 + $0x68] sm:$0xff]  ;;  %v269_v2 = vld [vmem:[%s1187_s6 + $0xd0] sm:$0xff] }
  0x17   : > { %266 = vst [vmem:[%s1192_s7] sm:$0xff] %v265_v0  ;;  %v271_v3 = vld [vmem:[%s1187_s6 + $0x138] sm:$0xff]  ;;  %v273_v4 = vld [vmem:[%s1187_s6 + $0x1a0] sm:$0xff]  ;;  %v275_v5 = vld [vmem:[%s1187_s6 + $0x208] sm:$0xff] }
  0x18   : > { %268 = vst [vmem:[%s1192_s7 + $0x8] sm:$0xff] %v267_v1  ;;  %v277_v6 = vld [vmem:[%s1187_s6 + $0x270] sm:$0xff]  ;;  %v279_v7 = vld [vmem:[%s1187_s6 + $0x2d8] sm:$0xff]  ;;  %v281_v8 = vld [vmem:[%s1187_s6 + $0x340] sm:$0xff] }
  0x19   : > { %270 = vst [vmem:[%s1192_s7 + $0x10] sm:$0xff] %v269_v2  ;;  %v283_v9 = vld [vmem:[%s1187_s6 + $0x3a8] sm:$0xff]  ;;  %v285_v10 = vld [vmem:[%s1187_s6 + $0x410] sm:$0xff]  ;;  %v287_v11 = vld [vmem:[%s1187_s6 + $0x478] sm:$0xff] }
  0x1a   : > { %272 = vst [vmem:[%s1192_s7 + $0x18] sm:$0xff] %v271_v3  ;;  %v289_v12 = vld [vmem:[%s1187_s6 + $0x4e0] sm:$0xff]  ;;  %v291_v13 = vld [vmem:[%s1187_s6 + $0x548] sm:$0xff]  ;;  %v293_v14 = vld [vmem:[%s1187_s6 + $0x5b0] sm:$0xff] }
  0x1b   : > { %274 = vst [vmem:[%s1192_s7 + $0x20] sm:$0xff] %v273_v4  ;;  %v295_v15 = vld [vmem:[%s1187_s6 + $0x618] sm:$0xff]  ;;  %v297_v16 = vld [vmem:[%s1187_s6 + $0x680] sm:$0xff]  ;;  %v299_v17 = vld [vmem:[%s1187_s6 + $0x6e8] sm:$0xff] }
  0x1c   : > { %276 = vst [vmem:[%s1192_s7 + $0x28] sm:$0xff] %v275_v5  ;;  %v301_v18 = vld [vmem:[%s1187_s6 + $0x750] sm:$0xff]  ;;  %v303_v19 = vld [vmem:[%s1187_s6 + $0x7b8] sm:$0xff]  ;;  %v305_v20 = vld [vmem:[%s1187_s6 + $0x820] sm:$0xff] }
  0x1d   : > { %278 = vst [vmem:[%s1192_s7 + $0x30] sm:$0xff] %v277_v6  ;;  %v307_v21 = vld [vmem:[%s1187_s6 + $0x888] sm:$0xff]  ;;  %v309_v22 = vld [vmem:[%s1187_s6 + $0x8f0] sm:$0xff]  ;;  %v311_v23 = vld [vmem:[%s1187_s6 + $0x958] sm:$0xff] }
  0x1e   : > { %280 = vst [vmem:[%s1192_s7 + $0x38] sm:$0xff] %v279_v7  ;;  %v313_v24 = vld [vmem:[%s1187_s6 + $0x9c0] sm:$0xff]  ;;  %v315_v25 = vld [vmem:[%s1187_s6 + $0xa28] sm:$0xff]  ;;  %v317_v26 = vld [vmem:[%s1187_s6 + $0xa90] sm:$0xff] }
  0x1f   : > { %282 = vst [vmem:[%s1192_s7 + $0x40] sm:$0xff] %v281_v8  ;;  %v319_v27 = vld [vmem:[%s1187_s6 + $0xaf8] sm:$0xff]  ;;  %v321_v28 = vld [vmem:[%s1187_s6 + $0xb60] sm:$0xff]  ;;  %v323_v29 = vld [vmem:[%s1187_s6 + $0xbc8] sm:$0xff] }
  0x20   : > { %284 = vst [vmem:[%s1192_s7 + $0x48] sm:$0xff] %v283_v9  ;;  %v325_v30 = vld [vmem:[%s1187_s6 + $0xc30] sm:$0xff]  ;;  %v327_v31 = vld [vmem:[%s1187_s6 + $0xc98] sm:$0xff] }
  0x21   : > { %286 = vst [vmem:[%s1192_s7 + $0x50] sm:$0xff] %v285_v10 }
  0x22   : > { %288 = vst [vmem:[%s1192_s7 + $0x58] sm:$0xff] %v287_v11 }
  0x23   : > { %290 = vst [vmem:[%s1192_s7 + $0x60] sm:$0xff] %v289_v12 }
  0x24   : > { %292 = vst [vmem:[%s1192_s7 + $0x68] sm:$0xff] %v291_v13 }
  0x25   : > { %294 = vst [vmem:[%s1192_s7 + $0x70] sm:$0xff] %v293_v14 }
  0x26   : > { %296 = vst [vmem:[%s1192_s7 + $0x78] sm:$0xff] %v295_v15 }
  0x27   : > { %298 = vst [vmem:[%s1192_s7 + $0x80] sm:$0xff] %v297_v16 }
  0x28   : > { %300 = vst [vmem:[%s1192_s7 + $0x88] sm:$0xff] %v299_v17 }
  0x29   : > { %302 = vst [vmem:[%s1192_s7 + $0x90] sm:$0xff] %v301_v18 }
  0x2a   : > { %304 = vst [vmem:[%s1192_s7 + $0x98] sm:$0xff] %v303_v19 }
  0x2b   : > { %306 = vst [vmem:[%s1192_s7 + $0xa0] sm:$0xff] %v305_v20 }
  0x2c   : > { %308 = vst [vmem:[%s1192_s7 + $0xa8] sm:$0xff] %v307_v21 }
  0x2d   : > { %310 = vst [vmem:[%s1192_s7 + $0xb0] sm:$0xff] %v309_v22 }
  0x2e   : > { %312 = vst [vmem:[%s1192_s7 + $0xb8] sm:$0xff] %v311_v23 }
  0x2f   : > { %314 = vst [vmem:[%s1192_s7 + $0xc0] sm:$0xff] %v313_v24 }
  0x30   : > { %316 = vst [vmem:[%s1192_s7 + $0xc8] sm:$0xff] %v315_v25 }
  0x31   : > { %318 = vst [vmem:[%s1192_s7 + $0xd0] sm:$0xff] %v317_v26 }
  0x32   : > { %320 = vst [vmem:[%s1192_s7 + $0xd8] sm:$0xff] %v319_v27 }
  0x33   : > { %322 = vst [vmem:[%s1192_s7 + $0xe0] sm:$0xff] %v321_v28 }
  0x34   : > { %324 = vst [vmem:[%s1192_s7 + $0xe8] sm:$0xff] %v323_v29 }
  0x35   : > { %326 = vst [vmem:[%s1192_s7 + $0xf0] sm:$0xff] %v325_v30 }
  0x36   : > { %328 = vst [vmem:[%s1192_s7 + $0xf8] sm:$0xff] %v327_v31 }
  0x37 PF: > { %p933_p7 = scmp.ge.s32.totalorder %s1104_s18, 1  ;;  %p345_p8 = scmp.lt.s32.totalorder %s1104_s18, 105 }
  0x39   : > { %p346_p9 = pnand %p933_p7, %p345_p8 }
  0x3a   : > { %s352_s8 = sand.u32 (!%p346_p9), 1, %s1080_s12   ;;  %s935_s9 = sshll.u32 (!%p346_p9), %s1088_s14, 4 }
  0x3b   : > { %349 = sbr.rel (%p346_p9) target bundleno = 364 (0x16c), region = 66  ;;  %s934_s10 = sshll.u32 (!%p346_p9), %s352_s8, 8 }
  0x3c   : > { %p391_p10 = scmp.lt.s32.totalorder (!%p346_p9), %s935_s9, 207  ;;  %s937_s11 = sshll.u32 (!%p346_p9), %s1092_s15, 5 }
  0x3d   : > { %p403_p11 = scmp.lt.s32.totalorder (!%p346_p9), %s937_s11, 255  ;;  %s1270_s12 = scalar_lea.vmem (!%p346_p9), [#allocation3], %s934_s10 }
  0x3e   : > { %p939_p12 = scmp.ne.s32.totalorder (!%p346_p9), %s1088_s14, 0 }
  0x40   : > { %s1429_s9 = smov (!%p391_p10, %s935_s9), 207  ;;  %s1431_s11 = smov (!%p403_p11, %s937_s11), 255 }
  0x41   : > { %s936_s21 = sshll.u32 %s1429_s9, 3  ;;  %s938_s26 = sshll.u32 %s1431_s11, 3 }
  0x42   : > { %s1263_s24 = scalar_lea.vmem %s1413_s1, %s936_s21  ;;  %s1268_s29 = scalar_lea.vmem %s1415_s3, %s938_s26 }
  0x43   : > { %414 = sbr.rel (%p939_p12) target bundleno = 105 (0x69), region = 74 }
  0x48   : > { %v1106_v32 = vmov 0.0  }
  0x49   : > { %415 = vst [vmem:[#allocation2 + $0xb0] sm:$0xff] %v1106_v32 }
  0x4a   : > { %416 = vst [vmem:[#allocation2] sm:$0xff] %v1106_v32 }
  0x4b   : > { %417 = vst [vmem:[#allocation2 + $0xd8] sm:$0xff] %v1106_v32 }
  0x4c   : > { %418 = vst [vmem:[#allocation2 + $0x18] sm:$0xff] %v1106_v32 }
  0x4d   : > { %419 = vst [vmem:[#allocation2 + $0x50] sm:$0xff] %v1106_v32 }
  0x4e   : > { %420 = vst [vmem:[#allocation2 + $0x68] sm:$0xff] %v1106_v32 }
  0x4f   : > { %421 = vst [vmem:[#allocation2 + $0x30] sm:$0xff] %v1106_v32 }
  0x50   : > { %422 = vst [vmem:[#allocation2 + $0x48] sm:$0xff] %v1106_v32 }
  0x51   : > { %423 = vst [vmem:[#allocation2 + $0x80] sm:$0xff] %v1106_v32 }
  0x52   : > { %424 = vst [vmem:[#allocation2 + $0x88] sm:$0xff] %v1106_v32 }
  0x53   : > { %425 = vst [vmem:[#allocation2 + $0xe8] sm:$0xff] %v1106_v32 }
  0x54   : > { %426 = vst [vmem:[#allocation2 + $0xb8] sm:$0xff] %v1106_v32 }
  0x55   : > { %427 = vst [vmem:[#allocation2 + $0x60] sm:$0xff] %v1106_v32 }
  0x56   : > { %428 = vst [vmem:[#allocation2 + $0xf0] sm:$0xff] %v1106_v32 }
  0x57   : > { %429 = vst [vmem:[#allocation2 + $0x8] sm:$0xff] %v1106_v32 }
  0x58   : > { %430 = vst [vmem:[#allocation2 + $0x78] sm:$0xff] %v1106_v32 }
  0x59   : > { %431 = vst [vmem:[#allocation2 + $0x38] sm:$0xff] %v1106_v32 }
  0x5a   : > { %432 = vst [vmem:[#allocation2 + $0x58] sm:$0xff] %v1106_v32 }
  0x5b   : > { %433 = vst [vmem:[#allocation2 + $0x40] sm:$0xff] %v1106_v32 }
  0x5c   : > { %434 = vst [vmem:[#allocation2 + $0xc8] sm:$0xff] %v1106_v32 }
  0x5d   : > { %435 = vst [vmem:[#allocation2 + $0xe0] sm:$0xff] %v1106_v32 }
  0x5e   : > { %436 = vst [vmem:[#allocation2 + $0x90] sm:$0xff] %v1106_v32 }
  0x5f   : > { %437 = vst [vmem:[#allocation2 + $0x70] sm:$0xff] %v1106_v32 }
  0x60   : > { %438 = vst [vmem:[#allocation2 + $0xc0] sm:$0xff] %v1106_v32 }
  0x61   : > { %439 = vst [vmem:[#allocation2 + $0xa8] sm:$0xff] %v1106_v32 }
  0x62   : > { %440 = vst [vmem:[#allocation2 + $0xd0] sm:$0xff] %v1106_v32 }
  0x63   : > { %441 = vst [vmem:[#allocation2 + $0x10] sm:$0xff] %v1106_v32 }
  0x64   : > { %442 = vst [vmem:[#allocation2 + $0x28] sm:$0xff] %v1106_v32 }
  0x65   : > { %443 = vst [vmem:[#allocation2 + $0xa0] sm:$0xff] %v1106_v32 }
  0x66   : > { %444 = vst [vmem:[#allocation2 + $0xf8] sm:$0xff] %v1106_v32 }
  0x67   : > { %445 = vst [vmem:[#allocation2 + $0x20] sm:$0xff] %v1106_v32 }
  0x68   : > { %446 = vst [vmem:[#allocation2 + $0x98] sm:$0xff] %v1106_v32 }
  0x69 PF: > { %v526_v33 = vld [vmem:[%s1263_s24 + $0x78] sm:$0xff]  ;;  %v525_v34 = vld [vmem:[%s1263_s24 + $0x70] sm:$0xff]  ;;  %v524_v35 = vld [vmem:[%s1263_s24 + $0x68] sm:$0xff]  ;;  %p940_p13 = scmp.ne.s32.totalorder %s1088_s14, 12 }
  0x6a   : > { %944 = vmatpush.msra.mxu2 %v526_v33  ;;  %945 = vmatpush.msra.mxu3 %v526_v33  ;;  %v523_v36 = vld [vmem:[%s1263_s24 + $0x60] sm:$0xff]  ;;  %v522_v37 = vld [vmem:[%s1263_s24 + $0x58] sm:$0xff]  ;;  %v521_v38 = vld [vmem:[%s1263_s24 + $0x50] sm:$0xff] }
  0x6b   : > { %527 = vmatpush.msra.mxu0 %v526_v33  ;;  %943 = vmatpush.msra.mxu1 %v526_v33  ;;  %v520_v39 = vld [vmem:[%s1263_s24 + $0x48] sm:$0xff]  ;;  %v519_v40 = vld [vmem:[%s1263_s24 + $0x40] sm:$0xff]  ;;  %v518_v41 = vld [vmem:[%s1263_s24 + $0x38] sm:$0xff] }
  0x6c   : > { %947 = vmatpush.msra.mxu2 %v525_v34  ;;  %948 = vmatpush.msra.mxu3 %v525_v34  ;;  %v517_v42 = vld [vmem:[%s1263_s24 + $0x30] sm:$0xff]  ;;  %v516_v43 = vld [vmem:[%s1263_s24 + $0x28] sm:$0xff]  ;;  %v515_v44 = vld [vmem:[%s1263_s24 + $0x20] sm:$0xff] }
  0x6d   : > { %528 = vmatpush.msra.mxu0 %v525_v34  ;;  %946 = vmatpush.msra.mxu1 %v525_v34  ;;  %v514_v45 = vld [vmem:[%s1263_s24 + $0x18] sm:$0xff]  ;;  %v513_v46 = vld [vmem:[%s1263_s24 + $0x10] sm:$0xff]  ;;  %v512_v47 = vld [vmem:[%s1263_s24 + $0x8] sm:$0xff] }
  0x6e   : > { %950 = vmatpush.msra.mxu2 %v524_v35  ;;  %951 = vmatpush.msra.mxu3 %v524_v35  ;;  %v511_v48 = vld [vmem:[%s1263_s24] sm:$0xff]  ;;  %v496_v53 = vld [vmem:[%s1270_s12 + $0x88] sm:$0xff]  ;;  %v497_v57 = vld [vmem:[%s1270_s12 + $0x90] sm:$0xff] }
  0x6f   : > { %529 = vmatpush.msra.mxu0 %v524_v35  ;;  %949 = vmatpush.msra.mxu1 %v524_v35  ;;  %v495_v49 = vld [vmem:[%s1270_s12 + $0x80] sm:$0xff]  ;;  %v504_v54 = vld [vmem:[%s1270_s12 + $0xc8] sm:$0xff]  ;;  %v505_v58 = vld [vmem:[%s1270_s12 + $0xd0] sm:$0xff] }
  0x70   : > { %953 = vmatpush.msra.mxu2 %v523_v36  ;;  %954 = vmatpush.msra.mxu3 %v523_v36  ;;  %v503_v50 = vld [vmem:[%s1270_s12 + $0xc0] sm:$0xff]  ;;  %v480_v55 = vld [vmem:[%s1270_s12 + $0x8] sm:$0xff]  ;;  %v481_v59 = vld [vmem:[%s1270_s12 + $0x10] sm:$0xff] }
  0x71   : > { %530 = vmatpush.msra.mxu0 %v523_v36  ;;  %952 = vmatpush.msra.mxu1 %v523_v36  ;;  %v479_v51 = vld [vmem:[%s1270_s12] sm:$0xff]  ;;  %v488_v56 = vld [vmem:[%s1270_s12 + $0x48] sm:$0xff]  ;;  %v489_v60 = vld [vmem:[%s1270_s12 + $0x50] sm:$0xff] }
  0x72   : > { %956 = vmatpush.msra.mxu2 %v522_v37  ;;  %957 = vmatpush.msra.mxu3 %v522_v37  ;;  %v487_v52 = vld [vmem:[%s1270_s12 + $0x40] sm:$0xff]  ;;  %v498_v61 = vld [vmem:[%s1270_s12 + $0x98] sm:$0xff]  ;;  %v500_v5 = vld [vmem:[%s1270_s12 + $0xa8] sm:$0xff] }
  0x73   : > { %531 = vmatpush.msra.mxu0 %v522_v37  ;;  %955 = vmatpush.msra.mxu1 %v522_v37  ;;  %v506_v62 = vld [vmem:[%s1270_s12 + $0xd8] sm:$0xff]  ;;  %v499_v1 = vld [vmem:[%s1270_s12 + $0xa0] sm:$0xff]  ;;  %v508_v6 = vld [vmem:[%s1270_s12 + $0xe8] sm:$0xff] }
  0x74   : > { %959 = vmatpush.msra.mxu2 %v521_v38  ;;  %960 = vmatpush.msra.mxu3 %v521_v38  ;;  %v482_v63 = vld [vmem:[%s1270_s12 + $0x18] sm:$0xff]  ;;  %v507_v2 = vld [vmem:[%s1270_s12 + $0xe0] sm:$0xff]  ;;  %v484_v7 = vld [vmem:[%s1270_s12 + $0x28] sm:$0xff] }
  0x75   : > { %532 = vmatpush.msra.mxu0 %v521_v38  ;;  %958 = vmatpush.msra.mxu1 %v521_v38  ;;  %v490_v0 = vld [vmem:[%s1270_s12 + $0x58] sm:$0xff]  ;;  %v483_v3 = vld [vmem:[%s1270_s12 + $0x20] sm:$0xff]  ;;  %v492_v8 = vld [vmem:[%s1270_s12 + $0x68] sm:$0xff] }
  0x76   : > { %962 = vmatpush.msra.mxu2 %v520_v39  ;;  %963 = vmatpush.msra.mxu3 %v520_v39  ;;  %v491_v4 = vld [vmem:[%s1270_s12 + $0x60] sm:$0xff]  ;;  %v501_v9 = vld [vmem:[%s1270_s12 + $0xb0] sm:$0xff]  ;;  %v502_v13 = vld [vmem:[%s1270_s12 + $0xb8] sm:$0xff] }
  0x77   : > { %533 = vmatpush.msra.mxu0 %v520_v39  ;;  %961 = vmatpush.msra.mxu1 %v520_v39  ;;  %v509_v10 = vld [vmem:[%s1270_s12 + $0xf0] sm:$0xff]  ;;  %v510_v14 = vld [vmem:[%s1270_s12 + $0xf8] sm:$0xff]  ;;  %v455_v18 = vld [vmem:[#allocation2 + $0x80] sm:$0xff] }
  0x78   : > { %965 = vmatpush.msra.mxu2 %v519_v40  ;;  %966 = vmatpush.msra.mxu3 %v519_v40  ;;  %v485_v11 = vld [vmem:[%s1270_s12 + $0x30] sm:$0xff]  ;;  %v486_v15 = vld [vmem:[%s1270_s12 + $0x38] sm:$0xff]  ;;  %v471_v24 = vld [vmem:[#allocation2 + $0xa8] sm:$0xff] }
  0x79   : > { %534 = vmatpush.msra.mxu0 %v519_v40  ;;  %964 = vmatpush.msra.mxu1 %v519_v40  ;;  %v493_v12 = vld [vmem:[%s1270_s12 + $0x70] sm:$0xff]  ;;  %v494_v16 = vld [vmem:[%s1270_s12 + $0x78] sm:$0xff]  ;;  %v448_v29 = vld [vmem:[#allocation2] sm:$0xff] }
  0x7a   : > { %968 = vmatpush.msra.mxu2 %v518_v41  ;;  %969 = vmatpush.msra.mxu3 %v518_v41  ;;  %v447_v17 = vld [vmem:[#allocation2 + $0xb0] sm:$0xff]  ;;  %v463_v23 = vld [vmem:[#allocation2 + $0x38] sm:$0xff]  ;;  %v456_v30 = vld [vmem:[#allocation2 + $0x88] sm:$0xff] }
  0x7b   : > { %535 = vmatpush.msra.mxu0 %v518_v41  ;;  %967 = vmatpush.msra.mxu1 %v518_v41  ;;  %v464_v35 = vld [vmem:[#allocation2 + $0x58] sm:$0xff]  ;;  %v472_v36 = vld [vmem:[#allocation2 + $0xd0] sm:$0xff] }
  0x7c   : > { %971 = vmatpush.msra.mxu2 %v517_v42  ;;  %972 = vmatpush.msra.mxu3 %v517_v42  ;;  %v449_v41 = vld [vmem:[#allocation2 + $0xd8] sm:$0xff] }
  0x7d   : > { %536 = vmatpush.msra.mxu0 %v517_v42  ;;  %970 = vmatpush.msra.mxu1 %v517_v42  ;;  %v457_v42 = vld [vmem:[#allocation2 + $0xe8] sm:$0xff] }
  0x7e   : > { %974 = vmatpush.msra.mxu2 %v516_v43  ;;  %975 = vmatpush.msra.mxu3 %v516_v43 }
  0x7f   : > { %537 = vmatpush.msra.mxu0 %v516_v43  ;;  %973 = vmatpush.msra.mxu1 %v516_v43 }
  0x80   : > { %977 = vmatpush.msra.mxu2 %v515_v44  ;;  %978 = vmatpush.msra.mxu3 %v515_v44 }
  0x81   : > { %538 = vmatpush.msra.mxu0 %v515_v44  ;;  %976 = vmatpush.msra.mxu1 %v515_v44 }
  0x82   : > { %980 = vmatpush.msra.mxu2 %v514_v45  ;;  %981 = vmatpush.msra.mxu3 %v514_v45 }
  0x83   : > { %539 = vmatpush.msra.mxu0 %v514_v45  ;;  %979 = vmatpush.msra.mxu1 %v514_v45 }
  0x84   : > { %983 = vmatpush.msra.mxu2 %v513_v46  ;;  %984 = vmatpush.msra.mxu3 %v513_v46 }
  0x85   : > { %540 = vmatpush.msra.mxu0 %v513_v46  ;;  %982 = vmatpush.msra.mxu1 %v513_v46 }
  0x86   : > { %986 = vmatpush.msra.mxu2 %v512_v47  ;;  %987 = vmatpush.msra.mxu3 %v512_v47 }
  0x87   : > { %541 = vmatpush.msra.mxu0 %v512_v47  ;;  %985 = vmatpush.msra.mxu1 %v512_v47  ;;  %v465_v47 = vld [vmem:[#allocation2 + $0x40] sm:$0xff] }
  0x88   : > { %989 = vmatpush.msra.mxu2 %v511_v48  ;;  %990 = vmatpush.msra.mxu3 %v511_v48 }
  0x89   : > { %591 = vmatmul.f32.vlgmr.msra.gmra.mxu2 %v495_v49  ;;  %615 = vmatmul.f32.vlgmr.msra.gmra.mxu3 %v503_v50 }
  0x8a   : > { %542 = vmatpush.msra.mxu0 %v511_v48  ;;  %988 = vmatpush.msra.mxu1 %v511_v48  ;;  %v473_v48 = vld [vmem:[#allocation2 + $0x10] sm:$0xff] }
  0x8b   : > { %543 = vmatmul.f32.vlgmr.msra.gmra.mxu0 %v479_v51  ;;  %567 = vmatmul.f32.vlgmr.msra.gmra.mxu1 %v487_v52 }
  0x91   : > { %594 = vmatmul.f32.gmra.mxu2 %v496_v53  ;;  %618 = vmatmul.f32.gmra.mxu3 %v504_v54  ;;  %v450_v53 = vld [vmem:[#allocation2 + $0x18] sm:$0xff] }
  0x92   : > { %v458_v54 = vld [vmem:[#allocation2 + $0xb8] sm:$0xff] }
  0x93   : > { %546 = vmatmul.f32.gmra.mxu0 %v480_v55  ;;  %570 = vmatmul.f32.gmra.mxu1 %v488_v56 }
  0x99   : > { %597 = vmatmul.f32.gmra.mxu2 %v497_v57  ;;  %621 = vmatmul.f32.gmra.mxu3 %v505_v58 }
  0x9b   : > { %549 = vmatmul.f32.gmra.mxu0 %v481_v59  ;;  %573 = vmatmul.f32.gmra.mxu1 %v489_v60  ;;  %v466_v59 = vld [vmem:[#allocation2 + $0xc8] sm:$0xff] }
  0x9c   : > { %v474_v60 = vld [vmem:[#allocation2 + $0x28] sm:$0xff] }
  0xa1   : > { %600 = vmatmul.f32.gmra.mxu2 %v498_v61  ;;  %624 = vmatmul.f32.gmra.mxu3 %v506_v62 }
  0xa3   : > { %552 = vmatmul.f32.gmra.mxu0 %v482_v63  ;;  %576 = vmatmul.f32.gmra.mxu1 %v490_v0 }
  0xa9   : > { %603 = vmatmul.f32.gmra.mxu2 %v499_v1  ;;  %627 = vmatmul.f32.gmra.mxu3 %v507_v2  ;;  %v451_v1 = vld [vmem:[#allocation2 + $0x50] sm:$0xff]  ;;  %v459_v2 = vld [vmem:[#allocation2 + $0x60] sm:$0xff] }
  0xab   : > { %555 = vmatmul.f32.gmra.mxu0 %v483_v3  ;;  %579 = vmatmul.f32.gmra.mxu1 %v491_v4 }
  0xb1   : > { %606 = vmatmul.f32.gmra.mxu2 %v500_v5  ;;  %630 = vmatmul.f32.gmra.mxu3 %v508_v6 }
  0xb3   : > { %558 = vmatmul.f32.gmra.mxu0 %v484_v7  ;;  %582 = vmatmul.f32.gmra.mxu1 %v492_v8  ;;  %v467_v7 = vld [vmem:[#allocation2 + $0xe0] sm:$0xff] }
  0xb4   : > { %v475_v8 = vld [vmem:[#allocation2 + $0xa0] sm:$0xff] }
  0xb9   : > { %609 = vmatmul.f32.gmra.mxu2 %v501_v9  ;;  %633 = vmatmul.f32.gmra.mxu3 %v509_v10 }
  0xbb   : > { %561 = vmatmul.f32.gmra.mxu0 %v485_v11  ;;  %585 = vmatmul.f32.gmra.mxu1 %v493_v12 }
  0xc1   : > { %612 = vmatmul.f32.gmra.mxu2 %v502_v13  ;;  %636 = vmatmul.f32.gmra.mxu3 %v510_v14  ;;  %v452_v13 = vld [vmem:[#allocation2 + $0x68] sm:$0xff]  ;;  %v460_v14 = vld [vmem:[#allocation2 + $0xf0] sm:$0xff] }
  0xc3   : > { %564 = vmatmul.f32.gmra.mxu0 %v486_v15  ;;  %588 = vmatmul.f32.gmra.mxu1 %v494_v16 }
 0x108   : > { %v544_v19 = vpop.f32.mrf.mxu0  ;;  %v568_v20 = vpop.f32.mrf.mxu1 }
 0x109   : > { %v640_v21 = vadd.f32 %v544_v19, %v447_v17  ;;  %v648_v22 = vadd.f32 %v568_v20, %v455_v18  ;;  %v468_v19 = vld [vmem:[#allocation2 + $0x90] sm:$0xff]  ;;  %v476_v20 = vld [vmem:[#allocation2 + $0xf8] sm:$0xff] }
 0x10b   : > { %672 = vst [vmem:[#allocation2 + $0xb0] sm:$0xff] %v640_v21 }
 0x10c   : > { %680 = vst [vmem:[#allocation2 + $0x80] sm:$0xff] %v648_v22  ;;  %v592_v25 = vpop.f32.mrf.mxu2  ;;  %v616_v26 = vpop.f32.mrf.mxu3 }
 0x10d   : > { %v656_v27 = vadd.f32 %v592_v25, %v463_v23  ;;  %v664_v28 = vadd.f32 %v616_v26, %v471_v24  ;;  %v453_v25 = vld [vmem:[#allocation2 + $0x30] sm:$0xff]  ;;  %v461_v26 = vld [vmem:[#allocation2 + $0x8] sm:$0xff] }
 0x10f   : > { %688 = vst [vmem:[#allocation2 + $0x38] sm:$0xff] %v656_v27 }
 0x110   : > { %696 = vst [vmem:[#allocation2 + $0xa8] sm:$0xff] %v664_v28  ;;  %v547_v31 = vpop.f32.mrf.mxu0  ;;  %v571_v32 = vpop.f32.mrf.mxu1 }
 0x111   : > { %v641_v33 = vadd.f32 %v547_v31, %v448_v29  ;;  %v649_v34 = vadd.f32 %v571_v32, %v456_v30  ;;  %v469_v31 = vld [vmem:[#allocation2 + $0x70] sm:$0xff]  ;;  %v477_v32 = vld [vmem:[#allocation2 + $0x20] sm:$0xff] }
 0x113   : > { %673 = vst [vmem:[#allocation2] sm:$0xff] %v641_v33 }
 0x114   : > { %681 = vst [vmem:[#allocation2 + $0x88] sm:$0xff] %v649_v34  ;;  %v595_v37 = vpop.f32.mrf.mxu2  ;;  %v619_v38 = vpop.f32.mrf.mxu3 }
 0x115   : > { %v657_v39 = vadd.f32 %v595_v37, %v464_v35  ;;  %v665_v40 = vadd.f32 %v619_v38, %v472_v36  ;;  %v454_v37 = vld [vmem:[#allocation2 + $0x48] sm:$0xff]  ;;  %v462_v38 = vld [vmem:[#allocation2 + $0x78] sm:$0xff] }
 0x117   : > { %689 = vst [vmem:[#allocation2 + $0x58] sm:$0xff] %v657_v39 }
 0x118   : > { %697 = vst [vmem:[#allocation2 + $0xd0] sm:$0xff] %v665_v40  ;;  %v550_v43 = vpop.f32.mrf.mxu0  ;;  %v574_v44 = vpop.f32.mrf.mxu1 }
 0x119   : > { %v642_v45 = vadd.f32 %v550_v43, %v449_v41  ;;  %v650_v46 = vadd.f32 %v574_v44, %v457_v42  ;;  %v470_v43 = vld [vmem:[#allocation2 + $0xc0] sm:$0xff]  ;;  %v478_v44 = vld [vmem:[#allocation2 + $0x98] sm:$0xff] }
 0x11b   : > { %674 = vst [vmem:[#allocation2 + $0xd8] sm:$0xff] %v642_v45 }
 0x11c   : > { %682 = vst [vmem:[#allocation2 + $0xe8] sm:$0xff] %v650_v46  ;;  %v598_v49 = vpop.f32.mrf.mxu2  ;;  %v622_v50 = vpop.f32.mrf.mxu3 }
 0x11d   : > { %v658_v51 = vadd.f32 %v598_v49, %v465_v47  ;;  %v666_v52 = vadd.f32 %v622_v50, %v473_v48 }
 0x11f   : > { %690 = vst [vmem:[#allocation2 + $0x40] sm:$0xff] %v658_v51 }
 0x120   : > { %698 = vst [vmem:[#allocation2 + $0x10] sm:$0xff] %v666_v52  ;;  %v553_v55 = vpop.f32.mrf.mxu0  ;;  %v577_v56 = vpop.f32.mrf.mxu1 }
 0x121   : > { %v643_v57 = vadd.f32 %v553_v55, %v450_v53  ;;  %v651_v58 = vadd.f32 %v577_v56, %v458_v54 }
 0x123   : > { %675 = vst [vmem:[#allocation2 + $0x18] sm:$0xff] %v643_v57 }
 0x124   : > { %683 = vst [vmem:[#allocation2 + $0xb8] sm:$0xff] %v651_v58  ;;  %v601_v61 = vpop.f32.mrf.mxu2  ;;  %v625_v62 = vpop.f32.mrf.mxu3 }
 0x125   : > { %v659_v63 = vadd.f32 %v601_v61, %v466_v59  ;;  %v667_v0 = vadd.f32 %v625_v62, %v474_v60 }
 0x127   : > { %691 = vst [vmem:[#allocation2 + $0xc8] sm:$0xff] %v659_v63 }
 0x128   : > { %699 = vst [vmem:[#allocation2 + $0x28] sm:$0xff] %v667_v0  ;;  %v556_v3 = vpop.f32.mrf.mxu0  ;;  %v580_v4 = vpop.f32.mrf.mxu1 }
 0x129   : > { %v644_v5 = vadd.f32 %v556_v3, %v451_v1  ;;  %v652_v6 = vadd.f32 %v580_v4, %v459_v2 }
 0x12b   : > { %676 = vst [vmem:[#allocation2 + $0x50] sm:$0xff] %v644_v5 }
 0x12c   : > { %684 = vst [vmem:[#allocation2 + $0x60] sm:$0xff] %v652_v6  ;;  %v604_v9 = vpop.f32.mrf.mxu2  ;;  %v628_v10 = vpop.f32.mrf.mxu3 }
 0x12d   : > { %v660_v11 = vadd.f32 %v604_v9, %v467_v7  ;;  %v668_v12 = vadd.f32 %v628_v10, %v475_v8 }
 0x12f   : > { %692 = vst [vmem:[#allocation2 + $0xe0] sm:$0xff] %v660_v11 }
 0x130   : > { %700 = vst [vmem:[#allocation2 + $0xa0] sm:$0xff] %v668_v12  ;;  %v559_v15 = vpop.f32.mrf.mxu0  ;;  %v583_v16 = vpop.f32.mrf.mxu1 }
 0x131   : > { %v645_v17 = vadd.f32 %v559_v15, %v452_v13  ;;  %v653_v18 = vadd.f32 %v583_v16, %v460_v14 }
 0x133   : > { %677 = vst [vmem:[#allocation2 + $0x68] sm:$0xff] %v645_v17 }
 0x134   : > { %685 = vst [vmem:[#allocation2 + $0xf0] sm:$0xff] %v653_v18  ;;  %v607_v21 = vpop.f32.mrf.mxu2  ;;  %v631_v22 = vpop.f32.mrf.mxu3 }
 0x135   : > { %v661_v23 = vadd.f32 %v607_v21, %v468_v19  ;;  %v669_v24 = vadd.f32 %v631_v22, %v476_v20 }
 0x137   : > { %693 = vst [vmem:[#allocation2 + $0x90] sm:$0xff] %v661_v23 }
 0x138   : > { %701 = vst [vmem:[#allocation2 + $0xf8] sm:$0xff] %v669_v24  ;;  %v562_v27 = vpop.f32.mrf.mxu0  ;;  %v586_v28 = vpop.f32.mrf.mxu1 }
 0x139   : > { %v646_v29 = vadd.f32 %v562_v27, %v453_v25  ;;  %v654_v30 = vadd.f32 %v586_v28, %v461_v26 }
 0x13b   : > { %678 = vst [vmem:[#allocation2 + $0x30] sm:$0xff] %v646_v29 }
 0x13c   : > { %686 = vst [vmem:[#allocation2 + $0x8] sm:$0xff] %v654_v30  ;;  %v610_v33 = vpop.f32.mrf.mxu2  ;;  %v634_v34 = vpop.f32.mrf.mxu3 }
 0x13d   : > { %v662_v35 = vadd.f32 %v610_v33, %v469_v31  ;;  %v670_v36 = vadd.f32 %v634_v34, %v477_v32 }
 0x13f   : > { %694 = vst [vmem:[#allocation2 + $0x70] sm:$0xff] %v662_v35 }
 0x140   : > { %702 = vst [vmem:[#allocation2 + $0x20] sm:$0xff] %v670_v36  ;;  %v565_v39 = vpop.f32.mrf.mxu0  ;;  %v589_v40 = vpop.f32.mrf.mxu1 }
 0x141   : > { %v647_v41 = vadd.f32 %v565_v39, %v454_v37  ;;  %v655_v42 = vadd.f32 %v589_v40, %v462_v38 }
 0x143   : > { %679 = vst [vmem:[#allocation2 + $0x48] sm:$0xff] %v647_v41 }
 0x144   : > { %687 = vst [vmem:[#allocation2 + $0x78] sm:$0xff] %v655_v42  ;;  %v613_v45 = vpop.f32.mrf.mxu2  ;;  %v637_v46 = vpop.f32.mrf.mxu3  ;;  %707 = sbr.rel (%p940_p13) target bundleno = 364 (0x16c), region = 78 }
 0x145   : > { %v663_v47 = vadd.f32 %v613_v45, %v470_v43  ;;  %v671_v48 = vadd.f32 %v637_v46, %v478_v44 }
 0x147   : > { %695 = vst [vmem:[#allocation2 + $0xc0] sm:$0xff] %v663_v47 }
 0x148   : > { %703 = vst [vmem:[#allocation2 + $0x98] sm:$0xff] %v671_v48 }
 0x149   : > { %v708_v49 = vld [vmem:[#allocation2 + $0xb0] sm:$0xff]  ;;  %v1325_v50 = vld [vmem:[%s1414_s2] ss:$0 sm:$0xff]  ;;  %v710_v52 = vld [vmem:[#allocation2 + $0xd8] sm:$0xff] }
 0x14a   : > { %v709_v51 = vld [vmem:[#allocation2] sm:$0xff]  ;;  %v711_v53 = vld [vmem:[#allocation2 + $0x18] sm:$0xff]  ;;  %v744_v54 = vadd.f32 %v1325_v50, %v708_v49  ;;  %v746_v56 = vadd.f32 %v1325_v50, %v710_v52  ;;  %v712_v57 = vld [vmem:[#allocation2 + $0x50] sm:$0xff] }
 0x14b   : > { %v745_v55 = vadd.f32 %v1325_v50, %v709_v51  ;;  %v713_v58 = vld [vmem:[#allocation2 + $0x68] sm:$0xff]  ;;  %v747_v59 = vadd.f32 %v1325_v50, %v711_v53  ;;  %v714_v60 = vld [vmem:[#allocation2 + $0x30] sm:$0xff]  ;;  %v748_v61 = vadd.f32 %v1325_v50, %v712_v57  ;;  %v716_v0 = vld [vmem:[#allocation2 + $0x80] sm:$0xff] }
 0x14c   : > { %776 = vst [vmem:[%s1268_s29] sm:$0xff] %v744_v54  ;;  %v715_v62 = vld [vmem:[#allocation2 + $0x48] sm:$0xff]  ;;  %v749_v63 = vadd.f32 %v1325_v50, %v713_v58  ;;  %v750_v1 = vadd.f32 %v1325_v50, %v714_v60  ;;  %v752_v5 = vadd.f32 %v1325_v50, %v716_v0  ;;  %v719_v6 = vld [vmem:[#allocation2 + $0xb8] sm:$0xff]  ;;  %v720_v8 = vld [vmem:[#allocation2 + $0x60] sm:$0xff] }
 0x14d   : > { %777 = vst [vmem:[%s1268_s29 + $0x8] sm:$0xff] %v745_v55  ;;  %v717_v2 = vld [vmem:[#allocation2 + $0x88] sm:$0xff]  ;;  %v751_v3 = vadd.f32 %v1325_v50, %v715_v62  ;;  %v721_v10 = vld [vmem:[#allocation2 + $0xf0] sm:$0xff]  ;;  %v755_v11 = vadd.f32 %v1325_v50, %v719_v6  ;;  %v756_v13 = vadd.f32 %v1325_v50, %v720_v8  ;;  %v723_v14 = vld [vmem:[#allocation2 + $0x78] sm:$0xff] }
 0x14e   : > { %778 = vst [vmem:[%s1268_s29 + $0x10] sm:$0xff] %v746_v56  ;;  %v718_v4 = vld [vmem:[#allocation2 + $0xe8] sm:$0xff]  ;;  %v753_v7 = vadd.f32 %v1325_v50, %v717_v2  ;;  %v757_v15 = vadd.f32 %v1325_v50, %v721_v10  ;;  %v724_v16 = vld [vmem:[#allocation2 + $0x38] sm:$0xff]  ;;  %v759_v19 = vadd.f32 %v1325_v50, %v723_v14  ;;  %v726_v20 = vld [vmem:[#allocation2 + $0x40] sm:$0xff] }
 0x14f   : > { %779 = vst [vmem:[%s1268_s29 + $0x18] sm:$0xff] %v747_v59  ;;  %v754_v9 = vadd.f32 %v1325_v50, %v718_v4  ;;  %v722_v12 = vld [vmem:[#allocation2 + $0x8] sm:$0xff]  ;;  %v725_v18 = vld [vmem:[#allocation2 + $0x58] sm:$0xff]  ;;  %v760_v21 = vadd.f32 %v1325_v50, %v724_v16  ;;  %v728_v24 = vld [vmem:[#allocation2 + $0xe0] sm:$0xff]  ;;  %v762_v25 = vadd.f32 %v1325_v50, %v726_v20 }
 0x150   : > { %780 = vst [vmem:[%s1268_s29 + $0x20] sm:$0xff] %v748_v61  ;;  %v758_v17 = vadd.f32 %v1325_v50, %v722_v12  ;;  %v727_v22 = vld [vmem:[#allocation2 + $0xc8] sm:$0xff]  ;;  %v761_v23 = vadd.f32 %v1325_v50, %v725_v18  ;;  %v729_v26 = vld [vmem:[#allocation2 + $0x90] sm:$0xff]  ;;  %v764_v29 = vadd.f32 %v1325_v50, %v728_v24  ;;  %v731_v30 = vld [vmem:[#allocation2 + $0xc0] sm:$0xff] }
 0x151   : > { %781 = vst [vmem:[%s1268_s29 + $0x28] sm:$0xff] %v749_v63  ;;  %v763_v27 = vadd.f32 %v1325_v50, %v727_v22  ;;  %v730_v28 = vld [vmem:[#allocation2 + $0x70] sm:$0xff]  ;;  %v765_v31 = vadd.f32 %v1325_v50, %v729_v26  ;;  %v732_v32 = vld [vmem:[#allocation2 + $0xa8] sm:$0xff]  ;;  %v767_v35 = vadd.f32 %v1325_v50, %v731_v30  ;;  %v736_v40 = vld [vmem:[#allocation2 + $0xa0] sm:$0xff] }
 0x152   : > { %782 = vst [vmem:[%s1268_s29 + $0x30] sm:$0xff] %v750_v1  ;;  %v766_v33 = vadd.f32 %v1325_v50, %v730_v28  ;;  %v733_v34 = vld [vmem:[#allocation2 + $0xd0] sm:$0xff]  ;;  %v768_v37 = vadd.f32 %v1325_v50, %v732_v32  ;;  %v735_v38 = vld [vmem:[#allocation2 + $0x28] sm:$0xff]  ;;  %v737_v42 = vld [vmem:[#allocation2 + $0xf8] sm:$0xff]  ;;  %v772_v45 = vadd.f32 %v1325_v50, %v736_v40 }
 0x153   : > { %783 = vst [vmem:[%s1268_s29 + $0x38] sm:$0xff] %v751_v3  ;;  %v734_v36 = vld [vmem:[#allocation2 + $0x10] sm:$0xff]  ;;  %v769_v39 = vadd.f32 %v1325_v50, %v733_v34  ;;  %v771_v43 = vadd.f32 %v1325_v50, %v735_v38  ;;  %v738_v44 = vld [vmem:[#allocation2 + $0x20] sm:$0xff]  ;;  %v739_v46 = vld [vmem:[#allocation2 + $0x98] sm:$0xff]  ;;  %v773_v47 = vadd.f32 %v1325_v50, %v737_v42 }
 0x154   : > { %784 = vst [vmem:[%s1268_s29 + $0x40] sm:$0xff] %v752_v5  ;;  %v770_v41 = vadd.f32 %v1325_v50, %v734_v36  ;;  %v774_v48 = vadd.f32 %v1325_v50, %v738_v44  ;;  %v775_v49 = vadd.f32 %v1325_v50, %v739_v46 }
 0x155   : > { %785 = vst [vmem:[%s1268_s29 + $0x48] sm:$0xff] %v753_v7 }
 0x156   : > { %786 = vst [vmem:[%s1268_s29 + $0x50] sm:$0xff] %v754_v9 }
 0x157   : > { %787 = vst [vmem:[%s1268_s29 + $0x58] sm:$0xff] %v755_v11 }
 0x158   : > { %788 = vst [vmem:[%s1268_s29 + $0x60] sm:$0xff] %v756_v13 }
 0x159   : > { %789 = vst [vmem:[%s1268_s29 + $0x68] sm:$0xff] %v757_v15 }
 0x15a   : > { %790 = vst [vmem:[%s1268_s29 + $0x70] sm:$0xff] %v758_v17 }
 0x15b   : > { %791 = vst [vmem:[%s1268_s29 + $0x78] sm:$0xff] %v759_v19 }
 0x15c   : > { %792 = vst [vmem:[%s1268_s29 + $0x80] sm:$0xff] %v760_v21 }
 0x15d   : > { %793 = vst [vmem:[%s1268_s29 + $0x88] sm:$0xff] %v761_v23 }
 0x15e   : > { %794 = vst [vmem:[%s1268_s29 + $0x90] sm:$0xff] %v762_v25 }
 0x15f   : > { %795 = vst [vmem:[%s1268_s29 + $0x98] sm:$0xff] %v763_v27 }
 0x160   : > { %796 = vst [vmem:[%s1268_s29 + $0xa0] sm:$0xff] %v764_v29 }
 0x161   : > { %797 = vst [vmem:[%s1268_s29 + $0xa8] sm:$0xff] %v765_v31 }
 0x162   : > { %798 = vst [vmem:[%s1268_s29 + $0xb0] sm:$0xff] %v766_v33 }
 0x163   : > { %799 = vst [vmem:[%s1268_s29 + $0xb8] sm:$0xff] %v767_v35 }
 0x164   : > { %800 = vst [vmem:[%s1268_s29 + $0xc0] sm:$0xff] %v768_v37 }
 0x165   : > { %801 = vst [vmem:[%s1268_s29 + $0xc8] sm:$0xff] %v769_v39 }
 0x166   : > { %802 = vst [vmem:[%s1268_s29 + $0xd0] sm:$0xff] %v770_v41 }
 0x167   : > { %803 = vst [vmem:[%s1268_s29 + $0xd8] sm:$0xff] %v771_v43 }
 0x168   : > { %804 = vst [vmem:[%s1268_s29 + $0xe0] sm:$0xff] %v772_v45 }
 0x169   : > { %805 = vst [vmem:[%s1268_s29 + $0xe8] sm:$0xff] %v773_v47 }
 0x16a   : > { %806 = vst [vmem:[%s1268_s29 + $0xf0] sm:$0xff] %v774_v48 }
 0x16b   : > { %807 = vst [vmem:[%s1268_s29 + $0xf8] sm:$0xff] %v775_v49 }
 0x16c PF: > { %s13_s18 = sadd.s32 1, %s1104_s18   ;;  %s1416_s12 = smov %s1084_s13 }
 0x16d   : > { %p10_p0 = scmp.ge.s32.totalorder %s13_s18, 106   ;;  %s1417_s13 = smov %s1178_s25 }
 0x16e   : > { %s1418_s14 = smov %s1096_s16  ;;  %s1419_s15 = smov %s1100_s17 }
 0x16f   : > { %s1420_s16 = smov %s1423_s19  ;;  %s1421_s17 = smov %s1427_s20 }
 0x170   :  { %12 = sbr.rel (!%p10_p0) target bundleno = 4 (0x4), region = 119 }

// kernel: dis_content_forward.9
= control target key start
LH: loop header
LB: loop body
LE: loop exit
PB: predicated region body
PF: predicated region fallthrough
CT: control target
= control target key end

     0   :  { %s1602_s6 = smov 0   ;;  %s3446_s0 = inlined_call_operand.vmem [shape: f32[2,900,32], index: 0, kind: input, shape index: {}]   ;;  %s3447_s1 = inlined_call_operand.vmem [shape: f32[2,900,32], index: 1, kind: output, shape index: {}]  }
   0x1 LB: > { %s1560_s7 = sadd.s32 4294967295, %s1589_s6   ;;  %p1564_p0 = scmp.ge.s32.totalorder %s1589_s6, 1  ;;  %s1589_s6 = sphi %s1602_s6, %s11_s6  }
   0x2   : > { %p87_p1 = scmp.lt.s32.totalorder %s1589_s6, 3 }
   0x4   : > { %p88_p2 = pnand %p1564_p0, %p87_p1 }
   0x6   : > { %91 = sbr.rel (%p88_p2) target bundleno = 638 (0x27e), region = 24 }
   0xb   : > { %p107_p3 = scmp.lt.s32.totalorder %s1560_s7, 1  ;;  %vm230_vm0 = vcmask 261120   ;;  %vm454_vm1 = vcmask 257024  }
   0xd   : > { %s3863_s7 = smov (!%p107_p3, %s1560_s7), 1 }
   0xe   : > { %s1569_s8 = smul.u32 904, %s3863_s7 }
  0x10   : > { %s1618_s11 = scalar_lea.vmem %s3446_s0, %s1569_s8  ;;  %s3005_s14 = scalar_lea.vmem %s3447_s1, %s1569_s8 }
  0x11   : > { %v1621_v0 = vld [vmem:[%s1618_s11] sm:$0xff]  ;;  %v1624_v1 = vld [vmem:[%s1618_s11 + $0x8] sm:$0xff]  ;;  %v1627_v2 = vld [vmem:[%s1618_s11 + $0x10] sm:$0xff] }
  0x12   : > { %v1630_v3 = vld [vmem:[%s1618_s11 + $0x18] sm:$0xff]  ;;  %v231_v4 = vsel %vm230_vm0, %v1621_v0, 0.0  ;;  %v232_v5 = vsel %vm230_vm0, %v1624_v1, 0.0  ;;  %v234_v6 = vsel %vm230_vm0, %v1627_v2, 0.0  ;;  %v1639_v7 = vld [vmem:[%s1618_s11 + $0x20] sm:$0xff]  ;;  %v1644_v10 = vld [vmem:[%s1618_s11 + $0x28] sm:$0xff] }
  0x13   : > { %v233_v8 = vadd.f32 %v232_v5, %v231_v4  ;;  %v236_v9 = vsel %vm230_vm0, %v1630_v3, 0.0  ;;  %v238_v12 = vsel %vm230_vm0, %v1639_v7, 0.0  ;;  %v1649_v13 = vld [vmem:[%s1618_s11 + $0x30] sm:$0xff]  ;;  %v240_v15 = vsel %vm230_vm0, %v1644_v10, 0.0  ;;  %v1654_v16 = vld [vmem:[%s1618_s11 + $0x38] sm:$0xff]  ;;  %v1659_v19 = vld [vmem:[%s1618_s11 + $0x40] sm:$0xff] }
  0x14   : > { %v242_v18 = vsel %vm230_vm0, %v1649_v13, 0.0  ;;  %v244_v21 = vsel %vm230_vm0, %v1654_v16, 0.0  ;;  %v1664_v22 = vld [vmem:[%s1618_s11 + $0x48] sm:$0xff]  ;;  %v246_v24 = vsel %vm230_vm0, %v1659_v19, 0.0  ;;  %v1669_v25 = vld [vmem:[%s1618_s11 + $0x50] sm:$0xff]  ;;  %v1674_v28 = vld [vmem:[%s1618_s11 + $0x58] sm:$0xff] }
  0x15   : > { %v235_v11 = vadd.f32 %v234_v6, %v233_v8  ;;  %v248_v27 = vsel %vm230_vm0, %v1664_v22, 0.0  ;;  %v250_v30 = vsel %vm230_vm0, %v1669_v25, 0.0  ;;  %v1679_v31 = vld [vmem:[%s1618_s11 + $0x60] sm:$0xff]  ;;  %v252_v33 = vsel %vm230_vm0, %v1674_v28, 0.0  ;;  %v1684_v34 = vld [vmem:[%s1618_s11 + $0x68] sm:$0xff]  ;;  %v1689_v37 = vld [vmem:[%s1618_s11 + $0x70] sm:$0xff] }
  0x16   : > { %v254_v36 = vsel %vm230_vm0, %v1679_v31, 0.0  ;;  %v256_v39 = vsel %vm230_vm0, %v1684_v34, 0.0  ;;  %v1694_v40 = vld [vmem:[%s1618_s11 + $0x78] sm:$0xff]  ;;  %v258_v42 = vsel %vm230_vm0, %v1689_v37, 0.0  ;;  %v1699_v43 = vld [vmem:[%s1618_s11 + $0x80] sm:$0xff]  ;;  %v1704_v46 = vld [vmem:[%s1618_s11 + $0x88] sm:$0xff] }
  0x17   : > { %v237_v14 = vadd.f32 %v236_v9, %v235_v11  ;;  %v260_v45 = vsel %vm230_vm0, %v1694_v40, 0.0  ;;  %v262_v48 = vsel %vm230_vm0, %v1699_v43, 0.0  ;;  %v1709_v49 = vld [vmem:[%s1618_s11 + $0x90] sm:$0xff]  ;;  %v264_v51 = vsel %vm230_vm0, %v1704_v46, 0.0  ;;  %v1714_v52 = vld [vmem:[%s1618_s11 + $0x98] sm:$0xff]  ;;  %v1719_v55 = vld [vmem:[%s1618_s11 + $0xa0] sm:$0xff] }
  0x18   : > { %v266_v54 = vsel %vm230_vm0, %v1709_v49, 0.0  ;;  %v268_v57 = vsel %vm230_vm0, %v1714_v52, 0.0  ;;  %v1724_v58 = vld [vmem:[%s1618_s11 + $0xa8] sm:$0xff]  ;;  %v270_v60 = vsel %vm230_vm0, %v1719_v55, 0.0  ;;  %v1729_v61 = vld [vmem:[%s1618_s11 + $0xb0] sm:$0xff]  ;;  %v1734_v4 = vld [vmem:[%s1618_s11 + $0xb8] sm:$0xff] }
  0x19   : > { %v239_v17 = vadd.f32 %v238_v12, %v237_v14  ;;  %v272_v63 = vsel %vm230_vm0, %v1724_v58, 0.0  ;;  %v274_v6 = vsel %vm230_vm0, %v1729_v61, 0.0  ;;  %v1739_v8 = vld [vmem:[%s1618_s11 + $0xc0] sm:$0xff]  ;;  %v276_v11 = vsel %vm230_vm0, %v1734_v4, 0.0  ;;  %v1744_v12 = vld [vmem:[%s1618_s11 + $0xc8] sm:$0xff] }
  0x1b   : > { %v241_v20 = vadd.f32 %v240_v15, %v239_v17  ;;  %v278_v15 = vsel %vm230_vm0, %v1739_v8, 0.0  ;;  %v1749_v17 = vld [vmem:[%s1618_s11 + $0xd0] sm:$0xff] }
  0x1d   : > { %v243_v23 = vadd.f32 %v242_v18, %v241_v20  ;;  %v280_v20 = vsel %vm230_vm0, %v1744_v12, 0.0 }
  0x1f   : > { %v245_v26 = vadd.f32 %v244_v21, %v243_v23  ;;  %v1754_v21 = vld [vmem:[%s1618_s11 + $0xd8] sm:$0xff] }
  0x21   : > { %v247_v29 = vadd.f32 %v246_v24, %v245_v26  ;;  %v282_v24 = vsel %vm230_vm0, %v1749_v17, 0.0  ;;  %v1759_v26 = vld [vmem:[%s1618_s11 + $0xe0] sm:$0xff] }
  0x23   : > { %v249_v32 = vadd.f32 %v248_v27, %v247_v29  ;;  %v284_v29 = vsel %vm230_vm0, %v1754_v21, 0.0 }
  0x25   : > { %v251_v35 = vadd.f32 %v250_v30, %v249_v32  ;;  %v1764_v30 = vld [vmem:[%s1618_s11 + $0xe8] sm:$0xff] }
  0x27   : > { %v253_v38 = vadd.f32 %v252_v33, %v251_v35  ;;  %v286_v33 = vsel %vm230_vm0, %v1759_v26, 0.0  ;;  %v1769_v35 = vld [vmem:[%s1618_s11 + $0xf0] sm:$0xff] }
  0x29   : > { %v255_v41 = vadd.f32 %v254_v36, %v253_v38  ;;  %v288_v38 = vsel %vm230_vm0, %v1764_v30, 0.0 }
  0x2b   : > { %v257_v44 = vadd.f32 %v256_v39, %v255_v41  ;;  %v1774_v39 = vld [vmem:[%s1618_s11 + $0xf8] sm:$0xff] }
  0x2d   : > { %v259_v47 = vadd.f32 %v258_v42, %v257_v44  ;;  %v290_v42 = vsel %vm230_vm0, %v1769_v35, 0.0  ;;  %v1779_v44 = vld [vmem:[%s1618_s11 + $0x100] sm:$0xff] }
  0x2f   : > { %v261_v50 = vadd.f32 %v260_v45, %v259_v47  ;;  %v292_v47 = vsel %vm230_vm0, %v1774_v39, 0.0 }
  0x31   : > { %v263_v53 = vadd.f32 %v262_v48, %v261_v50  ;;  %v1784_v48 = vld [vmem:[%s1618_s11 + $0x108] sm:$0xff] }
  0x33   : > { %v265_v56 = vadd.f32 %v264_v51, %v263_v53  ;;  %v294_v51 = vsel %vm230_vm0, %v1779_v44, 0.0  ;;  %v1789_v53 = vld [vmem:[%s1618_s11 + $0x110] sm:$0xff] }
  0x35   : > { %v267_v59 = vadd.f32 %v266_v54, %v265_v56  ;;  %v296_v56 = vsel %vm230_vm0, %v1784_v48, 0.0 }
  0x37   : > { %v269_v62 = vadd.f32 %v268_v57, %v267_v59  ;;  %v1794_v57 = vld [vmem:[%s1618_s11 + $0x118] sm:$0xff] }
  0x39   : > { %v271_v5 = vadd.f32 %v270_v60, %v269_v62  ;;  %v298_v60 = vsel %vm230_vm0, %v1789_v53, 0.0  ;;  %v1799_v62 = vld [vmem:[%s1618_s11 + $0x120] sm:$0xff] }
  0x3b   : > { %v273_v9 = vadd.f32 %v272_v63, %v271_v5  ;;  %v300_v5 = vsel %vm230_vm0, %v1794_v57, 0.0 }
  0x3d   : > { %v275_v14 = vadd.f32 %v274_v6, %v273_v9  ;;  %v1804_v6 = vld [vmem:[%s1618_s11 + $0x128] sm:$0xff] }
  0x3f   : > { %v277_v18 = vadd.f32 %v276_v11, %v275_v14  ;;  %v302_v11 = vsel %vm230_vm0, %v1799_v62, 0.0  ;;  %v1809_v14 = vld [vmem:[%s1618_s11 + $0x130] sm:$0xff] }
  0x41   : > { %v279_v23 = vadd.f32 %v278_v15, %v277_v18  ;;  %v304_v18 = vsel %vm230_vm0, %v1804_v6, 0.0 }
  0x43   : > { %v281_v27 = vadd.f32 %v280_v20, %v279_v23  ;;  %v1814_v20 = vld [vmem:[%s1618_s11 + $0x138] sm:$0xff] }
  0x45   : > { %v283_v32 = vadd.f32 %v282_v24, %v281_v27  ;;  %v306_v24 = vsel %vm230_vm0, %v1809_v14, 0.0  ;;  %v1819_v27 = vld [vmem:[%s1618_s11 + $0x140] sm:$0xff] }
  0x47   : > { %v285_v36 = vadd.f32 %v284_v29, %v283_v32  ;;  %v308_v32 = vsel %vm230_vm0, %v1814_v20, 0.0 }
  0x49   : > { %v287_v41 = vadd.f32 %v286_v33, %v285_v36  ;;  %v1824_v33 = vld [vmem:[%s1618_s11 + $0x148] sm:$0xff] }
  0x4b   : > { %v289_v45 = vadd.f32 %v288_v38, %v287_v41  ;;  %v310_v38 = vsel %vm230_vm0, %v1819_v27, 0.0  ;;  %v1829_v41 = vld [vmem:[%s1618_s11 + $0x150] sm:$0xff] }
  0x4d   : > { %v291_v50 = vadd.f32 %v290_v42, %v289_v45  ;;  %v312_v45 = vsel %vm230_vm0, %v1824_v33, 0.0 }
  0x4f   : > { %v293_v54 = vadd.f32 %v292_v47, %v291_v50  ;;  %v1834_v47 = vld [vmem:[%s1618_s11 + $0x158] sm:$0xff] }
  0x51   : > { %v295_v59 = vadd.f32 %v294_v51, %v293_v54  ;;  %v314_v51 = vsel %vm230_vm0, %v1829_v41, 0.0  ;;  %v1839_v54 = vld [vmem:[%s1618_s11 + $0x160] sm:$0xff] }
  0x53   : > { %v297_v63 = vadd.f32 %v296_v56, %v295_v59  ;;  %v316_v59 = vsel %vm230_vm0, %v1834_v47, 0.0 }
  0x55   : > { %v299_v9 = vadd.f32 %v298_v60, %v297_v63  ;;  %v1844_v60 = vld [vmem:[%s1618_s11 + $0x168] sm:$0xff] }
  0x56   : > { %3586 = vst [vmem:[#allocation2_spill] sm:$0xff] %v1844_v60 }
  0x57   : > { %v301_v15 = vadd.f32 %v300_v5, %v299_v9  ;;  %v318_v5 = vsel %vm230_vm0, %v1839_v54, 0.0  ;;  %v1849_v9 = vld [vmem:[%s1618_s11 + $0x170] sm:$0xff] }
  0x58   : > { %3587 = vst [vmem:[#allocation3_spill] sm:$0xff] %v1849_v9 }
  0x59   : > { %v303_v23 = vadd.f32 %v302_v11, %v301_v15  ;;  %v320_v15 = vsel %vm230_vm0, %v1844_v60, 0.0 }
  0x5b   : > { %v305_v29 = vadd.f32 %v304_v18, %v303_v23  ;;  %v1854_v18 = vld [vmem:[%s1618_s11 + $0x178] sm:$0xff] }
  0x5c   : > { %3588 = vst [vmem:[#allocation4_spill] sm:$0xff] %v1854_v18 }
  0x5d   : > { %v307_v36 = vadd.f32 %v306_v24, %v305_v29  ;;  %v322_v24 = vsel %vm230_vm0, %v1849_v9, 0.0  ;;  %v1859_v29 = vld [vmem:[%s1618_s11 + $0x180] sm:$0xff] }
  0x5e   : > { %3589 = vst [vmem:[#allocation5_spill] sm:$0xff] %v1859_v29 }
  0x5f   : > { %v309_v42 = vadd.f32 %v308_v32, %v307_v36  ;;  %v324_v36 = vsel %vm230_vm0, %v1854_v18, 0.0 }
  0x61   : > { %v311_v50 = vadd.f32 %v310_v38, %v309_v42  ;;  %v1864_v38 = vld [vmem:[%s1618_s11 + $0x188] sm:$0xff] }
  0x62   : > { %3590 = vst [vmem:[#allocation6_spill] sm:$0xff] %v1864_v38 }
  0x63   : > { %v313_v56 = vadd.f32 %v312_v45, %v311_v50  ;;  %v326_v45 = vsel %vm230_vm0, %v1859_v29, 0.0  ;;  %v1869_v50 = vld [vmem:[%s1618_s11 + $0x190] sm:$0xff] }
  0x64   : > { %3591 = vst [vmem:[#allocation7_spill] sm:$0xff] %v1869_v50 }
  0x65   : > { %v315_v63 = vadd.f32 %v314_v51, %v313_v56  ;;  %v328_v56 = vsel %vm230_vm0, %v1864_v38, 0.0 }
  0x67   : > { %v317_v11 = vadd.f32 %v316_v59, %v315_v63  ;;  %v1874_v59 = vld [vmem:[%s1618_s11 + $0x198] sm:$0xff] }
  0x68   : > { %3592 = vst [vmem:[#allocation8_spill] sm:$0xff] %v1874_v59 }
  0x69   : > { %v319_v23 = vadd.f32 %v318_v5, %v317_v11  ;;  %v330_v5 = vsel %vm230_vm0, %v1869_v50, 0.0  ;;  %v1879_v11 = vld [vmem:[%s1618_s11 + $0x1a0] sm:$0xff]  ;;  %v1894_v50 = vld [vmem:[%s1618_s11 + $0x1b8] sm:$0xff] }
  0x6a   : > { %3593 = vst [vmem:[#allocation9_spill] sm:$0xff] %v1879_v11 }
  0x6b   : > { %v321_v32 = vadd.f32 %v320_v15, %v319_v23  ;;  %v332_v23 = vsel %vm230_vm0, %v1874_v59, 0.0  ;;  %3596 = vst [vmem:[#allocation12_spill] sm:$0xff] %v1894_v50  ;;  %v1899_v59 = vld [vmem:[%s1618_s11 + $0x1c0] sm:$0xff] }
  0x6c   : > { %3597 = vst [vmem:[#allocation13_spill] sm:$0xff] %v1899_v59 }
  0x6d   : > { %v323_v42 = vadd.f32 %v322_v24, %v321_v32  ;;  %v1884_v24 = vld [vmem:[%s1618_s11 + $0x1a8] sm:$0xff] }
  0x6e   : > { %3594 = vst [vmem:[#allocation10_spill] sm:$0xff] %v1884_v24 }
  0x6f   : > { %v325_v51 = vadd.f32 %v324_v36, %v323_v42  ;;  %v334_v36 = vsel %vm230_vm0, %v1879_v11, 0.0  ;;  %v1889_v42 = vld [vmem:[%s1618_s11 + $0x1b0] sm:$0xff]  ;;  %v1904_v11 = vld [vmem:[%s1618_s11 + $0x1c8] sm:$0xff] }
  0x70   : > { %3595 = vst [vmem:[#allocation11_spill] sm:$0xff] %v1889_v42 }
  0x71   : > { %v327_v63 = vadd.f32 %v326_v45, %v325_v51  ;;  %v336_v51 = vsel %vm230_vm0, %v1884_v24, 0.0  ;;  %3598 = vst [vmem:[#allocation14_spill] sm:$0xff] %v1904_v11  ;;  %v1909_v24 = vld [vmem:[%s1618_s11 + $0x1d0] sm:$0xff] }
  0x72   : > { %3599 = vst [vmem:[#allocation15_spill] sm:$0xff] %v1909_v24 }
  0x73   : > { %v329_v15 = vadd.f32 %v328_v56, %v327_v63  ;;  %v338_v63 = vsel %vm230_vm0, %v1889_v42, 0.0  ;;  %v1914_v42 = vld [vmem:[%s1618_s11 + $0x1d8] sm:$0xff] }
  0x74   : > { %3600 = vst [vmem:[#allocation16_spill] sm:$0xff] %v1914_v42 }
  0x75   : > { %v331_v32 = vadd.f32 %v330_v5, %v329_v15  ;;  %v340_v15 = vsel %vm230_vm0, %v1894_v50, 0.0  ;;  %v1919_v50 = vld [vmem:[%s1618_s11 + $0x1e0] sm:$0xff] }
  0x76   : > { %3601 = vst [vmem:[#allocation17_spill] sm:$0xff] %v1919_v50 }
  0x77   : > { %v333_v45 = vadd.f32 %v332_v23, %v331_v32  ;;  %v342_v32 = vsel %vm230_vm0, %v1899_v59, 0.0  ;;  %v1924_v59 = vld [vmem:[%s1618_s11 + $0x1e8] sm:$0xff] }
  0x78   : > { %3602 = vst [vmem:[#allocation18_spill] sm:$0xff] %v1924_v59 }
  0x79   : > { %v335_v56 = vadd.f32 %v334_v36, %v333_v45  ;;  %v344_v45 = vsel %vm230_vm0, %v1904_v11, 0.0  ;;  %v1929_v11 = vld [vmem:[%s1618_s11 + $0x1f0] sm:$0xff] }
  0x7a   : > { %3603 = vst [vmem:[#allocation19_spill] sm:$0xff] %v1929_v11 }
  0x7b   : > { %v337_v5 = vadd.f32 %v336_v51, %v335_v56  ;;  %v346_v56 = vsel %vm230_vm0, %v1909_v24, 0.0  ;;  %v1934_v24 = vld [vmem:[%s1618_s11 + $0x1f8] sm:$0xff] }
  0x7c   : > { %3604 = vst [vmem:[#allocation20_spill] sm:$0xff] %v1934_v24 }
  0x7d   : > { %v339_v23 = vadd.f32 %v338_v63, %v337_v5  ;;  %v348_v5 = vsel %vm230_vm0, %v1914_v42, 0.0  ;;  %v1939_v42 = vld [vmem:[%s1618_s11 + $0x200] sm:$0xff] }
  0x7e   : > { %3605 = vst [vmem:[#allocation21_spill] sm:$0xff] %v1939_v42 }
  0x7f   : > { %v341_v36 = vadd.f32 %v340_v15, %v339_v23  ;;  %v350_v23 = vsel %vm230_vm0, %v1919_v50, 0.0  ;;  %v1944_v50 = vld [vmem:[%s1618_s11 + $0x208] sm:$0xff] }
  0x80   : > { %3606 = vst [vmem:[#allocation22_spill] sm:$0xff] %v1944_v50 }
  0x81   : > { %v343_v51 = vadd.f32 %v342_v32, %v341_v36  ;;  %v352_v36 = vsel %vm230_vm0, %v1924_v59, 0.0  ;;  %v1949_v59 = vld [vmem:[%s1618_s11 + $0x210] sm:$0xff] }
  0x82   : > { %3607 = vst [vmem:[#allocation23_spill] sm:$0xff] %v1949_v59 }
  0x83   : > { %v345_v63 = vadd.f32 %v344_v45, %v343_v51  ;;  %v354_v51 = vsel %vm230_vm0, %v1929_v11, 0.0  ;;  %v1954_v11 = vld [vmem:[%s1618_s11 + $0x218] sm:$0xff] }
  0x84   : > { %3608 = vst [vmem:[#allocation24_spill] sm:$0xff] %v1954_v11 }
  0x85   : > { %v347_v15 = vadd.f32 %v346_v56, %v345_v63  ;;  %v356_v63 = vsel %vm230_vm0, %v1934_v24, 0.0  ;;  %v1959_v24 = vld [vmem:[%s1618_s11 + $0x220] sm:$0xff] }
  0x86   : > { %3609 = vst [vmem:[#allocation25_spill] sm:$0xff] %v1959_v24 }
  0x87   : > { %v349_v32 = vadd.f32 %v348_v5, %v347_v15  ;;  %v358_v15 = vsel %vm230_vm0, %v1939_v42, 0.0  ;;  %v1964_v42 = vld [vmem:[%s1618_s11 + $0x228] sm:$0xff] }
  0x88   : > { %3610 = vst [vmem:[#allocation26_spill] sm:$0xff] %v1964_v42 }
  0x89   : > { %v351_v45 = vadd.f32 %v350_v23, %v349_v32  ;;  %v360_v32 = vsel %vm230_vm0, %v1944_v50, 0.0  ;;  %v1969_v50 = vld [vmem:[%s1618_s11 + $0x230] sm:$0xff] }
  0x8a   : > { %3611 = vst [vmem:[#allocation27_spill] sm:$0xff] %v1969_v50 }
  0x8b   : > { %v353_v56 = vadd.f32 %v352_v36, %v351_v45  ;;  %v362_v45 = vsel %vm230_vm0, %v1949_v59, 0.0  ;;  %v1974_v59 = vld [vmem:[%s1618_s11 + $0x238] sm:$0xff] }
  0x8c   : > { %3612 = vst [vmem:[#allocation28_spill] sm:$0xff] %v1974_v59 }
  0x8d   : > { %v355_v5 = vadd.f32 %v354_v51, %v353_v56  ;;  %v364_v56 = vsel %vm230_vm0, %v1954_v11, 0.0  ;;  %v1979_v11 = vld [vmem:[%s1618_s11 + $0x240] sm:$0xff] }
  0x8e   : > { %3613 = vst [vmem:[#allocation29_spill] sm:$0xff] %v1979_v11 }
  0x8f   : > { %v357_v23 = vadd.f32 %v356_v63, %v355_v5  ;;  %v366_v5 = vsel %vm230_vm0, %v1959_v24, 0.0  ;;  %v1984_v24 = vld [vmem:[%s1618_s11 + $0x248] sm:$0xff] }
  0x90   : > { %3614 = vst [vmem:[#allocation30_spill] sm:$0xff] %v1984_v24 }
  0x91   : > { %v359_v36 = vadd.f32 %v358_v15, %v357_v23  ;;  %v368_v23 = vsel %vm230_vm0, %v1964_v42, 0.0  ;;  %v1989_v42 = vld [vmem:[%s1618_s11 + $0x250] sm:$0xff] }
  0x92   : > { %3615 = vst [vmem:[#allocation31_spill] sm:$0xff] %v1989_v42 }
  0x93   : > { %v361_v51 = vadd.f32 %v360_v32, %v359_v36  ;;  %v370_v36 = vsel %vm230_vm0, %v1969_v50, 0.0  ;;  %v1994_v50 = vld [vmem:[%s1618_s11 + $0x258] sm:$0xff] }
  0x94   : > { %3616 = vst [vmem:[#allocation32_spill] sm:$0xff] %v1994_v50 }
  0x95   : > { %v363_v63 = vadd.f32 %v362_v45, %v361_v51  ;;  %v372_v51 = vsel %vm230_vm0, %v1974_v59, 0.0  ;;  %v1999_v59 = vld [vmem:[%s1618_s11 + $0x260] sm:$0xff] }
  0x96   : > { %3617 = vst [vmem:[#allocation33_spill] sm:$0xff] %v1999_v59 }
  0x97   : > { %v365_v15 = vadd.f32 %v364_v56, %v363_v63  ;;  %v374_v63 = vsel %vm230_vm0, %v1979_v11, 0.0  ;;  %v2004_v11 = vld [vmem:[%s1618_s11 + $0x268] sm:$0xff] }
  0x98   : > { %3618 = vst [vmem:[#allocation34_spill] sm:$0xff] %v2004_v11 }
  0x99   : > { %v367_v32 = vadd.f32 %v366_v5, %v365_v15  ;;  %v376_v15 = vsel %vm230_vm0, %v1984_v24, 0.0  ;;  %v2009_v24 = vld [vmem:[%s1618_s11 + $0x270] sm:$0xff] }
  0x9a   : > { %3619 = vst [vmem:[#allocation35_spill] sm:$0xff] %v2009_v24 }
  0x9b   : > { %v369_v45 = vadd.f32 %v368_v23, %v367_v32  ;;  %v378_v32 = vsel %vm230_vm0, %v1989_v42, 0.0  ;;  %v2014_v42 = vld [vmem:[%s1618_s11 + $0x278] sm:$0xff] }
  0x9c   : > { %3620 = vst [vmem:[#allocation36_spill] sm:$0xff] %v2014_v42 }
  0x9d   : > { %v371_v56 = vadd.f32 %v370_v36, %v369_v45  ;;  %v380_v45 = vsel %vm230_vm0, %v1994_v50, 0.0  ;;  %v2019_v50 = vld [vmem:[%s1618_s11 + $0x280] sm:$0xff] }
  0x9e   : > { %3621 = vst [vmem:[#allocation37_spill] sm:$0xff] %v2019_v50 }
  0x9f   : > { %v373_v5 = vadd.f32 %v372_v51, %v371_v56  ;;  %v382_v56 = vsel %vm230_vm0, %v1999_v59, 0.0  ;;  %v2024_v59 = vld [vmem:[%s1618_s11 + $0x288] sm:$0xff] }
  0xa0   : > { %3622 = vst [vmem:[#allocation38_spill] sm:$0xff] %v2024_v59 }
  0xa1   : > { %v375_v23 = vadd.f32 %v374_v63, %v373_v5  ;;  %v384_v5 = vsel %vm230_vm0, %v2004_v11, 0.0  ;;  %v2029_v11 = vld [vmem:[%s1618_s11 + $0x290] sm:$0xff] }
  0xa2   : > { %3623 = vst [vmem:[#allocation39_spill] sm:$0xff] %v2029_v11 }
  0xa3   : > { %v377_v36 = vadd.f32 %v376_v15, %v375_v23  ;;  %v386_v23 = vsel %vm230_vm0, %v2009_v24, 0.0  ;;  %v2034_v24 = vld [vmem:[%s1618_s11 + $0x298] sm:$0xff] }
  0xa4   : > { %3624 = vst [vmem:[#allocation40_spill] sm:$0xff] %v2034_v24 }
  0xa5   : > { %v379_v51 = vadd.f32 %v378_v32, %v377_v36  ;;  %v388_v36 = vsel %vm230_vm0, %v2014_v42, 0.0  ;;  %v2039_v42 = vld [vmem:[%s1618_s11 + $0x2a0] sm:$0xff] }
  0xa6   : > { %3625 = vst [vmem:[#allocation41_spill] sm:$0xff] %v2039_v42 }
  0xa7   : > { %v381_v63 = vadd.f32 %v380_v45, %v379_v51  ;;  %v390_v51 = vsel %vm230_vm0, %v2019_v50, 0.0  ;;  %v2044_v50 = vld [vmem:[%s1618_s11 + $0x2a8] sm:$0xff] }
  0xa8   : > { %3626 = vst [vmem:[#allocation42_spill] sm:$0xff] %v2044_v50 }
  0xa9   : > { %v383_v15 = vadd.f32 %v382_v56, %v381_v63  ;;  %v392_v63 = vsel %vm230_vm0, %v2024_v59, 0.0  ;;  %v2049_v59 = vld [vmem:[%s1618_s11 + $0x2b0] sm:$0xff] }
  0xaa   : > { %3627 = vst [vmem:[#allocation43_spill] sm:$0xff] %v2049_v59 }
  0xab   : > { %v385_v32 = vadd.f32 %v384_v5, %v383_v15  ;;  %v394_v15 = vsel %vm230_vm0, %v2029_v11, 0.0  ;;  %v2054_v11 = vld [vmem:[%s1618_s11 + $0x2b8] sm:$0xff] }
  0xac   : > { %3628 = vst [vmem:[#allocation44_spill] sm:$0xff] %v2054_v11 }
  0xad   : > { %v387_v45 = vadd.f32 %v386_v23, %v385_v32  ;;  %v396_v32 = vsel %vm230_vm0, %v2034_v24, 0.0  ;;  %v2059_v24 = vld [vmem:[%s1618_s11 + $0x2c0] sm:$0xff] }
  0xae   : > { %3629 = vst [vmem:[#allocation45_spill] sm:$0xff] %v2059_v24 }
  0xaf   : > { %v389_v56 = vadd.f32 %v388_v36, %v387_v45  ;;  %v398_v45 = vsel %vm230_vm0, %v2039_v42, 0.0  ;;  %v2064_v42 = vld [vmem:[%s1618_s11 + $0x2c8] sm:$0xff] }
  0xb0   : > { %3630 = vst [vmem:[#allocation46_spill] sm:$0xff] %v2064_v42 }
  0xb1   : > { %v391_v5 = vadd.f32 %v390_v51, %v389_v56  ;;  %v400_v56 = vsel %vm230_vm0, %v2044_v50, 0.0  ;;  %v2069_v50 = vld [vmem:[%s1618_s11 + $0x2d0] sm:$0xff] }
  0xb2   : > { %3631 = vst [vmem:[#allocation47_spill] sm:$0xff] %v2069_v50 }
  0xb3   : > { %v393_v23 = vadd.f32 %v392_v63, %v391_v5  ;;  %v402_v5 = vsel %vm230_vm0, %v2049_v59, 0.0  ;;  %v2074_v59 = vld [vmem:[%s1618_s11 + $0x2d8] sm:$0xff] }
  0xb4   : > { %3632 = vst [vmem:[#allocation48_spill] sm:$0xff] %v2074_v59 }
  0xb5   : > { %v395_v36 = vadd.f32 %v394_v15, %v393_v23  ;;  %v404_v23 = vsel %vm230_vm0, %v2054_v11, 0.0  ;;  %v2079_v11 = vld [vmem:[%s1618_s11 + $0x2e0] sm:$0xff] }
  0xb6   : > { %3633 = vst [vmem:[#allocation49_spill] sm:$0xff] %v2079_v11 }
  0xb7   : > { %v397_v51 = vadd.f32 %v396_v32, %v395_v36  ;;  %v406_v36 = vsel %vm230_vm0, %v2059_v24, 0.0  ;;  %v2084_v24 = vld [vmem:[%s1618_s11 + $0x2e8] sm:$0xff] }
  0xb8   : > { %3634 = vst [vmem:[#allocation50_spill] sm:$0xff] %v2084_v24 }
  0xb9   : > { %v399_v63 = vadd.f32 %v398_v45, %v397_v51  ;;  %v408_v51 = vsel %vm230_vm0, %v2064_v42, 0.0  ;;  %v2089_v42 = vld [vmem:[%s1618_s11 + $0x2f0] sm:$0xff] }
  0xba   : > { %3635 = vst [vmem:[#allocation51_spill] sm:$0xff] %v2089_v42 }
  0xbb   : > { %v401_v15 = vadd.f32 %v400_v56, %v399_v63  ;;  %v410_v63 = vsel %vm230_vm0, %v2069_v50, 0.0  ;;  %v2094_v50 = vld [vmem:[%s1618_s11 + $0x2f8] sm:$0xff] }
  0xbc   : > { %3636 = vst [vmem:[#allocation52_spill] sm:$0xff] %v2094_v50 }
  0xbd   : > { %v403_v32 = vadd.f32 %v402_v5, %v401_v15  ;;  %v412_v15 = vsel %vm230_vm0, %v2074_v59, 0.0  ;;  %v2099_v59 = vld [vmem:[%s1618_s11 + $0x300] sm:$0xff] }
  0xbe   : > { %3637 = vst [vmem:[#allocation53_spill] sm:$0xff] %v2099_v59 }
  0xbf   : > { %v405_v45 = vadd.f32 %v404_v23, %v403_v32  ;;  %v414_v32 = vsel %vm230_vm0, %v2079_v11, 0.0 }
  0xc1   : > { %v407_v56 = vadd.f32 %v406_v36, %v405_v45  ;;  %v416_v45 = vsel %vm230_vm0, %v2084_v24, 0.0 }
  0xc3   : > { %v409_v5 = vadd.f32 %v408_v51, %v407_v56  ;;  %v418_v56 = vsel %vm230_vm0, %v2089_v42, 0.0  ;;  %v2111_v42 = vld [vmem:[%s1618_s11 + $0x310] sm:$0xff] }
  0xc4   : > { %3639 = vst [vmem:[#allocation55_spill] sm:$0xff] %v2111_v42 }
  0xc5   : > { %v411_v23 = vadd.f32 %v410_v63, %v409_v5  ;;  %v420_v5 = vsel %vm230_vm0, %v2094_v50, 0.0 }
  0xc7   : > { %v413_v36 = vadd.f32 %v412_v15, %v411_v23  ;;  %v422_v15 = vsel %vm230_vm0, %v2099_v59, 0.0  ;;  %v2106_v23 = vld [vmem:[%s1618_s11 + $0x308] sm:$0xff] }
  0xc8   : > { %3638 = vst [vmem:[#allocation54_spill] sm:$0xff] %v2106_v23 }
  0xc9   : > { %v415_v51 = vadd.f32 %v414_v32, %v413_v36  ;;  %v424_v36 = vsel %vm230_vm0, %v2106_v23, 0.0 }
  0xcb   : > { %v417_v63 = vadd.f32 %v416_v45, %v415_v51  ;;  %v426_v51 = vsel %vm230_vm0, %v2111_v42, 0.0  ;;  %v2131_v42 = vld [vmem:[%s1618_s11 + $0x330] sm:$0xff] }
  0xcc   : > { %3643 = vst [vmem:[#allocation59_spill] sm:$0xff] %v2131_v42 }
  0xcd   : > { %v419_v11 = vadd.f32 %v418_v56, %v417_v63  ;;  %v2116_v56 = vld [vmem:[%s1618_s11 + $0x318] sm:$0xff] }
  0xce   : > { %3640 = vst [vmem:[#allocation56_spill] sm:$0xff] %v2116_v56  ;;  %v428_v59 = vsel %vm230_vm0, %v2116_v56, 0.0  ;;  %v2136_v56 = vld [vmem:[%s1618_s11 + $0x338] sm:$0xff] }
  0xcf   : > { %v421_v24 = vadd.f32 %v420_v5, %v419_v11  ;;  %v2121_v11 = vld [vmem:[%s1618_s11 + $0x320] sm:$0xff]  ;;  %3644 = vst [vmem:[#allocation60_spill] sm:$0xff] %v2136_v56 }
  0xd0   : > { %3641 = vst [vmem:[#allocation57_spill] sm:$0xff] %v2121_v11  ;;  %v430_v5 = vsel %vm230_vm0, %v2121_v11, 0.0  ;;  %v2141_v11 = vld [vmem:[%s1618_s11 + $0x340] sm:$0xff] }
  0xd1   : > { %v423_v32 = vadd.f32 %v422_v15, %v421_v24  ;;  %v2126_v15 = vld [vmem:[%s1618_s11 + $0x328] sm:$0xff]  ;;  %3645 = vst [vmem:[#allocation61_spill] sm:$0xff] %v2141_v11 }
  0xd2   : > { %3642 = vst [vmem:[#allocation58_spill] sm:$0xff] %v2126_v15 }
  0xd3   : > { %v425_v45 = vadd.f32 %v424_v36, %v423_v32  ;;  %v432_v36 = vsel %vm230_vm0, %v2126_v15, 0.0  ;;  %v2146_v15 = vld [vmem:[%s1618_s11 + $0x348] sm:$0xff] }
  0xd4   : > { %3646 = vst [vmem:[#allocation62_spill] sm:$0xff] %v2146_v15 }
  0xd5   : > { %v427_v63 = vadd.f32 %v426_v51, %v425_v45  ;;  %v434_v51 = vsel %vm230_vm0, %v2131_v42, 0.0  ;;  %v2151_v42 = vld [vmem:[%s1618_s11 + $0x350] sm:$0xff] }
  0xd6   : > { %3647 = vst [vmem:[#allocation63_spill] sm:$0xff] %v2151_v42 }
  0xd7   : > { %v429_v24 = vadd.f32 %v428_v59, %v427_v63  ;;  %v436_v63 = vsel %vm230_vm0, %v2136_v56, 0.0  ;;  %v2156_v56 = vld [vmem:[%s1618_s11 + $0x358] sm:$0xff] }
  0xd8   : > { %3648 = vst [vmem:[#allocation64_spill] sm:$0xff] %v2156_v56 }
  0xd9   : > { %v431_v32 = vadd.f32 %v430_v5, %v429_v24  ;;  %v438_v5 = vsel %vm230_vm0, %v2141_v11, 0.0  ;;  %v2161_v11 = vld [vmem:[%s1618_s11 + $0x360] sm:$0xff] }
  0xda   : > { %3649 = vst [vmem:[#allocation65_spill] sm:$0xff] %v2161_v11 }
  0xdb   : > { %v433_v45 = vadd.f32 %v432_v36, %v431_v32  ;;  %v440_v36 = vsel %vm230_vm0, %v2146_v15, 0.0  ;;  %v2166_v15 = vld [vmem:[%s1618_s11 + $0x368] sm:$0xff] }
  0xdc   : > { %3650 = vst [vmem:[#allocation66_spill] sm:$0xff] %v2166_v15 }
  0xdd   : > { %v435_v59 = vadd.f32 %v434_v51, %v433_v45  ;;  %v442_v51 = vsel %vm230_vm0, %v2151_v42, 0.0 }
  0xdf   : > { %v437_v24 = vadd.f32 %v436_v63, %v435_v59  ;;  %v444_v63 = vsel %vm230_vm0, %v2156_v56, 0.0 }
  0xe1   : > { %v439_v32 = vadd.f32 %v438_v5, %v437_v24  ;;  %v446_v5 = vsel %vm230_vm0, %v2161_v11, 0.0 }
  0xe3   : > { %v441_v45 = vadd.f32 %v440_v36, %v439_v32  ;;  %v448_v32 = vsel %vm230_vm0, %v2166_v15, 0.0  ;;  %v2171_v36 = vld [vmem:[%s1618_s11 + $0x370] sm:$0xff]  ;;  %v1591_v15 = vmov 900.0  }
  0xe4   : > { %3651 = vst [vmem:[#allocation67_spill] sm:$0xff] %v2171_v36  ;;  %1579 = vrcp.f32 %v1591_v15 }
  0xe5   : > { %v443_v59 = vadd.f32 %v442_v51, %v441_v45  ;;  %v450_v45 = vsel %vm230_vm0, %v2171_v36, 0.0  ;;  %v2176_v51 = vld [vmem:[%s1618_s11 + $0x378] sm:$0xff] }
  0xe6   : > { %3652 = vst [vmem:[#allocation68_spill] sm:$0xff] %v2176_v51 }
  0xe7   : > { %v445_v24 = vadd.f32 %v444_v63, %v443_v59  ;;  %v452_v59 = vsel %vm230_vm0, %v2176_v51, 0.0  ;;  %v2181_v63 = vld [vmem:[%s1618_s11 + $0x380] sm:$0xf] }
  0xe9   : > { %v447_v23 = vadd.f32 %v446_v5, %v445_v24  ;;  %v455_v24 = vsel %vm454_vm1, %v2181_v63, 0.0 }
  0xeb   : > { %v449_v42 = vadd.f32 %v448_v32, %v447_v23  ;;  %v1580_v32 = vpop.eup %1579 }
  0xec   : > { %v464_v36 = vmul.f32 900.0, %v1580_v32  ;;  %vm468_vm2 = vweird.f32 %v1580_v32 }
  0xed   : > { %v451_v56 = vadd.f32 %v450_v45, %v449_v42 }
  0xee   : > { %v465_v29 = vsub.f32 1.0, %v464_v36 }
  0xef   : > { %v453_v11 = vadd.f32 %v452_v59, %v451_v56 }
  0xf0   : > { %v466_v45 = vmul.f32 %v1580_v32, %v465_v29 }
  0xf1   : > { %v456_v5 = vadd.f32 %v455_v24, %v453_v11 }
  0xf2   : > { %v467_v51 = vadd.f32 %v1580_v32, %v466_v45 }
  0xf3   : > { %v457_v23 = vrot.slane %v456_v5, 4 }
  0xf4   : > { %v2185_v60 = vsel %vm468_vm2, %v1580_v32, %v467_v51 }
  0xf5   : > { %v458_v50 = vadd.f32 %v457_v23, %v456_v5 }
  0xf7   : > { %v459_v38 = vrot.slane %v458_v50, 2 }
  0xf9   : > { %v460_v42 = vadd.f32 %v459_v38, %v458_v50 }
  0xfb   : > { %v461_v18 = vrot.slane %v460_v42, 1 }
  0xfd   : > { %v462_v9 = vadd.f32 %v461_v18, %v460_v42 }
  0xff   : > { %v2188_v56 = vmul.f32 %v2185_v60, %v462_v9 }
 0x101   : > { %v2192_v11 = vsub.f32 %v1621_v0, %v2188_v56  ;;  %v2196_v15 = vsub.f32 %v1624_v1, %v2188_v56  ;;  %v2200_v29 = vsub.f32 %v1627_v2, %v2188_v56  ;;  %v2204_v18 = vsub.f32 %v1630_v3, %v2188_v56 }
 0x102   : > { %v2208_v9 = vsub.f32 %v1639_v7, %v2188_v56  ;;  %v2218_v2 = vsub.f32 %v1644_v10, %v2188_v56  ;;  %v2224_v7 = vsub.f32 %v1649_v13, %v2188_v56  ;;  %v2233_v10 = vsub.f32 %v1654_v16, %v2188_v56 }
 0x103   : > { %v584_v0 = vmul.f32 %v2192_v11, %v2192_v11  ;;  %v585_v38 = vmul.f32 %v2196_v15, %v2196_v15  ;;  %v586_v1 = vmul.f32 %v2200_v29, %v2200_v29  ;;  %v587_v3 = vmul.f32 %v2204_v18, %v2204_v18 }
 0x104   : > { %v588_v50 = vmul.f32 %v2208_v9, %v2208_v9  ;;  %v589_v5 = vmul.f32 %v2218_v2, %v2218_v2  ;;  %v2240_v32 = vsub.f32 %v1659_v19, %v2188_v56  ;;  %v590_v42 = vmul.f32 %v2224_v7, %v2224_v7 }
 0x105   : > { %v697_v36 = vsel %vm230_vm0, %v584_v0, 0.0  ;;  %v698_v51 = vsel %vm230_vm0, %v585_v38, 0.0  ;;  %v700_v24 = vsel %vm230_vm0, %v586_v1, 0.0  ;;  %v702_v13 = vsel %vm230_vm0, %v587_v3, 0.0 }
 0x106   : > { %v699_v59 = vadd.f32 %v698_v51, %v697_v36  ;;  %v704_v45 = vsel %vm230_vm0, %v588_v50, 0.0  ;;  %v2247_v16 = vsub.f32 %v1664_v22, %v2188_v56  ;;  %v591_v38 = vmul.f32 %v2233_v10, %v2233_v10 }
 0x107   : > { %v706_v1 = vsel %vm230_vm0, %v589_v5, 0.0  ;;  %v2254_v19 = vsub.f32 %v1669_v25, %v2188_v56  ;;  %v592_v36 = vmul.f32 %v2240_v32, %v2240_v32  ;;  %v708_v50 = vsel %vm230_vm0, %v590_v42, 0.0 }
 0x108   : > { %v701_v23 = vadd.f32 %v700_v24, %v699_v59  ;;  %v2261_v22 = vsub.f32 %v1674_v28, %v2188_v56  ;;  %v593_v59 = vmul.f32 %v2247_v16, %v2247_v16  ;;  %v710_v24 = vsel %vm230_vm0, %v591_v38, 0.0 }
 0x109   : > { %v2268_v25 = vsub.f32 %v1679_v31, %v2188_v56  ;;  %v2275_v28 = vsub.f32 %v1684_v34, %v2188_v56  ;;  %v2282_v31 = vsub.f32 %v1689_v37, %v2188_v56  ;;  %v2289_v34 = vsub.f32 %v1694_v40, %v2188_v56 }
 0x10a   : > { %v703_v0 = vadd.f32 %v702_v13, %v701_v23  ;;  %v594_v13 = vmul.f32 %v2254_v19, %v2254_v19  ;;  %v712_v23 = vsel %vm230_vm0, %v592_v36, 0.0  ;;  %v2296_v37 = vsub.f32 %v1699_v43, %v2188_v56 }
 0x10b   : > { %v2303_v40 = vsub.f32 %v1704_v46, %v2188_v56  ;;  %v2310_v43 = vsub.f32 %v1709_v49, %v2188_v56  ;;  %v2317_v46 = vsub.f32 %v1714_v52, %v2188_v56  ;;  %v2324_v49 = vsub.f32 %v1719_v55, %v2188_v56 }
 0x10c   : > { %v705_v3 = vadd.f32 %v704_v45, %v703_v0  ;;  %v595_v45 = vmul.f32 %v2261_v22, %v2261_v22  ;;  %v714_v0 = vsel %vm230_vm0, %v593_v59, 0.0  ;;  %v2331_v52 = vsub.f32 %v1724_v58, %v2188_v56 }
 0x10d   : > { %v2338_v55 = vsub.f32 %v1729_v61, %v2188_v56  ;;  %v2345_v58 = vsub.f32 %v1734_v4, %v2188_v56  ;;  %v2352_v61 = vsub.f32 %v1739_v8, %v2188_v56  ;;  %v2359_v4 = vsub.f32 %v1744_v12, %v2188_v56 }
 0x10e   : > { %v707_v51 = vadd.f32 %v706_v1, %v705_v3  ;;  %v596_v1 = vmul.f32 %v2268_v25, %v2268_v25  ;;  %v716_v3 = vsel %vm230_vm0, %v594_v13, 0.0  ;;  %v2366_v8 = vsub.f32 %v1749_v17, %v2188_v56 }
 0x10f   : > { %v2373_v12 = vsub.f32 %v1754_v21, %v2188_v56  ;;  %v2380_v17 = vsub.f32 %v1759_v26, %v2188_v56  ;;  %v2387_v21 = vsub.f32 %v1764_v30, %v2188_v56  ;;  %v2394_v26 = vsub.f32 %v1769_v35, %v2188_v56 }
 0x110   : > { %v709_v5 = vadd.f32 %v708_v50, %v707_v51  ;;  %v597_v50 = vmul.f32 %v2275_v28, %v2275_v28  ;;  %v718_v51 = vsel %vm230_vm0, %v595_v45, 0.0  ;;  %v2401_v30 = vsub.f32 %v1774_v39, %v2188_v56 }
 0x111   : > { %v2408_v35 = vsub.f32 %v1779_v44, %v2188_v56  ;;  %v2415_v39 = vsub.f32 %v1784_v48, %v2188_v56  ;;  %v2422_v44 = vsub.f32 %v1789_v53, %v2188_v56  ;;  %v2429_v48 = vsub.f32 %v1794_v57, %v2188_v56 }
 0x112   : > { %v711_v42 = vadd.f32 %v710_v24, %v709_v5  ;;  %v598_v24 = vmul.f32 %v2282_v31, %v2282_v31  ;;  %v720_v5 = vsel %vm230_vm0, %v596_v1, 0.0  ;;  %v2436_v53 = vsub.f32 %v1799_v62, %v2188_v56 }
 0x113   : > { %v2443_v57 = vsub.f32 %v1804_v6, %v2188_v56  ;;  %v2450_v62 = vsub.f32 %v1809_v14, %v2188_v56  ;;  %v2457_v6 = vsub.f32 %v1814_v20, %v2188_v56  ;;  %v2464_v14 = vsub.f32 %v1819_v27, %v2188_v56 }
 0x114   : > { %v713_v38 = vadd.f32 %v712_v23, %v711_v42  ;;  %v599_v23 = vmul.f32 %v2289_v34, %v2289_v34  ;;  %v722_v42 = vsel %vm230_vm0, %v597_v50, 0.0  ;;  %v2471_v20 = vsub.f32 %v1824_v33, %v2188_v56 }
 0x115   : > { %v2478_v27 = vsub.f32 %v1829_v41, %v2188_v56  ;;  %v2485_v33 = vsub.f32 %v1834_v47, %v2188_v56  ;;  %v2492_v41 = vsub.f32 %v1839_v54, %v2188_v56 }
 0x116   : > { %v715_v36 = vadd.f32 %v714_v0, %v713_v38  ;;  %v600_v0 = vmul.f32 %v2296_v37, %v2296_v37  ;;  %v724_v38 = vsel %vm230_vm0, %v598_v24, 0.0 }
 0x117   : > { %3653 = vst [vmem:[#allocation69_spill] sm:$0xff] %v2478_v27 }
 0x118   : > { %v717_v59 = vadd.f32 %v716_v3, %v715_v36  ;;  %v601_v3 = vmul.f32 %v2303_v40, %v2303_v40  ;;  %v726_v36 = vsel %vm230_vm0, %v599_v23, 0.0  ;;  %3654 = vst [vmem:[#allocation70_spill] sm:$0xff] %v2485_v33 }
 0x119   : > { %3655 = vst [vmem:[#allocation71_spill] sm:$0xff] %v2492_v41 }
 0x11a   : > { %v719_v13 = vadd.f32 %v718_v51, %v717_v59  ;;  %v602_v51 = vmul.f32 %v2310_v43, %v2310_v43  ;;  %v728_v59 = vsel %vm230_vm0, %v600_v0, 0.0 }
 0x11c   : > { %v721_v45 = vadd.f32 %v720_v5, %v719_v13  ;;  %v603_v5 = vmul.f32 %v2317_v46, %v2317_v46  ;;  %v730_v13 = vsel %vm230_vm0, %v601_v3, 0.0 }
 0x11e   : > { %v723_v1 = vadd.f32 %v722_v42, %v721_v45  ;;  %v604_v42 = vmul.f32 %v2324_v49, %v2324_v49  ;;  %v732_v45 = vsel %vm230_vm0, %v602_v51, 0.0 }
 0x120   : > { %v725_v50 = vadd.f32 %v724_v38, %v723_v1  ;;  %v605_v38 = vmul.f32 %v2331_v52, %v2331_v52  ;;  %v734_v1 = vsel %vm230_vm0, %v603_v5, 0.0 }
 0x122   : > { %v727_v24 = vadd.f32 %v726_v36, %v725_v50  ;;  %v606_v36 = vmul.f32 %v2338_v55, %v2338_v55  ;;  %v736_v50 = vsel %vm230_vm0, %v604_v42, 0.0 }
 0x124   : > { %v729_v23 = vadd.f32 %v728_v59, %v727_v24  ;;  %v607_v59 = vmul.f32 %v2345_v58, %v2345_v58  ;;  %v738_v24 = vsel %vm230_vm0, %v605_v38, 0.0 }
 0x126   : > { %v731_v0 = vadd.f32 %v730_v13, %v729_v23  ;;  %v608_v13 = vmul.f32 %v2352_v61, %v2352_v61  ;;  %v740_v23 = vsel %vm230_vm0, %v606_v36, 0.0 }
 0x128   : > { %v733_v3 = vadd.f32 %v732_v45, %v731_v0  ;;  %v609_v45 = vmul.f32 %v2359_v4, %v2359_v4  ;;  %v742_v0 = vsel %vm230_vm0, %v607_v59, 0.0 }
 0x12a   : > { %v735_v51 = vadd.f32 %v734_v1, %v733_v3  ;;  %v610_v1 = vmul.f32 %v2366_v8, %v2366_v8  ;;  %v744_v3 = vsel %vm230_vm0, %v608_v13, 0.0 }
 0x12c   : > { %v737_v5 = vadd.f32 %v736_v50, %v735_v51  ;;  %v611_v50 = vmul.f32 %v2373_v12, %v2373_v12  ;;  %v746_v51 = vsel %vm230_vm0, %v609_v45, 0.0 }
 0x12e   : > { %v739_v42 = vadd.f32 %v738_v24, %v737_v5  ;;  %v612_v24 = vmul.f32 %v2380_v17, %v2380_v17  ;;  %v748_v5 = vsel %vm230_vm0, %v610_v1, 0.0 }
 0x130   : > { %v741_v38 = vadd.f32 %v740_v23, %v739_v42  ;;  %v613_v23 = vmul.f32 %v2387_v21, %v2387_v21  ;;  %v750_v42 = vsel %vm230_vm0, %v611_v50, 0.0 }
 0x132   : > { %v743_v36 = vadd.f32 %v742_v0, %v741_v38  ;;  %v614_v0 = vmul.f32 %v2394_v26, %v2394_v26  ;;  %v752_v38 = vsel %vm230_vm0, %v612_v24, 0.0 }
 0x134   : > { %v745_v59 = vadd.f32 %v744_v3, %v743_v36  ;;  %v615_v3 = vmul.f32 %v2401_v30, %v2401_v30  ;;  %v754_v36 = vsel %vm230_vm0, %v613_v23, 0.0 }
 0x136   : > { %v747_v13 = vadd.f32 %v746_v51, %v745_v59  ;;  %v616_v51 = vmul.f32 %v2408_v35, %v2408_v35  ;;  %v756_v59 = vsel %vm230_vm0, %v614_v0, 0.0 }
 0x138   : > { %v749_v45 = vadd.f32 %v748_v5, %v747_v13  ;;  %v617_v5 = vmul.f32 %v2415_v39, %v2415_v39  ;;  %v758_v13 = vsel %vm230_vm0, %v615_v3, 0.0 }
 0x13a   : > { %v751_v1 = vadd.f32 %v750_v42, %v749_v45  ;;  %v618_v42 = vmul.f32 %v2422_v44, %v2422_v44  ;;  %v760_v45 = vsel %vm230_vm0, %v616_v51, 0.0 }
 0x13c   : > { %v753_v50 = vadd.f32 %v752_v38, %v751_v1  ;;  %v619_v38 = vmul.f32 %v2429_v48, %v2429_v48  ;;  %v762_v1 = vsel %vm230_vm0, %v617_v5, 0.0 }
 0x13e   : > { %v755_v24 = vadd.f32 %v754_v36, %v753_v50  ;;  %v620_v36 = vmul.f32 %v2436_v53, %v2436_v53  ;;  %v764_v50 = vsel %vm230_vm0, %v618_v42, 0.0 }
 0x140   : > { %v757_v23 = vadd.f32 %v756_v59, %v755_v24  ;;  %v621_v59 = vmul.f32 %v2443_v57, %v2443_v57  ;;  %v766_v24 = vsel %vm230_vm0, %v619_v38, 0.0 }
 0x142   : > { %v759_v0 = vadd.f32 %v758_v13, %v757_v23  ;;  %v622_v13 = vmul.f32 %v2450_v62, %v2450_v62  ;;  %v768_v23 = vsel %vm230_vm0, %v620_v36, 0.0 }
 0x144   : > { %v761_v3 = vadd.f32 %v760_v45, %v759_v0  ;;  %v623_v45 = vmul.f32 %v2457_v6, %v2457_v6  ;;  %v770_v0 = vsel %vm230_vm0, %v621_v59, 0.0 }
 0x146   : > { %v763_v51 = vadd.f32 %v762_v1, %v761_v3  ;;  %v624_v1 = vmul.f32 %v2464_v14, %v2464_v14  ;;  %v772_v3 = vsel %vm230_vm0, %v622_v13, 0.0 }
 0x148   : > { %v765_v5 = vadd.f32 %v764_v50, %v763_v51  ;;  %v625_v50 = vmul.f32 %v2471_v20, %v2471_v20  ;;  %v774_v51 = vsel %vm230_vm0, %v623_v45, 0.0 }
 0x14a   : > { %v767_v42 = vadd.f32 %v766_v24, %v765_v5  ;;  %v626_v24 = vmul.f32 %v2478_v27, %v2478_v27  ;;  %v776_v5 = vsel %vm230_vm0, %v624_v1, 0.0  ;;  %v778_v45 = vsel %vm230_vm0, %v625_v50, 0.0 }
 0x14c   : > { %v769_v38 = vadd.f32 %v768_v23, %v767_v42  ;;  %v3656_v23 = vld [vmem:[#allocation2_spill] sm:$0xff]  ;;  %v627_v42 = vmul.f32 %v2485_v33, %v2485_v33  ;;  %v780_v1 = vsel %vm230_vm0, %v626_v24, 0.0 }
 0x14d   : > { %v2499_v47 = vsub.f32 %v3656_v23, %v2188_v56 }
 0x14e   : > { %v771_v36 = vadd.f32 %v770_v0, %v769_v38  ;;  %v3658_v38 = vld [vmem:[#allocation3_spill] sm:$0xff]  ;;  %v782_v50 = vsel %vm230_vm0, %v627_v42, 0.0 }
 0x14f   : > { %3657 = vst [vmem:[#allocation2_spill] sm:$0xff] %v2499_v47  ;;  %v2506_v54 = vsub.f32 %v3658_v38, %v2188_v56  ;;  %v629_v23 = vmul.f32 %v2499_v47, %v2499_v47 }
 0x150   : > { %v773_v59 = vadd.f32 %v772_v3, %v771_v36  ;;  %v628_v3 = vmul.f32 %v2492_v41, %v2492_v41 }
 0x151   : > { %3659 = vst [vmem:[#allocation3_spill] sm:$0xff] %v2506_v54  ;;  %v630_v41 = vmul.f32 %v2506_v54, %v2506_v54  ;;  %v786_v42 = vsel %vm230_vm0, %v629_v23, 0.0 }
 0x152   : > { %v775_v13 = vadd.f32 %v774_v51, %v773_v59  ;;  %v3660_v51 = vld [vmem:[#allocation4_spill] sm:$0xff]  ;;  %v784_v24 = vsel %vm230_vm0, %v628_v3, 0.0 }
 0x153   : > { %v2513_v59 = vsub.f32 %v3660_v51, %v2188_v56  ;;  %v788_v3 = vsel %vm230_vm0, %v630_v41, 0.0 }
 0x154   : > { %v777_v0 = vadd.f32 %v776_v5, %v775_v13  ;;  %v3662_v13 = vld [vmem:[#allocation5_spill] sm:$0xff] }
 0x155   : > { %3661 = vst [vmem:[#allocation4_spill] sm:$0xff] %v2513_v59  ;;  %v2520_v38 = vsub.f32 %v3662_v13, %v2188_v56  ;;  %v631_v47 = vmul.f32 %v2513_v59, %v2513_v59 }
 0x156   : > { %v779_v36 = vadd.f32 %v778_v45, %v777_v0  ;;  %v3664_v0 = vld [vmem:[#allocation6_spill] sm:$0xff] }
 0x157   : > { %3663 = vst [vmem:[#allocation5_spill] sm:$0xff] %v2520_v38  ;;  %v2527_v51 = vsub.f32 %v3664_v0, %v2188_v56  ;;  %v632_v54 = vmul.f32 %v2520_v38, %v2520_v38  ;;  %v790_v23 = vsel %vm230_vm0, %v631_v47, 0.0 }
 0x158   : > { %v781_v5 = vadd.f32 %v780_v1, %v779_v36  ;;  %v3666_v36 = vld [vmem:[#allocation7_spill] sm:$0xff] }
 0x159   : > { %3665 = vst [vmem:[#allocation6_spill] sm:$0xff] %v2527_v51  ;;  %v2534_v13 = vsub.f32 %v3666_v36, %v2188_v56  ;;  %v633_v59 = vmul.f32 %v2527_v51, %v2527_v51  ;;  %v792_v41 = vsel %vm230_vm0, %v632_v54, 0.0 }
 0x15a   : > { %v783_v45 = vadd.f32 %v782_v50, %v781_v5  ;;  %v3668_v5 = vld [vmem:[#allocation8_spill] sm:$0xff] }
 0x15b   : > { %3667 = vst [vmem:[#allocation7_spill] sm:$0xff] %v2534_v13  ;;  %v2541_v0 = vsub.f32 %v3668_v5, %v2188_v56  ;;  %v634_v38 = vmul.f32 %v2534_v13, %v2534_v13  ;;  %v794_v47 = vsel %vm230_vm0, %v633_v59, 0.0 }
 0x15c   : > { %v785_v1 = vadd.f32 %v784_v24, %v783_v45  ;;  %v3670_v45 = vld [vmem:[#allocation9_spill] sm:$0xff] }
 0x15d   : > { %3669 = vst [vmem:[#allocation8_spill] sm:$0xff] %v2541_v0  ;;  %v2548_v36 = vsub.f32 %v3670_v45, %v2188_v56  ;;  %v635_v51 = vmul.f32 %v2541_v0, %v2541_v0  ;;  %v796_v54 = vsel %vm230_vm0, %v634_v38, 0.0 }
 0x15e   : > { %v787_v50 = vadd.f32 %v786_v42, %v785_v1  ;;  %v3672_v1 = vld [vmem:[#allocation10_spill] sm:$0xff] }
 0x15f   : > { %3671 = vst [vmem:[#allocation9_spill] sm:$0xff] %v2548_v36  ;;  %v2555_v5 = vsub.f32 %v3672_v1, %v2188_v56  ;;  %v636_v13 = vmul.f32 %v2548_v36, %v2548_v36  ;;  %v798_v59 = vsel %vm230_vm0, %v635_v51, 0.0 }
 0x160   : > { %v789_v24 = vadd.f32 %v788_v3, %v787_v50  ;;  %v3674_v50 = vld [vmem:[#allocation11_spill] sm:$0xff] }
 0x161   : > { %3673 = vst [vmem:[#allocation10_spill] sm:$0xff] %v2555_v5  ;;  %v2562_v45 = vsub.f32 %v3674_v50, %v2188_v56  ;;  %v637_v0 = vmul.f32 %v2555_v5, %v2555_v5  ;;  %v800_v38 = vsel %vm230_vm0, %v636_v13, 0.0 }
 0x162   : > { %v791_v42 = vadd.f32 %v790_v23, %v789_v24  ;;  %v3676_v24 = vld [vmem:[#allocation12_spill] sm:$0xff] }
 0x163   : > { %3675 = vst [vmem:[#allocation11_spill] sm:$0xff] %v2562_v45  ;;  %v2569_v1 = vsub.f32 %v3676_v24, %v2188_v56  ;;  %v638_v36 = vmul.f32 %v2562_v45, %v2562_v45  ;;  %v802_v51 = vsel %vm230_vm0, %v637_v0, 0.0 }
 0x164   : > { %v793_v3 = vadd.f32 %v792_v41, %v791_v42  ;;  %v3678_v42 = vld [vmem:[#allocation13_spill] sm:$0xff] }
 0x165   : > { %3677 = vst [vmem:[#allocation12_spill] sm:$0xff] %v2569_v1  ;;  %v2576_v50 = vsub.f32 %v3678_v42, %v2188_v56  ;;  %v639_v5 = vmul.f32 %v2569_v1, %v2569_v1  ;;  %v804_v13 = vsel %vm230_vm0, %v638_v36, 0.0 }
 0x166   : > { %v795_v23 = vadd.f32 %v794_v47, %v793_v3  ;;  %v3680_v3 = vld [vmem:[#allocation14_spill] sm:$0xff] }
 0x167   : > { %3679 = vst [vmem:[#allocation13_spill] sm:$0xff] %v2576_v50  ;;  %v2583_v24 = vsub.f32 %v3680_v3, %v2188_v56  ;;  %v640_v45 = vmul.f32 %v2576_v50, %v2576_v50  ;;  %v806_v0 = vsel %vm230_vm0, %v639_v5, 0.0 }
 0x168   : > { %v797_v41 = vadd.f32 %v796_v54, %v795_v23  ;;  %v3682_v23 = vld [vmem:[#allocation15_spill] sm:$0xff] }
 0x169   : > { %3681 = vst [vmem:[#allocation14_spill] sm:$0xff] %v2583_v24  ;;  %v2590_v42 = vsub.f32 %v3682_v23, %v2188_v56  ;;  %v641_v1 = vmul.f32 %v2583_v24, %v2583_v24  ;;  %v808_v36 = vsel %vm230_vm0, %v640_v45, 0.0 }
 0x16a   : > { %v799_v47 = vadd.f32 %v798_v59, %v797_v41  ;;  %v3684_v41 = vld [vmem:[#allocation16_spill] sm:$0xff] }
 0x16b   : > { %3683 = vst [vmem:[#allocation15_spill] sm:$0xff] %v2590_v42  ;;  %v2597_v3 = vsub.f32 %v3684_v41, %v2188_v56  ;;  %v642_v50 = vmul.f32 %v2590_v42, %v2590_v42  ;;  %v810_v5 = vsel %vm230_vm0, %v641_v1, 0.0 }
 0x16c   : > { %v801_v54 = vadd.f32 %v800_v38, %v799_v47  ;;  %v3686_v47 = vld [vmem:[#allocation17_spill] sm:$0xff] }
 0x16d   : > { %3685 = vst [vmem:[#allocation16_spill] sm:$0xff] %v2597_v3  ;;  %v2604_v23 = vsub.f32 %v3686_v47, %v2188_v56  ;;  %v643_v24 = vmul.f32 %v2597_v3, %v2597_v3  ;;  %v812_v45 = vsel %vm230_vm0, %v642_v50, 0.0 }
 0x16e   : > { %v803_v59 = vadd.f32 %v802_v51, %v801_v54  ;;  %v3688_v54 = vld [vmem:[#allocation18_spill] sm:$0xff] }
 0x16f   : > { %3687 = vst [vmem:[#allocation17_spill] sm:$0xff] %v2604_v23  ;;  %v2611_v41 = vsub.f32 %v3688_v54, %v2188_v56  ;;  %v644_v42 = vmul.f32 %v2604_v23, %v2604_v23  ;;  %v814_v1 = vsel %vm230_vm0, %v643_v24, 0.0 }
 0x170   : > { %v805_v38 = vadd.f32 %v804_v13, %v803_v59  ;;  %v3690_v59 = vld [vmem:[#allocation19_spill] sm:$0xff] }
 0x171   : > { %3689 = vst [vmem:[#allocation18_spill] sm:$0xff] %v2611_v41  ;;  %v2618_v47 = vsub.f32 %v3690_v59, %v2188_v56  ;;  %v645_v3 = vmul.f32 %v2611_v41, %v2611_v41  ;;  %v816_v50 = vsel %vm230_vm0, %v644_v42, 0.0 }
 0x172   : > { %v807_v51 = vadd.f32 %v806_v0, %v805_v38  ;;  %v3692_v38 = vld [vmem:[#allocation20_spill] sm:$0xff] }
 0x173   : > { %3691 = vst [vmem:[#allocation19_spill] sm:$0xff] %v2618_v47  ;;  %v2625_v54 = vsub.f32 %v3692_v38, %v2188_v56  ;;  %v646_v23 = vmul.f32 %v2618_v47, %v2618_v47  ;;  %v818_v24 = vsel %vm230_vm0, %v645_v3, 0.0 }
 0x174   : > { %v809_v13 = vadd.f32 %v808_v36, %v807_v51  ;;  %v3694_v51 = vld [vmem:[#allocation21_spill] sm:$0xff] }
 0x175   : > { %3693 = vst [vmem:[#allocation20_spill] sm:$0xff] %v2625_v54  ;;  %v2632_v59 = vsub.f32 %v3694_v51, %v2188_v56  ;;  %v647_v41 = vmul.f32 %v2625_v54, %v2625_v54  ;;  %v820_v42 = vsel %vm230_vm0, %v646_v23, 0.0 }
 0x176   : > { %v811_v0 = vadd.f32 %v810_v5, %v809_v13  ;;  %v3696_v13 = vld [vmem:[#allocation22_spill] sm:$0xff] }
 0x177   : > { %3695 = vst [vmem:[#allocation21_spill] sm:$0xff] %v2632_v59  ;;  %v2639_v38 = vsub.f32 %v3696_v13, %v2188_v56  ;;  %v648_v47 = vmul.f32 %v2632_v59, %v2632_v59  ;;  %v822_v3 = vsel %vm230_vm0, %v647_v41, 0.0 }
 0x178   : > { %v813_v36 = vadd.f32 %v812_v45, %v811_v0  ;;  %v3698_v0 = vld [vmem:[#allocation23_spill] sm:$0xff] }
 0x179   : > { %3697 = vst [vmem:[#allocation22_spill] sm:$0xff] %v2639_v38  ;;  %v2646_v51 = vsub.f32 %v3698_v0, %v2188_v56  ;;  %v649_v54 = vmul.f32 %v2639_v38, %v2639_v38  ;;  %v824_v23 = vsel %vm230_vm0, %v648_v47, 0.0 }
 0x17a   : > { %v815_v5 = vadd.f32 %v814_v1, %v813_v36  ;;  %v3700_v36 = vld [vmem:[#allocation24_spill] sm:$0xff] }
 0x17b   : > { %3699 = vst [vmem:[#allocation23_spill] sm:$0xff] %v2646_v51  ;;  %v2653_v13 = vsub.f32 %v3700_v36, %v2188_v56  ;;  %v650_v59 = vmul.f32 %v2646_v51, %v2646_v51  ;;  %v826_v41 = vsel %vm230_vm0, %v649_v54, 0.0 }
 0x17c   : > { %v817_v45 = vadd.f32 %v816_v50, %v815_v5  ;;  %v3702_v5 = vld [vmem:[#allocation25_spill] sm:$0xff] }
 0x17d   : > { %3701 = vst [vmem:[#allocation24_spill] sm:$0xff] %v2653_v13  ;;  %v2660_v0 = vsub.f32 %v3702_v5, %v2188_v56  ;;  %v651_v38 = vmul.f32 %v2653_v13, %v2653_v13  ;;  %v828_v47 = vsel %vm230_vm0, %v650_v59, 0.0 }
 0x17e   : > { %v819_v1 = vadd.f32 %v818_v24, %v817_v45  ;;  %v3704_v45 = vld [vmem:[#allocation26_spill] sm:$0xff] }
 0x17f   : > { %3703 = vst [vmem:[#allocation25_spill] sm:$0xff] %v2660_v0  ;;  %v2667_v36 = vsub.f32 %v3704_v45, %v2188_v56  ;;  %v652_v51 = vmul.f32 %v2660_v0, %v2660_v0  ;;  %v830_v54 = vsel %vm230_vm0, %v651_v38, 0.0 }
 0x180   : > { %v821_v50 = vadd.f32 %v820_v42, %v819_v1  ;;  %v3706_v1 = vld [vmem:[#allocation27_spill] sm:$0xff] }
 0x181   : > { %3705 = vst [vmem:[#allocation26_spill] sm:$0xff] %v2667_v36  ;;  %v2674_v5 = vsub.f32 %v3706_v1, %v2188_v56  ;;  %v653_v13 = vmul.f32 %v2667_v36, %v2667_v36  ;;  %v832_v59 = vsel %vm230_vm0, %v652_v51, 0.0 }
 0x182   : > { %v823_v24 = vadd.f32 %v822_v3, %v821_v50  ;;  %v3708_v50 = vld [vmem:[#allocation28_spill] sm:$0xff] }
 0x183   : > { %3707 = vst [vmem:[#allocation27_spill] sm:$0xff] %v2674_v5  ;;  %v2681_v45 = vsub.f32 %v3708_v50, %v2188_v56  ;;  %v654_v0 = vmul.f32 %v2674_v5, %v2674_v5  ;;  %v834_v38 = vsel %vm230_vm0, %v653_v13, 0.0 }
 0x184   : > { %v825_v42 = vadd.f32 %v824_v23, %v823_v24  ;;  %v3710_v24 = vld [vmem:[#allocation29_spill] sm:$0xff] }
 0x185   : > { %3709 = vst [vmem:[#allocation28_spill] sm:$0xff] %v2681_v45  ;;  %v2688_v1 = vsub.f32 %v3710_v24, %v2188_v56  ;;  %v655_v36 = vmul.f32 %v2681_v45, %v2681_v45  ;;  %v836_v51 = vsel %vm230_vm0, %v654_v0, 0.0 }
 0x186   : > { %v827_v3 = vadd.f32 %v826_v41, %v825_v42  ;;  %v3712_v42 = vld [vmem:[#allocation30_spill] sm:$0xff] }
 0x187   : > { %3711 = vst [vmem:[#allocation29_spill] sm:$0xff] %v2688_v1  ;;  %v2695_v50 = vsub.f32 %v3712_v42, %v2188_v56  ;;  %v656_v5 = vmul.f32 %v2688_v1, %v2688_v1  ;;  %v838_v13 = vsel %vm230_vm0, %v655_v36, 0.0 }
 0x188   : > { %v829_v23 = vadd.f32 %v828_v47, %v827_v3  ;;  %v3714_v3 = vld [vmem:[#allocation31_spill] sm:$0xff] }
 0x189   : > { %3713 = vst [vmem:[#allocation30_spill] sm:$0xff] %v2695_v50  ;;  %v2702_v24 = vsub.f32 %v3714_v3, %v2188_v56  ;;  %v657_v45 = vmul.f32 %v2695_v50, %v2695_v50  ;;  %v840_v0 = vsel %vm230_vm0, %v656_v5, 0.0 }
 0x18a   : > { %v831_v41 = vadd.f32 %v830_v54, %v829_v23  ;;  %v3716_v23 = vld [vmem:[#allocation32_spill] sm:$0xff] }
 0x18b   : > { %3715 = vst [vmem:[#allocation31_spill] sm:$0xff] %v2702_v24  ;;  %v2709_v42 = vsub.f32 %v3716_v23, %v2188_v56  ;;  %v658_v1 = vmul.f32 %v2702_v24, %v2702_v24  ;;  %v842_v36 = vsel %vm230_vm0, %v657_v45, 0.0 }
 0x18c   : > { %v833_v47 = vadd.f32 %v832_v59, %v831_v41  ;;  %v3718_v41 = vld [vmem:[#allocation33_spill] sm:$0xff] }
 0x18d   : > { %3717 = vst [vmem:[#allocation32_spill] sm:$0xff] %v2709_v42  ;;  %v2716_v3 = vsub.f32 %v3718_v41, %v2188_v56  ;;  %v659_v50 = vmul.f32 %v2709_v42, %v2709_v42  ;;  %v844_v5 = vsel %vm230_vm0, %v658_v1, 0.0 }
 0x18e   : > { %v835_v54 = vadd.f32 %v834_v38, %v833_v47  ;;  %v3720_v47 = vld [vmem:[#allocation34_spill] sm:$0xff] }
 0x18f   : > { %3719 = vst [vmem:[#allocation33_spill] sm:$0xff] %v2716_v3  ;;  %v2723_v23 = vsub.f32 %v3720_v47, %v2188_v56  ;;  %v660_v24 = vmul.f32 %v2716_v3, %v2716_v3  ;;  %v846_v45 = vsel %vm230_vm0, %v659_v50, 0.0 }
 0x190   : > { %v837_v59 = vadd.f32 %v836_v51, %v835_v54  ;;  %v3722_v54 = vld [vmem:[#allocation35_spill] sm:$0xff] }
 0x191   : > { %3721 = vst [vmem:[#allocation34_spill] sm:$0xff] %v2723_v23  ;;  %v2730_v41 = vsub.f32 %v3722_v54, %v2188_v56  ;;  %v661_v42 = vmul.f32 %v2723_v23, %v2723_v23  ;;  %v848_v1 = vsel %vm230_vm0, %v660_v24, 0.0 }
 0x192   : > { %v839_v38 = vadd.f32 %v838_v13, %v837_v59  ;;  %v3724_v59 = vld [vmem:[#allocation36_spill] sm:$0xff] }
 0x193   : > { %3723 = vst [vmem:[#allocation35_spill] sm:$0xff] %v2730_v41  ;;  %v2737_v47 = vsub.f32 %v3724_v59, %v2188_v56  ;;  %v662_v3 = vmul.f32 %v2730_v41, %v2730_v41  ;;  %v850_v50 = vsel %vm230_vm0, %v661_v42, 0.0 }
 0x194   : > { %v841_v51 = vadd.f32 %v840_v0, %v839_v38  ;;  %v3726_v38 = vld [vmem:[#allocation37_spill] sm:$0xff] }
 0x195   : > { %3725 = vst [vmem:[#allocation36_spill] sm:$0xff] %v2737_v47  ;;  %v2744_v54 = vsub.f32 %v3726_v38, %v2188_v56  ;;  %v663_v23 = vmul.f32 %v2737_v47, %v2737_v47  ;;  %v852_v24 = vsel %vm230_vm0, %v662_v3, 0.0 }
 0x196   : > { %v843_v13 = vadd.f32 %v842_v36, %v841_v51  ;;  %v3728_v51 = vld [vmem:[#allocation38_spill] sm:$0xff] }
 0x197   : > { %3727 = vst [vmem:[#allocation37_spill] sm:$0xff] %v2744_v54  ;;  %v2751_v59 = vsub.f32 %v3728_v51, %v2188_v56  ;;  %v664_v41 = vmul.f32 %v2744_v54, %v2744_v54  ;;  %v854_v42 = vsel %vm230_vm0, %v663_v23, 0.0 }
 0x198   : > { %v845_v0 = vadd.f32 %v844_v5, %v843_v13  ;;  %v3730_v13 = vld [vmem:[#allocation39_spill] sm:$0xff] }
 0x199   : > { %3729 = vst [vmem:[#allocation38_spill] sm:$0xff] %v2751_v59  ;;  %v2758_v38 = vsub.f32 %v3730_v13, %v2188_v56  ;;  %v665_v47 = vmul.f32 %v2751_v59, %v2751_v59  ;;  %v856_v3 = vsel %vm230_vm0, %v664_v41, 0.0 }
 0x19a   : > { %v847_v36 = vadd.f32 %v846_v45, %v845_v0  ;;  %v3732_v0 = vld [vmem:[#allocation40_spill] sm:$0xff] }
 0x19b   : > { %3731 = vst [vmem:[#allocation39_spill] sm:$0xff] %v2758_v38  ;;  %v2765_v51 = vsub.f32 %v3732_v0, %v2188_v56  ;;  %v666_v54 = vmul.f32 %v2758_v38, %v2758_v38  ;;  %v858_v23 = vsel %vm230_vm0, %v665_v47, 0.0 }
 0x19c   : > { %v849_v5 = vadd.f32 %v848_v1, %v847_v36  ;;  %v3734_v36 = vld [vmem:[#allocation41_spill] sm:$0xff] }
 0x19d   : > { %3733 = vst [vmem:[#allocation40_spill] sm:$0xff] %v2765_v51  ;;  %v2772_v13 = vsub.f32 %v3734_v36, %v2188_v56  ;;  %v667_v59 = vmul.f32 %v2765_v51, %v2765_v51  ;;  %v860_v41 = vsel %vm230_vm0, %v666_v54, 0.0 }
 0x19e   : > { %v851_v45 = vadd.f32 %v850_v50, %v849_v5  ;;  %v3736_v5 = vld [vmem:[#allocation42_spill] sm:$0xff] }
 0x19f   : > { %3735 = vst [vmem:[#allocation41_spill] sm:$0xff] %v2772_v13  ;;  %v2779_v0 = vsub.f32 %v3736_v5, %v2188_v56  ;;  %v668_v38 = vmul.f32 %v2772_v13, %v2772_v13  ;;  %v862_v47 = vsel %vm230_vm0, %v667_v59, 0.0 }
 0x1a0   : > { %v853_v1 = vadd.f32 %v852_v24, %v851_v45  ;;  %v3738_v45 = vld [vmem:[#allocation43_spill] sm:$0xff] }
 0x1a1   : > { %3737 = vst [vmem:[#allocation42_spill] sm:$0xff] %v2779_v0  ;;  %v2786_v36 = vsub.f32 %v3738_v45, %v2188_v56  ;;  %v669_v51 = vmul.f32 %v2779_v0, %v2779_v0  ;;  %v864_v54 = vsel %vm230_vm0, %v668_v38, 0.0 }
 0x1a2   : > { %v855_v50 = vadd.f32 %v854_v42, %v853_v1  ;;  %v3740_v1 = vld [vmem:[#allocation44_spill] sm:$0xff] }
 0x1a3   : > { %3739 = vst [vmem:[#allocation43_spill] sm:$0xff] %v2786_v36  ;;  %v2793_v5 = vsub.f32 %v3740_v1, %v2188_v56  ;;  %v670_v13 = vmul.f32 %v2786_v36, %v2786_v36  ;;  %v866_v59 = vsel %vm230_vm0, %v669_v51, 0.0 }
 0x1a4   : > { %v857_v24 = vadd.f32 %v856_v3, %v855_v50  ;;  %v3742_v50 = vld [vmem:[#allocation45_spill] sm:$0xff] }
 0x1a5   : > { %3741 = vst [vmem:[#allocation44_spill] sm:$0xff] %v2793_v5  ;;  %v2800_v45 = vsub.f32 %v3742_v50, %v2188_v56  ;;  %v671_v0 = vmul.f32 %v2793_v5, %v2793_v5  ;;  %v868_v38 = vsel %vm230_vm0, %v670_v13, 0.0 }
 0x1a6   : > { %v859_v42 = vadd.f32 %v858_v23, %v857_v24  ;;  %v3744_v24 = vld [vmem:[#allocation46_spill] sm:$0xff] }
 0x1a7   : > { %3743 = vst [vmem:[#allocation45_spill] sm:$0xff] %v2800_v45  ;;  %v2807_v1 = vsub.f32 %v3744_v24, %v2188_v56  ;;  %v672_v36 = vmul.f32 %v2800_v45, %v2800_v45  ;;  %v870_v51 = vsel %vm230_vm0, %v671_v0, 0.0 }
 0x1a8   : > { %v861_v3 = vadd.f32 %v860_v41, %v859_v42  ;;  %v3746_v42 = vld [vmem:[#allocation47_spill] sm:$0xff] }
 0x1a9   : > { %3745 = vst [vmem:[#allocation46_spill] sm:$0xff] %v2807_v1  ;;  %v2814_v50 = vsub.f32 %v3746_v42, %v2188_v56  ;;  %v673_v5 = vmul.f32 %v2807_v1, %v2807_v1  ;;  %v872_v13 = vsel %vm230_vm0, %v672_v36, 0.0 }
 0x1aa   : > { %v863_v23 = vadd.f32 %v862_v47, %v861_v3  ;;  %v3748_v3 = vld [vmem:[#allocation48_spill] sm:$0xff] }
 0x1ab   : > { %3747 = vst [vmem:[#allocation47_spill] sm:$0xff] %v2814_v50  ;;  %v2821_v24 = vsub.f32 %v3748_v3, %v2188_v56  ;;  %v674_v45 = vmul.f32 %v2814_v50, %v2814_v50  ;;  %v874_v0 = vsel %vm230_vm0, %v673_v5, 0.0 }
 0x1ac   : > { %v865_v41 = vadd.f32 %v864_v54, %v863_v23  ;;  %v3750_v23 = vld [vmem:[#allocation49_spill] sm:$0xff] }
 0x1ad   : > { %3749 = vst [vmem:[#allocation48_spill] sm:$0xff] %v2821_v24  ;;  %v2828_v42 = vsub.f32 %v3750_v23, %v2188_v56  ;;  %v675_v1 = vmul.f32 %v2821_v24, %v2821_v24  ;;  %v876_v36 = vsel %vm230_vm0, %v674_v45, 0.0 }
 0x1ae   : > { %v867_v47 = vadd.f32 %v866_v59, %v865_v41  ;;  %v3752_v41 = vld [vmem:[#allocation50_spill] sm:$0xff] }
 0x1af   : > { %3751 = vst [vmem:[#allocation49_spill] sm:$0xff] %v2828_v42  ;;  %v2835_v3 = vsub.f32 %v3752_v41, %v2188_v56  ;;  %v676_v50 = vmul.f32 %v2828_v42, %v2828_v42  ;;  %v878_v5 = vsel %vm230_vm0, %v675_v1, 0.0 }
 0x1b0   : > { %v869_v54 = vadd.f32 %v868_v38, %v867_v47  ;;  %v3754_v47 = vld [vmem:[#allocation51_spill] sm:$0xff] }
 0x1b1   : > { %3753 = vst [vmem:[#allocation50_spill] sm:$0xff] %v2835_v3  ;;  %v2842_v23 = vsub.f32 %v3754_v47, %v2188_v56  ;;  %v677_v24 = vmul.f32 %v2835_v3, %v2835_v3  ;;  %v880_v45 = vsel %vm230_vm0, %v676_v50, 0.0 }
 0x1b2   : > { %v871_v59 = vadd.f32 %v870_v51, %v869_v54  ;;  %v3756_v54 = vld [vmem:[#allocation52_spill] sm:$0xff] }
 0x1b3   : > { %3755 = vst [vmem:[#allocation51_spill] sm:$0xff] %v2842_v23  ;;  %v2849_v41 = vsub.f32 %v3756_v54, %v2188_v56  ;;  %v678_v42 = vmul.f32 %v2842_v23, %v2842_v23  ;;  %v882_v1 = vsel %vm230_vm0, %v677_v24, 0.0 }
 0x1b4   : > { %v873_v38 = vadd.f32 %v872_v13, %v871_v59  ;;  %v3758_v59 = vld [vmem:[#allocation53_spill] sm:$0xff] }
 0x1b5   : > { %3757 = vst [vmem:[#allocation52_spill] sm:$0xff] %v2849_v41  ;;  %v2856_v47 = vsub.f32 %v3758_v59, %v2188_v56  ;;  %v679_v3 = vmul.f32 %v2849_v41, %v2849_v41  ;;  %v884_v50 = vsel %vm230_vm0, %v678_v42, 0.0 }
 0x1b6   : > { %v875_v51 = vadd.f32 %v874_v0, %v873_v38  ;;  %v3760_v38 = vld [vmem:[#allocation54_spill] sm:$0xff] }
 0x1b7   : > { %3759 = vst [vmem:[#allocation53_spill] sm:$0xff] %v2856_v47  ;;  %v2863_v54 = vsub.f32 %v3760_v38, %v2188_v56  ;;  %v680_v23 = vmul.f32 %v2856_v47, %v2856_v47  ;;  %v886_v24 = vsel %vm230_vm0, %v679_v3, 0.0 }
 0x1b8   : > { %v877_v13 = vadd.f32 %v876_v36, %v875_v51  ;;  %v3762_v51 = vld [vmem:[#allocation55_spill] sm:$0xff] }
 0x1b9   : > { %3761 = vst [vmem:[#allocation54_spill] sm:$0xff] %v2863_v54  ;;  %v2870_v59 = vsub.f32 %v3762_v51, %v2188_v56  ;;  %v681_v41 = vmul.f32 %v2863_v54, %v2863_v54  ;;  %v888_v42 = vsel %vm230_vm0, %v680_v23, 0.0 }
 0x1ba   : > { %v879_v0 = vadd.f32 %v878_v5, %v877_v13  ;;  %v3764_v13 = vld [vmem:[#allocation56_spill] sm:$0xff] }
 0x1bb   : > { %3763 = vst [vmem:[#allocation55_spill] sm:$0xff] %v2870_v59  ;;  %v2877_v38 = vsub.f32 %v3764_v13, %v2188_v56  ;;  %v682_v47 = vmul.f32 %v2870_v59, %v2870_v59  ;;  %v890_v3 = vsel %vm230_vm0, %v681_v41, 0.0 }
 0x1bc   : > { %v881_v36 = vadd.f32 %v880_v45, %v879_v0  ;;  %v3766_v0 = vld [vmem:[#allocation57_spill] sm:$0xff] }
 0x1bd   : > { %3765 = vst [vmem:[#allocation56_spill] sm:$0xff] %v2877_v38  ;;  %v2884_v51 = vsub.f32 %v3766_v0, %v2188_v56  ;;  %v683_v54 = vmul.f32 %v2877_v38, %v2877_v38  ;;  %v892_v23 = vsel %vm230_vm0, %v682_v47, 0.0 }
 0x1be   : > { %v883_v5 = vadd.f32 %v882_v1, %v881_v36  ;;  %v3768_v36 = vld [vmem:[#allocation58_spill] sm:$0xff] }
 0x1bf   : > { %3767 = vst [vmem:[#allocation57_spill] sm:$0xff] %v2884_v51  ;;  %v2891_v13 = vsub.f32 %v3768_v36, %v2188_v56  ;;  %v684_v59 = vmul.f32 %v2884_v51, %v2884_v51  ;;  %v894_v41 = vsel %vm230_vm0, %v683_v54, 0.0 }
 0x1c0   : > { %v885_v45 = vadd.f32 %v884_v50, %v883_v5  ;;  %v3770_v5 = vld [vmem:[#allocation59_spill] sm:$0xff] }
 0x1c1   : > { %3769 = vst [vmem:[#allocation58_spill] sm:$0xff] %v2891_v13  ;;  %v2898_v0 = vsub.f32 %v3770_v5, %v2188_v56  ;;  %v685_v38 = vmul.f32 %v2891_v13, %v2891_v13  ;;  %v896_v47 = vsel %vm230_vm0, %v684_v59, 0.0 }
 0x1c2   : > { %v887_v1 = vadd.f32 %v886_v24, %v885_v45  ;;  %v3772_v45 = vld [vmem:[#allocation60_spill] sm:$0xff] }
 0x1c3   : > { %3771 = vst [vmem:[#allocation59_spill] sm:$0xff] %v2898_v0  ;;  %v2905_v36 = vsub.f32 %v3772_v45, %v2188_v56  ;;  %v686_v51 = vmul.f32 %v2898_v0, %v2898_v0  ;;  %v898_v54 = vsel %vm230_vm0, %v685_v38, 0.0 }
 0x1c4   : > { %v889_v50 = vadd.f32 %v888_v42, %v887_v1  ;;  %v3774_v1 = vld [vmem:[#allocation61_spill] sm:$0xff] }
 0x1c5   : > { %3773 = vst [vmem:[#allocation60_spill] sm:$0xff] %v2905_v36  ;;  %v2912_v5 = vsub.f32 %v3774_v1, %v2188_v56  ;;  %v687_v13 = vmul.f32 %v2905_v36, %v2905_v36  ;;  %v900_v59 = vsel %vm230_vm0, %v686_v51, 0.0 }
 0x1c6   : > { %v891_v24 = vadd.f32 %v890_v3, %v889_v50  ;;  %v3776_v50 = vld [vmem:[#allocation62_spill] sm:$0xff] }
 0x1c7   : > { %3775 = vst [vmem:[#allocation61_spill] sm:$0xff] %v2912_v5  ;;  %v2919_v45 = vsub.f32 %v3776_v50, %v2188_v56  ;;  %v688_v0 = vmul.f32 %v2912_v5, %v2912_v5  ;;  %v902_v38 = vsel %vm230_vm0, %v687_v13, 0.0 }
 0x1c8   : > { %v893_v42 = vadd.f32 %v892_v23, %v891_v24  ;;  %v3778_v24 = vld [vmem:[#allocation63_spill] sm:$0xff] }
 0x1c9   : > { %3777 = vst [vmem:[#allocation62_spill] sm:$0xff] %v2919_v45  ;;  %v2926_v1 = vsub.f32 %v3778_v24, %v2188_v56  ;;  %v689_v36 = vmul.f32 %v2919_v45, %v2919_v45  ;;  %v904_v51 = vsel %vm230_vm0, %v688_v0, 0.0 }
 0x1ca   : > { %v895_v3 = vadd.f32 %v894_v41, %v893_v42  ;;  %v3780_v42 = vld [vmem:[#allocation64_spill] sm:$0xff] }
 0x1cb   : > { %3779 = vst [vmem:[#allocation63_spill] sm:$0xff] %v2926_v1  ;;  %v2933_v50 = vsub.f32 %v3780_v42, %v2188_v56  ;;  %v690_v5 = vmul.f32 %v2926_v1, %v2926_v1  ;;  %v906_v13 = vsel %vm230_vm0, %v689_v36, 0.0 }
 0x1cc   : > { %v897_v23 = vadd.f32 %v896_v47, %v895_v3  ;;  %v3782_v3 = vld [vmem:[#allocation65_spill] sm:$0xff] }
 0x1cd   : > { %3781 = vst [vmem:[#allocation64_spill] sm:$0xff] %v2933_v50  ;;  %v2940_v24 = vsub.f32 %v3782_v3, %v2188_v56  ;;  %v691_v45 = vmul.f32 %v2933_v50, %v2933_v50  ;;  %v908_v0 = vsel %vm230_vm0, %v690_v5, 0.0 }
 0x1ce   : > { %v899_v41 = vadd.f32 %v898_v54, %v897_v23  ;;  %v3784_v23 = vld [vmem:[#allocation66_spill] sm:$0xff] }
 0x1cf   : > { %3783 = vst [vmem:[#allocation65_spill] sm:$0xff] %v2940_v24  ;;  %v2947_v42 = vsub.f32 %v3784_v23, %v2188_v56  ;;  %v692_v1 = vmul.f32 %v2940_v24, %v2940_v24  ;;  %v910_v36 = vsel %vm230_vm0, %v691_v45, 0.0 }
 0x1d0   : > { %v901_v47 = vadd.f32 %v900_v59, %v899_v41  ;;  %v3786_v41 = vld [vmem:[#allocation67_spill] sm:$0xff] }
 0x1d1   : > { %3785 = vst [vmem:[#allocation66_spill] sm:$0xff] %v2947_v42  ;;  %v2954_v3 = vsub.f32 %v3786_v41, %v2188_v56  ;;  %v693_v50 = vmul.f32 %v2947_v42, %v2947_v42  ;;  %v912_v5 = vsel %vm230_vm0, %v692_v1, 0.0 }
 0x1d2   : > { %v903_v54 = vadd.f32 %v902_v38, %v901_v47  ;;  %v3788_v47 = vld [vmem:[#allocation68_spill] sm:$0xff] }
 0x1d3   : > { %3787 = vst [vmem:[#allocation67_spill] sm:$0xff] %v2954_v3  ;;  %v2961_v23 = vsub.f32 %v3788_v47, %v2188_v56  ;;  %v694_v41 = vmul.f32 %v2954_v3, %v2954_v3  ;;  %v914_v47 = vsel %vm230_vm0, %v693_v50, 0.0 }
 0x1d4   : > { %v905_v59 = vadd.f32 %v904_v51, %v903_v54  ;;  %v2968_v54 = vsub.f32 %v2181_v63, %v2188_v56 }
 0x1d5   : > { %3789 = vst [vmem:[#allocation68_spill] sm:$0xff] %v2961_v23 }
 0x1d6   : > { %v907_v38 = vadd.f32 %v906_v13, %v905_v59  ;;  %3790 = vst [vmem:[#allocation72_spill] sm:$0xff] %v2968_v54  ;;  %v695_v59 = vmul.f32 %v2961_v23, %v2961_v23  ;;  %v696_v45 = vmul.f32 %v2968_v54, %v2968_v54 }
 0x1d8   : > { %v909_v51 = vadd.f32 %v908_v0, %v907_v38  ;;  %v916_v0 = vsel %vm230_vm0, %v694_v41, 0.0  ;;  %v918_v63 = vsel %vm230_vm0, %v695_v59, 0.0  ;;  %v920_v3 = vsel %vm454_vm1, %v696_v45, 0.0 }
 0x1da   : > { %v911_v13 = vadd.f32 %v910_v36, %v909_v51 }
 0x1dc   : > { %v913_v24 = vadd.f32 %v912_v5, %v911_v13 }
 0x1de   : > { %v915_v38 = vadd.f32 %v914_v47, %v913_v24 }
 0x1e0   : > { %v917_v56 = vadd.f32 %v916_v0, %v915_v38 }
 0x1e2   : > { %v919_v42 = vadd.f32 %v918_v63, %v917_v56 }
 0x1e4   : > { %v921_v1 = vadd.f32 %v920_v3, %v919_v42 }
 0x1e6   : > { %v922_v36 = vrot.slane %v921_v1, 4 }
 0x1e8   : > { %v923_v51 = vadd.f32 %v922_v36, %v921_v1 }
 0x1ea   : > { %v924_v33 = vrot.slane %v923_v51, 2 }
 0x1ec   : > { %v925_v23 = vadd.f32 %v924_v33, %v923_v51 }
 0x1ee   : > { %v926_v27 = vrot.slane %v925_v23, 1 }
 0x1f0   : > { %v927_v50 = vadd.f32 %v926_v27, %v925_v23 }
 0x1f2   : > { %v928_v5 = vmul.f32 %v927_v50, %v2185_v60 }
 0x1f4   : > { %v929_v13 = vadd.f32 1e-05, %v928_v5 }
 0x1f6   : > { %1581 = vrsqrt.f32 %v929_v13  ;;  %vm936_vm3 = vweird.f32 %v929_v13 }
 0x1fc   : > { %v1582_v54 = vpop.eup %1581 }
 0x1fd   : > { %v931_v41 = vmul.f32 %v1582_v54, %v929_v13  ;;  %vm937_vm4 = vweird.f32 %v1582_v54 }
 0x1fe   : > { %vm938_vm5 = vmor %vm936_vm3, %vm937_vm4 }
 0x1ff   : > { %v932_v24 = vmul.f32 %v1582_v54, %v931_v41 }
 0x201   : > { %v933_v59 = vmul.f32 0.5, %v932_v24 }
 0x203   : > { %v934_v47 = vsub.f32 1.5, %v933_v59 }
 0x205   : > { %v935_v42 = vmul.f32 %v1582_v54, %v934_v47 }
 0x207   : > { %v2982_v3 = vsel %vm938_vm5, %v1582_v54, %v935_v42 }
 0x208   : > { %v940_v33 = vmul.f32 %v2982_v3, %v2192_v11  ;;  %v941_v60 = vmul.f32 %v2982_v3, %v2196_v15  ;;  %v942_v27 = vmul.f32 %v2982_v3, %v2200_v29  ;;  %v943_v23 = vmul.f32 %v2982_v3, %v2204_v18 }
 0x209   : > { %v944_v45 = vmul.f32 %v2982_v3, %v2208_v9  ;;  %v945_v0 = vmul.f32 %v2982_v3, %v2218_v2  ;;  %v946_v54 = vmul.f32 %v2982_v3, %v2224_v7  ;;  %v947_v11 = vmul.f32 %v2982_v3, %v2233_v10 }
 0x20a   : > { %vm1053_vm6 = vcmp.ge.f32.partialorder %v940_v33, 0.0  ;;  %v1166_v15 = vmul.f32 0.01, %v940_v33  ;;  %vm1054_vm7 = vcmp.ge.f32.partialorder %v941_v60, 0.0  ;;  %v1167_v29 = vmul.f32 0.01, %v941_v60 }
 0x20b   : > { %vm1055_vm8 = vcmp.ge.f32.partialorder %v942_v27, 0.0  ;;  %v1168_v18 = vmul.f32 0.01, %v942_v27  ;;  %vm1056_vm9 = vcmp.ge.f32.partialorder %v943_v23, 0.0  ;;  %v1169_v9 = vmul.f32 0.01, %v943_v23 }
 0x20c   : > { %v1279_v2 = vsel %vm1053_vm6, %v940_v33, %v1166_v15  ;;  %v1280_v7 = vsel %vm1054_vm7, %v941_v60, %v1167_v29  ;;  %vm1057_vm10 = vcmp.ge.f32.partialorder %v944_v45, 0.0  ;;  %v1170_v10 = vmul.f32 0.01, %v944_v45 }
 0x20d   : > { %1392 = vst.msk [vmem:[%s3005_s14] sm:$0xff] %vm230_vm0, %v1279_v2  ;;  %v1281_v38 = vsel %vm1055_vm8, %v942_v27, %v1168_v18  ;;  %v1282_v63 = vsel %vm1056_vm9, %v943_v23, %v1169_v9  ;;  %vm1058_vm11 = vcmp.ge.f32.partialorder %v945_v0, 0.0  ;;  %v1171_v56 = vmul.f32 0.01, %v945_v0 }
 0x20e   : > { %1393 = vst.msk [vmem:[%s3005_s14 + $0x8] sm:$0xff] %vm230_vm0, %v1280_v7  ;;  %v1283_v1 = vsel %vm1057_vm10, %v944_v45, %v1170_v10  ;;  %vm1059_vm12 = vcmp.ge.f32.partialorder %v946_v54, 0.0  ;;  %v1172_v36 = vmul.f32 0.01, %v946_v54  ;;  %vm1060_vm13 = vcmp.ge.f32.partialorder %v947_v11, 0.0 }
 0x20f   : > { %1394 = vst.msk [vmem:[%s3005_s14 + $0x10] sm:$0xff] %vm230_vm0, %v1281_v38  ;;  %v1284_v51 = vsel %vm1058_vm11, %v945_v0, %v1171_v56  ;;  %v1173_v50 = vmul.f32 0.01, %v947_v11  ;;  %v948_v5 = vmul.f32 %v2982_v3, %v2240_v32  ;;  %v949_v13 = vmul.f32 %v2982_v3, %v2247_v16 }
 0x210   : > { %1395 = vst.msk [vmem:[%s3005_s14 + $0x18] sm:$0xff] %vm230_vm0, %v1282_v63  ;;  %v1285_v41 = vsel %vm1059_vm12, %v946_v54, %v1172_v36  ;;  %v950_v24 = vmul.f32 %v2982_v3, %v2254_v19  ;;  %v951_v59 = vmul.f32 %v2982_v3, %v2261_v22  ;;  %v952_v47 = vmul.f32 %v2982_v3, %v2268_v25 }
 0x211   : > { %1396 = vst.msk [vmem:[%s3005_s14 + $0x20] sm:$0xff] %vm230_vm0, %v1283_v1  ;;  %v1286_v32 = vsel %vm1060_vm13, %v947_v11, %v1173_v50  ;;  %vm1061_vm14 = vcmp.ge.f32.partialorder %v948_v5, 0.0  ;;  %v1174_v42 = vmul.f32 0.01, %v948_v5  ;;  %vm1062_vm15 = vcmp.ge.f32.partialorder %v949_v13, 0.0 }
 0x212   : > { %1397 = vst.msk [vmem:[%s3005_s14 + $0x28] sm:$0xff] %vm230_vm0, %v1284_v51  ;;  %v1175_v16 = vmul.f32 0.01, %v949_v13  ;;  %vm1063_vm2 = vcmp.ge.f32.partialorder %v950_v24, 0.0  ;;  %v1176_v33 = vmul.f32 0.01, %v950_v24  ;;  %v953_v19 = vmul.f32 %v2982_v3, %v2275_v28 }
 0x213   : > { %1398 = vst.msk [vmem:[%s3005_s14 + $0x30] sm:$0xff] %vm230_vm0, %v1285_v41  ;;  %v1287_v22 = vsel %vm1061_vm14, %v948_v5, %v1174_v42  ;;  %vm1064_vm3 = vcmp.ge.f32.partialorder %v951_v59, 0.0  ;;  %v1177_v25 = vmul.f32 0.01, %v951_v59  ;;  %vm1065_vm4 = vcmp.ge.f32.partialorder %v952_v47, 0.0 }
 0x214   : > { %1399 = vst.msk [vmem:[%s3005_s14 + $0x38] sm:$0xff] %vm230_vm0, %v1286_v32  ;;  %v1288_v60 = vsel %vm1062_vm15, %v949_v13, %v1175_v16  ;;  %v1289_v27 = vsel %vm1063_vm2, %v950_v24, %v1176_v33  ;;  %v1178_v23 = vmul.f32 0.01, %v952_v47  ;;  %vm1066_vm5 = vcmp.ge.f32.partialorder %v953_v19, 0.0 }
 0x215   : > { %1400 = vst.msk [vmem:[%s3005_s14 + $0x40] sm:$0xff] %vm230_vm0, %v1287_v22  ;;  %v1290_v45 = vsel %vm1064_vm3, %v951_v59, %v1177_v25  ;;  %v1179_v0 = vmul.f32 0.01, %v953_v19  ;;  %v954_v28 = vmul.f32 %v2982_v3, %v2282_v31  ;;  %v955_v54 = vmul.f32 %v2982_v3, %v2289_v34 }
 0x216   : > { %1401 = vst.msk [vmem:[%s3005_s14 + $0x48] sm:$0xff] %vm230_vm0, %v1288_v60  ;;  %v1291_v11 = vsel %vm1065_vm4, %v952_v47, %v1178_v23  ;;  %v956_v15 = vmul.f32 %v2982_v3, %v2296_v37  ;;  %v957_v29 = vmul.f32 %v2982_v3, %v2303_v40  ;;  %v958_v18 = vmul.f32 %v2982_v3, %v2310_v43 }
 0x217   : > { %1402 = vst.msk [vmem:[%s3005_s14 + $0x50] sm:$0xff] %vm230_vm0, %v1289_v27  ;;  %v1292_v31 = vsel %vm1066_vm5, %v953_v19, %v1179_v0  ;;  %vm1067_vm6 = vcmp.ge.f32.partialorder %v954_v28, 0.0  ;;  %v1180_v9 = vmul.f32 0.01, %v954_v28  ;;  %vm1068_vm7 = vcmp.ge.f32.partialorder %v955_v54, 0.0 }
 0x218   : > { %1403 = vst.msk [vmem:[%s3005_s14 + $0x58] sm:$0xff] %vm230_vm0, %v1290_v45  ;;  %v1181_v34 = vmul.f32 0.01, %v955_v54  ;;  %vm1069_vm8 = vcmp.ge.f32.partialorder %v956_v15, 0.0  ;;  %v1182_v2 = vmul.f32 0.01, %v956_v15  ;;  %v959_v37 = vmul.f32 %v2982_v3, %v2317_v46 }
 0x219   : > { %1404 = vst.msk [vmem:[%s3005_s14 + $0x60] sm:$0xff] %vm230_vm0, %v1291_v11  ;;  %v1293_v40 = vsel %vm1067_vm6, %v954_v28, %v1180_v9  ;;  %vm1070_vm9 = vcmp.ge.f32.partialorder %v957_v29, 0.0  ;;  %v1183_v43 = vmul.f32 0.01, %v957_v29  ;;  %vm1071_vm10 = vcmp.ge.f32.partialorder %v958_v18, 0.0 }
 0x21a   : > { %1405 = vst.msk [vmem:[%s3005_s14 + $0x68] sm:$0xff] %vm230_vm0, %v1292_v31  ;;  %v1294_v7 = vsel %vm1068_vm7, %v955_v54, %v1181_v34  ;;  %v1295_v10 = vsel %vm1069_vm8, %v956_v15, %v1182_v2  ;;  %v1184_v38 = vmul.f32 0.01, %v958_v18  ;;  %vm1072_vm11 = vcmp.ge.f32.partialorder %v959_v37, 0.0 }
 0x21b   : > { %1406 = vst.msk [vmem:[%s3005_s14 + $0x70] sm:$0xff] %vm230_vm0, %v1293_v40  ;;  %v1296_v63 = vsel %vm1070_vm9, %v957_v29, %v1183_v43  ;;  %v1185_v56 = vmul.f32 0.01, %v959_v37  ;;  %v960_v46 = vmul.f32 %v2982_v3, %v2324_v49  ;;  %v961_v1 = vmul.f32 %v2982_v3, %v2331_v52 }
 0x21c   : > { %1407 = vst.msk [vmem:[%s3005_s14 + $0x78] sm:$0xff] %vm230_vm0, %v1294_v7  ;;  %v1297_v36 = vsel %vm1071_vm10, %v958_v18, %v1184_v38  ;;  %v962_v51 = vmul.f32 %v2982_v3, %v2338_v55  ;;  %v963_v50 = vmul.f32 %v2982_v3, %v2345_v58  ;;  %v964_v5 = vmul.f32 %v2982_v3, %v2352_v61 }
 0x21d   : > { %1408 = vst.msk [vmem:[%s3005_s14 + $0x80] sm:$0xff] %vm230_vm0, %v1295_v10  ;;  %v1298_v49 = vsel %vm1072_vm11, %v959_v37, %v1185_v56  ;;  %vm1073_vm12 = vcmp.ge.f32.partialorder %v960_v46, 0.0  ;;  %v1186_v13 = vmul.f32 0.01, %v960_v46  ;;  %vm1074_vm13 = vcmp.ge.f32.partialorder %v961_v1, 0.0 }
 0x21e   : > { %1409 = vst.msk [vmem:[%s3005_s14 + $0x88] sm:$0xff] %vm230_vm0, %v1296_v63  ;;  %v1187_v52 = vmul.f32 0.01, %v961_v1  ;;  %vm1075_vm14 = vcmp.ge.f32.partialorder %v962_v51, 0.0  ;;  %v1188_v41 = vmul.f32 0.01, %v962_v51  ;;  %v965_v55 = vmul.f32 %v2982_v3, %v2359_v4 }
 0x21f   : > { %1410 = vst.msk [vmem:[%s3005_s14 + $0x90] sm:$0xff] %vm230_vm0, %v1297_v36  ;;  %v1299_v58 = vsel %vm1073_vm12, %v960_v46, %v1186_v13  ;;  %vm1076_vm15 = vcmp.ge.f32.partialorder %v963_v50, 0.0  ;;  %v1189_v61 = vmul.f32 0.01, %v963_v50  ;;  %vm1077_vm2 = vcmp.ge.f32.partialorder %v964_v5, 0.0  ;;  %v3791_v46 = vld [vmem:[#allocation69_spill] sm:$0xff] }
 0x220   : > { %1411 = vst.msk [vmem:[%s3005_s14 + $0x98] sm:$0xff] %vm230_vm0, %v1298_v49  ;;  %v1300_v24 = vsel %vm1074_vm13, %v961_v1, %v1187_v52  ;;  %v1301_v59 = vsel %vm1075_vm14, %v962_v51, %v1188_v41  ;;  %v1190_v47 = vmul.f32 0.01, %v964_v5  ;;  %vm1078_vm3 = vcmp.ge.f32.partialorder %v965_v55, 0.0 }
 0x221   : > { %1412 = vst.msk [vmem:[%s3005_s14 + $0xa0] sm:$0xff] %vm230_vm0, %v1299_v58  ;;  %v1302_v32 = vsel %vm1076_vm15, %v963_v50, %v1189_v61  ;;  %v1191_v42 = vmul.f32 0.01, %v965_v55  ;;  %v966_v4 = vmul.f32 %v2982_v3, %v2366_v8  ;;  %v967_v16 = vmul.f32 %v2982_v3, %v2373_v12  ;;  %v3793_v58 = vld [vmem:[#allocation71_spill] sm:$0xff] }
 0x222   : > { %1413 = vst.msk [vmem:[%s3005_s14 + $0xa8] sm:$0xff] %vm230_vm0, %v1300_v24  ;;  %v1303_v33 = vsel %vm1077_vm2, %v964_v5, %v1190_v47  ;;  %v968_v19 = vmul.f32 %v2982_v3, %v2380_v17  ;;  %v969_v22 = vmul.f32 %v2982_v3, %v2387_v21  ;;  %v970_v25 = vmul.f32 %v2982_v3, %v2394_v26  ;;  %v3794_v24 = vld [vmem:[#allocation2_spill] sm:$0xff] }
 0x223   : > { %1414 = vst.msk [vmem:[%s3005_s14 + $0xb0] sm:$0xff] %vm230_vm0, %v1301_v59  ;;  %v1304_v8 = vsel %vm1078_vm3, %v965_v55, %v1191_v42  ;;  %vm1079_vm4 = vcmp.ge.f32.partialorder %v966_v4, 0.0  ;;  %v1192_v60 = vmul.f32 0.01, %v966_v4  ;;  %vm1080_vm5 = vcmp.ge.f32.partialorder %v967_v16, 0.0 }
 0x224   : > { %1415 = vst.msk [vmem:[%s3005_s14 + $0xb8] sm:$0xff] %vm230_vm0, %v1302_v32  ;;  %v1193_v12 = vmul.f32 0.01, %v967_v16  ;;  %vm1081_vm6 = vcmp.ge.f32.partialorder %v968_v19, 0.0  ;;  %v1194_v27 = vmul.f32 0.01, %v968_v19  ;;  %v971_v17 = vmul.f32 %v2982_v3, %v2401_v30 }
 0x225   : > { %1416 = vst.msk [vmem:[%s3005_s14 + $0xc0] sm:$0xff] %vm230_vm0, %v1303_v33  ;;  %v1305_v21 = vsel %vm1079_vm4, %v966_v4, %v1192_v60  ;;  %vm1082_vm7 = vcmp.ge.f32.partialorder %v969_v22, 0.0  ;;  %v1195_v26 = vmul.f32 0.01, %v969_v22  ;;  %vm1083_vm8 = vcmp.ge.f32.partialorder %v970_v25, 0.0  ;;  %v3795_v32 = vld [vmem:[#allocation3_spill] sm:$0xff] }
 0x226   : > { %1417 = vst.msk [vmem:[%s3005_s14 + $0xc8] sm:$0xff] %vm230_vm0, %v1304_v8  ;;  %v1306_v23 = vsel %vm1080_vm5, %v967_v16, %v1193_v12  ;;  %v1307_v45 = vsel %vm1081_vm6, %v968_v19, %v1194_v27  ;;  %v1196_v0 = vmul.f32 0.01, %v970_v25  ;;  %vm1084_vm9 = vcmp.ge.f32.partialorder %v971_v17, 0.0  ;;  %v3796_v4 = vld [vmem:[#allocation4_spill] sm:$0xff]  ;;  %v3797_v33 = vld [vmem:[#allocation5_spill] sm:$0xff] }
 0x227   : > { %1418 = vst.msk [vmem:[%s3005_s14 + $0xd0] sm:$0xff] %vm230_vm0, %v1305_v21  ;;  %v1308_v28 = vsel %vm1082_vm7, %v969_v22, %v1195_v26  ;;  %v1197_v54 = vmul.f32 0.01, %v971_v17  ;;  %v972_v30 = vmul.f32 %v2982_v3, %v2408_v35  ;;  %v973_v11 = vmul.f32 %v2982_v3, %v2415_v39  ;;  %v3798_v12 = vld [vmem:[#allocation6_spill] sm:$0xff] }
 0x228   : > { %1419 = vst.msk [vmem:[%s3005_s14 + $0xd8] sm:$0xff] %vm230_vm0, %v1306_v23  ;;  %v1309_v15 = vsel %vm1083_vm8, %v970_v25, %v1196_v0  ;;  %v974_v29 = vmul.f32 %v2982_v3, %v2422_v44  ;;  %v975_v18 = vmul.f32 %v2982_v3, %v2429_v48  ;;  %v976_v31 = vmul.f32 %v2982_v3, %v2436_v53 }
 0x229   : > { %1420 = vst.msk [vmem:[%s3005_s14 + $0xe0] sm:$0xff] %vm230_vm0, %v1307_v45  ;;  %v1310_v35 = vsel %vm1084_vm9, %v971_v17, %v1197_v54  ;;  %vm1085_vm10 = vcmp.ge.f32.partialorder %v972_v30, 0.0  ;;  %v1198_v9 = vmul.f32 0.01, %v972_v30  ;;  %vm1086_vm11 = vcmp.ge.f32.partialorder %v973_v11, 0.0  ;;  %v3799_v54 = vld [vmem:[#allocation7_spill] sm:$0xff] }
 0x22a   : > { %1421 = vst.msk [vmem:[%s3005_s14 + $0xe8] sm:$0xff] %vm230_vm0, %v1308_v28  ;;  %v1199_v39 = vmul.f32 0.01, %v973_v11  ;;  %vm1087_vm12 = vcmp.ge.f32.partialorder %v974_v29, 0.0  ;;  %v1200_v34 = vmul.f32 0.01, %v974_v29  ;;  %v977_v44 = vmul.f32 %v2982_v3, %v2443_v57 }
 0x22b   : > { %1422 = vst.msk [vmem:[%s3005_s14 + $0xf0] sm:$0xff] %vm230_vm0, %v1309_v15  ;;  %v1311_v48 = vsel %vm1085_vm10, %v972_v30, %v1198_v9  ;;  %vm1088_vm13 = vcmp.ge.f32.partialorder %v975_v18, 0.0  ;;  %v1201_v53 = vmul.f32 0.01, %v975_v18  ;;  %vm1089_vm14 = vcmp.ge.f32.partialorder %v976_v31, 0.0 }
 0x22c   : > { %1423 = vst.msk [vmem:[%s3005_s14 + $0xf8] sm:$0xff] %vm230_vm0, %v1310_v35  ;;  %v1312_v2 = vsel %vm1086_vm11, %v973_v11, %v1199_v39  ;;  %v1313_v37 = vsel %vm1087_vm12, %v974_v29, %v1200_v34  ;;  %v1202_v40 = vmul.f32 0.01, %v976_v31  ;;  %vm1090_vm15 = vcmp.ge.f32.partialorder %v977_v44, 0.0  ;;  %v3800_v11 = vld [vmem:[#allocation8_spill] sm:$0xff]  ;;  %v3802_v35 = vld [vmem:[#allocation10_spill] sm:$0xff] }
 0x22d   : > { %1424 = vst.msk [vmem:[%s3005_s14 + $0x100] sm:$0xff] %vm230_vm0, %v1311_v48  ;;  %v1314_v43 = vsel %vm1088_vm13, %v975_v18, %v1201_v53  ;;  %v1203_v7 = vmul.f32 0.01, %v977_v44  ;;  %v978_v57 = vmul.f32 %v2982_v3, %v2450_v62  ;;  %v979_v10 = vmul.f32 %v2982_v3, %v2457_v6  ;;  %v3801_v18 = vld [vmem:[#allocation9_spill] sm:$0xff]  ;;  %v3803_v39 = vld [vmem:[#allocation11_spill] sm:$0xff] }
 0x22e   : > { %1425 = vst.msk [vmem:[%s3005_s14 + $0x108] sm:$0xff] %vm230_vm0, %v1312_v2  ;;  %v1315_v38 = vsel %vm1089_vm14, %v976_v31, %v1202_v40  ;;  %v980_v63 = vmul.f32 %v2982_v3, %v2464_v14  ;;  %v981_v56 = vmul.f32 %v2982_v3, %v2471_v20  ;;  %v982_v1 = vmul.f32 %v2982_v3, %v3791_v46  ;;  %v3792_v14 = vld [vmem:[#allocation70_spill] sm:$0xff]  ;;  %v3805_v46 = vld [vmem:[#allocation13_spill] sm:$0xff] }
 0x22f   : > { %1426 = vst.msk [vmem:[%s3005_s14 + $0x110] sm:$0xff] %vm230_vm0, %v1313_v37  ;;  %v1316_v62 = vsel %vm1090_vm15, %v977_v44, %v1203_v7  ;;  %vm1091_vm2 = vcmp.ge.f32.partialorder %v978_v57, 0.0  ;;  %v1204_v36 = vmul.f32 0.01, %v978_v57  ;;  %vm1092_vm3 = vcmp.ge.f32.partialorder %v979_v10, 0.0  ;;  %v3804_v37 = vld [vmem:[#allocation12_spill] sm:$0xff] }
 0x230   : > { %1427 = vst.msk [vmem:[%s3005_s14 + $0x118] sm:$0xff] %vm230_vm0, %v1314_v43  ;;  %v1205_v6 = vmul.f32 0.01, %v979_v10  ;;  %vm1093_vm4 = vcmp.ge.f32.partialorder %v980_v63, 0.0  ;;  %v1206_v51 = vmul.f32 0.01, %v980_v63  ;;  %v983_v50 = vmul.f32 %v2982_v3, %v3792_v14 }
 0x231   : > { %1428 = vst.msk [vmem:[%s3005_s14 + $0x120] sm:$0xff] %vm230_vm0, %v1315_v38  ;;  %v1317_v20 = vsel %vm1091_vm2, %v978_v57, %v1204_v36  ;;  %vm1094_vm5 = vcmp.ge.f32.partialorder %v981_v56, 0.0  ;;  %v1207_v5 = vmul.f32 0.01, %v981_v56  ;;  %vm1095_vm6 = vcmp.ge.f32.partialorder %v982_v1, 0.0 }
 0x232   : > { %1429 = vst.msk [vmem:[%s3005_s14 + $0x128] sm:$0xff] %vm230_vm0, %v1316_v62  ;;  %v1318_v49 = vsel %vm1092_vm3, %v979_v10, %v1205_v6  ;;  %v1319_v13 = vsel %vm1093_vm4, %v980_v63, %v1206_v51  ;;  %v1208_v52 = vmul.f32 0.01, %v982_v1  ;;  %vm1096_vm7 = vcmp.ge.f32.partialorder %v983_v50, 0.0  ;;  %v3806_v62 = vld [vmem:[#allocation14_spill] sm:$0xff]  ;;  %v3807_v51 = vld [vmem:[#allocation15_spill] sm:$0xff] }
 0x233   : > { %1430 = vst.msk [vmem:[%s3005_s14 + $0x130] sm:$0xff] %vm230_vm0, %v1317_v20  ;;  %v1320_v41 = vsel %vm1094_vm5, %v981_v56, %v1207_v5  ;;  %v1209_v55 = vmul.f32 0.01, %v983_v50  ;;  %v984_v61 = vmul.f32 %v2982_v3, %v3793_v58  ;;  %v985_v59 = vmul.f32 %v2982_v3, %v3794_v24  ;;  %v3809_v5 = vld [vmem:[#allocation17_spill] sm:$0xff]  ;;  %v3810_v58 = vld [vmem:[#allocation18_spill] sm:$0xff] }
 0x234   : > { %1431 = vst.msk [vmem:[%s3005_s14 + $0x138] sm:$0xff] %vm230_vm0, %v1318_v49  ;;  %v1321_v47 = vsel %vm1095_vm6, %v982_v1, %v1208_v52  ;;  %v986_v42 = vmul.f32 %v2982_v3, %v3795_v32  ;;  %v987_v16 = vmul.f32 %v2982_v3, %v3796_v4  ;;  %v988_v19 = vmul.f32 %v2982_v3, %v3797_v33  ;;  %v3811_v33 = vld [vmem:[#allocation19_spill] sm:$0xff] }
 0x235   : > { %1432 = vst.msk [vmem:[%s3005_s14 + $0x140] sm:$0xff] %vm230_vm0, %v1319_v13  ;;  %v1322_v22 = vsel %vm1096_vm7, %v983_v50, %v1209_v55  ;;  %vm1097_vm8 = vcmp.ge.f32.partialorder %v984_v61, 0.0  ;;  %v1210_v25 = vmul.f32 0.01, %v984_v61  ;;  %vm1098_vm9 = vcmp.ge.f32.partialorder %v985_v59, 0.0  ;;  %v3808_v50 = vld [vmem:[#allocation16_spill] sm:$0xff] }
 0x236   : > { %1433 = vst.msk [vmem:[%s3005_s14 + $0x148] sm:$0xff] %vm230_vm0, %v1320_v41  ;;  %v1211_v8 = vmul.f32 0.01, %v985_v59  ;;  %vm1099_vm10 = vcmp.ge.f32.partialorder %v986_v42, 0.0  ;;  %v1212_v60 = vmul.f32 0.01, %v986_v42  ;;  %v989_v27 = vmul.f32 %v2982_v3, %v3798_v12 }
 0x237   : > { %1434 = vst.msk [vmem:[%s3005_s14 + $0x150] sm:$0xff] %vm230_vm0, %v1321_v47  ;;  %v1323_v17 = vsel %vm1097_vm8, %v984_v61, %v1210_v25  ;;  %vm1100_vm11 = vcmp.ge.f32.partialorder %v987_v16, 0.0  ;;  %v1213_v21 = vmul.f32 0.01, %v987_v16  ;;  %vm1101_vm12 = vcmp.ge.f32.partialorder %v988_v19, 0.0 }
 0x238   : > { %1435 = vst.msk [vmem:[%s3005_s14 + $0x158] sm:$0xff] %vm230_vm0, %v1322_v22  ;;  %v1324_v26 = vsel %vm1098_vm9, %v985_v59, %v1211_v8  ;;  %v1325_v23 = vsel %vm1099_vm10, %v986_v42, %v1212_v60  ;;  %v1214_v45 = vmul.f32 0.01, %v988_v19  ;;  %vm1102_vm13 = vcmp.ge.f32.partialorder %v989_v27, 0.0  ;;  %v3812_v22 = vld [vmem:[#allocation20_spill] sm:$0xff]  ;;  %v3813_v60 = vld [vmem:[#allocation21_spill] sm:$0xff] }
 0x239   : > { %1436 = vst.msk [vmem:[%s3005_s14 + $0x160] sm:$0xff] %vm230_vm0, %v1323_v17  ;;  %v1326_v0 = vsel %vm1100_vm11, %v987_v16, %v1213_v21  ;;  %v1215_v28 = vmul.f32 0.01, %v989_v27  ;;  %v990_v30 = vmul.f32 %v2982_v3, %v3799_v54  ;;  %v991_v15 = vmul.f32 %v2982_v3, %v3800_v11  ;;  %v3815_v21 = vld [vmem:[#allocation23_spill] sm:$0xff]  ;;  %v3816_v54 = vld [vmem:[#allocation24_spill] sm:$0xff] }
 0x23a   : > { %1437 = vst.msk [vmem:[%s3005_s14 + $0x168] sm:$0xff] %vm230_vm0, %v1324_v26  ;;  %v1327_v29 = vsel %vm1101_vm12, %v988_v19, %v1214_v45  ;;  %v992_v31 = vmul.f32 %v2982_v3, %v3801_v18  ;;  %v993_v9 = vmul.f32 %v2982_v3, %v3802_v35  ;;  %v994_v34 = vmul.f32 %v2982_v3, %v3803_v39  ;;  %v3817_v39 = vld [vmem:[#allocation25_spill] sm:$0xff] }
 0x23b   : > { %1438 = vst.msk [vmem:[%s3005_s14 + $0x170] sm:$0xff] %vm230_vm0, %v1325_v23  ;;  %v1328_v44 = vsel %vm1102_vm13, %v989_v27, %v1215_v28  ;;  %vm1103_vm14 = vcmp.ge.f32.partialorder %v990_v30, 0.0  ;;  %v1216_v48 = vmul.f32 0.01, %v990_v30  ;;  %vm1104_vm15 = vcmp.ge.f32.partialorder %v991_v15, 0.0  ;;  %v3814_v27 = vld [vmem:[#allocation22_spill] sm:$0xff] }
 0x23c   : > { %1439 = vst.msk [vmem:[%s3005_s14 + $0x178] sm:$0xff] %vm230_vm0, %v1326_v0  ;;  %v1217_v53 = vmul.f32 0.01, %v991_v15  ;;  %vm1105_vm2 = vcmp.ge.f32.partialorder %v992_v31, 0.0  ;;  %v1218_v2 = vmul.f32 0.01, %v992_v31  ;;  %v995_v40 = vmul.f32 %v2982_v3, %v3804_v37 }
 0x23d   : > { %1440 = vst.msk [vmem:[%s3005_s14 + $0x180] sm:$0xff] %vm230_vm0, %v1327_v29  ;;  %v1329_v43 = vsel %vm1103_vm14, %v990_v30, %v1216_v48  ;;  %vm1106_vm3 = vcmp.ge.f32.partialorder %v993_v9, 0.0  ;;  %v1219_v7 = vmul.f32 0.01, %v993_v9  ;;  %vm1107_vm4 = vcmp.ge.f32.partialorder %v994_v34, 0.0 }
 0x23e   : > { %1441 = vst.msk [vmem:[%s3005_s14 + $0x188] sm:$0xff] %vm230_vm0, %v1328_v44  ;;  %v1330_v57 = vsel %vm1104_vm15, %v991_v15, %v1217_v53  ;;  %v1331_v10 = vsel %vm1105_vm2, %v992_v31, %v1218_v2  ;;  %v1220_v38 = vmul.f32 0.01, %v994_v34  ;;  %vm1108_vm5 = vcmp.ge.f32.partialorder %v995_v40, 0.0  ;;  %v3818_v44 = vld [vmem:[#allocation26_spill] sm:$0xff]  ;;  %v3819_v2 = vld [vmem:[#allocation27_spill] sm:$0xff] }
 0x23f   : > { %1442 = vst.msk [vmem:[%s3005_s14 + $0x190] sm:$0xff] %vm230_vm0, %v1329_v43  ;;  %v1332_v63 = vsel %vm1106_vm3, %v993_v9, %v1219_v7  ;;  %v1221_v56 = vmul.f32 0.01, %v995_v40  ;;  %v996_v1 = vmul.f32 %v2982_v3, %v3805_v46  ;;  %v997_v36 = vmul.f32 %v2982_v3, %v3806_v62  ;;  %v3821_v7 = vld [vmem:[#allocation29_spill] sm:$0xff]  ;;  %v3822_v46 = vld [vmem:[#allocation30_spill] sm:$0xff] }
 0x240   : > { %1443 = vst.msk [vmem:[%s3005_s14 + $0x198] sm:$0xff] %vm230_vm0, %v1330_v57  ;;  %v1333_v6 = vsel %vm1107_vm4, %v994_v34, %v1220_v38  ;;  %v998_v14 = vmul.f32 %v2982_v3, %v3807_v51  ;;  %v999_v20 = vmul.f32 %v2982_v3, %v3808_v50  ;;  %v1000_v49 = vmul.f32 %v2982_v3, %v3809_v5  ;;  %v3823_v5 = vld [vmem:[#allocation31_spill] sm:$0xff] }
 0x241   : > { %1444 = vst.msk [vmem:[%s3005_s14 + $0x1a0] sm:$0xff] %vm230_vm0, %v1331_v10  ;;  %v1334_v13 = vsel %vm1108_vm5, %v995_v40, %v1221_v56  ;;  %vm1109_vm6 = vcmp.ge.f32.partialorder %v996_v1, 0.0  ;;  %v1222_v52 = vmul.f32 0.01, %v996_v1  ;;  %vm1110_vm7 = vcmp.ge.f32.partialorder %v997_v36, 0.0  ;;  %v3820_v40 = vld [vmem:[#allocation28_spill] sm:$0xff] }
 0x242   : > { %1445 = vst.msk [vmem:[%s3005_s14 + $0x1a8] sm:$0xff] %vm230_vm0, %v1332_v63  ;;  %v1223_v41 = vmul.f32 0.01, %v997_v36  ;;  %vm1111_vm8 = vcmp.ge.f32.partialorder %v998_v14, 0.0  ;;  %v1224_v55 = vmul.f32 0.01, %v998_v14  ;;  %v1001_v61 = vmul.f32 %v2982_v3, %v3810_v58 }
 0x243   : > { %1446 = vst.msk [vmem:[%s3005_s14 + $0x1b0] sm:$0xff] %vm230_vm0, %v1333_v6  ;;  %v1335_v24 = vsel %vm1109_vm6, %v996_v1, %v1222_v52  ;;  %vm1112_vm9 = vcmp.ge.f32.partialorder %v999_v20, 0.0  ;;  %v1225_v59 = vmul.f32 0.01, %v999_v20  ;;  %vm1113_vm10 = vcmp.ge.f32.partialorder %v1000_v49, 0.0 }
 0x244   : > { %1447 = vst.msk [vmem:[%s3005_s14 + $0x1b8] sm:$0xff] %vm230_vm0, %v1334_v13  ;;  %v1336_v47 = vsel %vm1110_vm7, %v997_v36, %v1223_v41  ;;  %v1337_v32 = vsel %vm1111_vm8, %v998_v14, %v1224_v55  ;;  %v1226_v42 = vmul.f32 0.01, %v1000_v49  ;;  %vm1114_vm11 = vcmp.ge.f32.partialorder %v1001_v61, 0.0  ;;  %v3824_v13 = vld [vmem:[#allocation32_spill] sm:$0xff]  ;;  %v3825_v55 = vld [vmem:[#allocation33_spill] sm:$0xff] }
 0x245   : > { %1448 = vst.msk [vmem:[%s3005_s14 + $0x1c0] sm:$0xff] %vm230_vm0, %v1335_v24  ;;  %v1338_v4 = vsel %vm1112_vm9, %v999_v20, %v1225_v59  ;;  %v1227_v16 = vmul.f32 0.01, %v1001_v61  ;;  %v1002_v19 = vmul.f32 %v2982_v3, %v3811_v33  ;;  %v1003_v25 = vmul.f32 %v2982_v3, %v3812_v22  ;;  %v3827_v59 = vld [vmem:[#allocation35_spill] sm:$0xff]  ;;  %v3828_v33 = vld [vmem:[#allocation36_spill] sm:$0xff] }
 0x246   : > { %1449 = vst.msk [vmem:[%s3005_s14 + $0x1c8] sm:$0xff] %vm230_vm0, %v1336_v47  ;;  %v1339_v8 = vsel %vm1113_vm10, %v1000_v49, %v1226_v42  ;;  %v1004_v12 = vmul.f32 %v2982_v3, %v3813_v60  ;;  %v1005_v17 = vmul.f32 %v2982_v3, %v3814_v27  ;;  %v1006_v26 = vmul.f32 %v2982_v3, %v3815_v21  ;;  %v3829_v21 = vld [vmem:[#allocation37_spill] sm:$0xff] }
 0x247   : > { %1450 = vst.msk [vmem:[%s3005_s14 + $0x1d0] sm:$0xff] %vm230_vm0, %v1337_v32  ;;  %v1340_v23 = vsel %vm1114_vm11, %v1001_v61, %v1227_v16  ;;  %vm1115_vm12 = vcmp.ge.f32.partialorder %v1002_v19, 0.0  ;;  %v1228_v45 = vmul.f32 0.01, %v1002_v19  ;;  %vm1116_vm13 = vcmp.ge.f32.partialorder %v1003_v25, 0.0  ;;  %v3826_v61 = vld [vmem:[#allocation34_spill] sm:$0xff] }
 0x248   : > { %1451 = vst.msk [vmem:[%s3005_s14 + $0x1d8] sm:$0xff] %vm230_vm0, %v1338_v4  ;;  %v1229_v0 = vmul.f32 0.01, %v1003_v25  ;;  %vm1117_vm14 = vcmp.ge.f32.partialorder %v1004_v12, 0.0  ;;  %v1230_v28 = vmul.f32 0.01, %v1004_v12  ;;  %v1007_v30 = vmul.f32 %v2982_v3, %v3816_v54 }
 0x249   : > { %1452 = vst.msk [vmem:[%s3005_s14 + $0x1e0] sm:$0xff] %vm230_vm0, %v1339_v8  ;;  %v1341_v11 = vsel %vm1115_vm12, %v1002_v19, %v1228_v45  ;;  %vm1118_vm15 = vcmp.ge.f32.partialorder %v1005_v17, 0.0  ;;  %v1231_v15 = vmul.f32 0.01, %v1005_v17  ;;  %vm1119_vm2 = vcmp.ge.f32.partialorder %v1006_v26, 0.0 }
 0x24a   : > { %1453 = vst.msk [vmem:[%s3005_s14 + $0x1e8] sm:$0xff] %vm230_vm0, %v1340_v23  ;;  %v1342_v29 = vsel %vm1116_vm13, %v1003_v25, %v1229_v0  ;;  %v1343_v18 = vsel %vm1117_vm14, %v1004_v12, %v1230_v28  ;;  %v1232_v31 = vmul.f32 0.01, %v1006_v26  ;;  %vm1120_vm3 = vcmp.ge.f32.partialorder %v1007_v30, 0.0  ;;  %v3830_v23 = vld [vmem:[#allocation38_spill] sm:$0xff]  ;;  %v3831_v28 = vld [vmem:[#allocation39_spill] sm:$0xff] }
 0x24b   : > { %1454 = vst.msk [vmem:[%s3005_s14 + $0x1f0] sm:$0xff] %vm230_vm0, %v1341_v11  ;;  %v1344_v35 = vsel %vm1118_vm15, %v1005_v17, %v1231_v15  ;;  %v1233_v9 = vmul.f32 0.01, %v1007_v30  ;;  %v1008_v34 = vmul.f32 %v2982_v3, %v3817_v39  ;;  %v1009_v48 = vmul.f32 %v2982_v3, %v3818_v44  ;;  %v3833_v15 = vld [vmem:[#allocation41_spill] sm:$0xff]  ;;  %v3834_v39 = vld [vmem:[#allocation42_spill] sm:$0xff] }
 0x24c   : > { %1455 = vst.msk [vmem:[%s3005_s14 + $0x1f8] sm:$0xff] %vm230_vm0, %v1342_v29  ;;  %v1345_v53 = vsel %vm1119_vm2, %v1006_v26, %v1232_v31  ;;  %v1010_v37 = vmul.f32 %v2982_v3, %v3819_v2  ;;  %v1011_v43 = vmul.f32 %v2982_v3, %v3820_v40  ;;  %v1012_v57 = vmul.f32 %v2982_v3, %v3821_v7  ;;  %v3835_v7 = vld [vmem:[#allocation43_spill] sm:$0xff] }
 0x24d   : > { %1456 = vst.msk [vmem:[%s3005_s14 + $0x200] sm:$0xff] %vm230_vm0, %v1343_v18  ;;  %v1346_v10 = vsel %vm1120_vm3, %v1007_v30, %v1233_v9  ;;  %vm1121_vm4 = vcmp.ge.f32.partialorder %v1008_v34, 0.0  ;;  %v1234_v38 = vmul.f32 0.01, %v1008_v34  ;;  %vm1122_vm5 = vcmp.ge.f32.partialorder %v1009_v48, 0.0  ;;  %v3832_v30 = vld [vmem:[#allocation40_spill] sm:$0xff] }
 0x24e   : > { %1457 = vst.msk [vmem:[%s3005_s14 + $0x208] sm:$0xff] %vm230_vm0, %v1344_v35  ;;  %v1235_v63 = vmul.f32 0.01, %v1009_v48  ;;  %vm1123_vm6 = vcmp.ge.f32.partialorder %v1010_v37, 0.0  ;;  %v1236_v56 = vmul.f32 0.01, %v1010_v37  ;;  %v1013_v1 = vmul.f32 %v2982_v3, %v3822_v46 }
 0x24f   : > { %1458 = vst.msk [vmem:[%s3005_s14 + $0x210] sm:$0xff] %vm230_vm0, %v1345_v53  ;;  %v1347_v62 = vsel %vm1121_vm4, %v1008_v34, %v1234_v38  ;;  %vm1124_vm7 = vcmp.ge.f32.partialorder %v1011_v43, 0.0  ;;  %v1237_v36 = vmul.f32 0.01, %v1011_v43  ;;  %vm1125_vm8 = vcmp.ge.f32.partialorder %v1012_v57, 0.0 }
 0x250   : > { %1459 = vst.msk [vmem:[%s3005_s14 + $0x218] sm:$0xff] %vm230_vm0, %v1346_v10  ;;  %v1348_v6 = vsel %vm1122_vm5, %v1009_v48, %v1235_v63  ;;  %v1349_v51 = vsel %vm1123_vm6, %v1010_v37, %v1236_v56  ;;  %v1238_v14 = vmul.f32 0.01, %v1012_v57  ;;  %vm1126_vm9 = vcmp.ge.f32.partialorder %v1013_v1, 0.0  ;;  %v3836_v10 = vld [vmem:[#allocation44_spill] sm:$0xff]  ;;  %v3837_v56 = vld [vmem:[#allocation45_spill] sm:$0xff] }
 0x251   : > { %1460 = vst.msk [vmem:[%s3005_s14 + $0x220] sm:$0xff] %vm230_vm0, %v1347_v62  ;;  %v1350_v50 = vsel %vm1124_vm7, %v1011_v43, %v1237_v36  ;;  %v1239_v20 = vmul.f32 0.01, %v1013_v1  ;;  %v1014_v49 = vmul.f32 %v2982_v3, %v3823_v5  ;;  %v1015_v52 = vmul.f32 %v2982_v3, %v3824_v13  ;;  %v3839_v36 = vld [vmem:[#allocation47_spill] sm:$0xff]  ;;  %v3840_v5 = vld [vmem:[#allocation48_spill] sm:$0xff] }
 0x252   : > { %1461 = vst.msk [vmem:[%s3005_s14 + $0x228] sm:$0xff] %vm230_vm0, %v1348_v6  ;;  %v1351_v41 = vsel %vm1125_vm8, %v1012_v57, %v1238_v14  ;;  %v1016_v58 = vmul.f32 %v2982_v3, %v3825_v55  ;;  %v1017_v24 = vmul.f32 %v2982_v3, %v3826_v61  ;;  %v1018_v47 = vmul.f32 %v2982_v3, %v3827_v59  ;;  %v3841_v59 = vld [vmem:[#allocation49_spill] sm:$0xff] }
 0x253   : > { %1462 = vst.msk [vmem:[%s3005_s14 + $0x230] sm:$0xff] %vm230_vm0, %v1349_v51  ;;  %v1352_v32 = vsel %vm1126_vm9, %v1013_v1, %v1239_v20  ;;  %vm1127_vm10 = vcmp.ge.f32.partialorder %v1014_v49, 0.0  ;;  %v1240_v42 = vmul.f32 0.01, %v1014_v49  ;;  %vm1128_vm11 = vcmp.ge.f32.partialorder %v1015_v52, 0.0  ;;  %v3838_v1 = vld [vmem:[#allocation46_spill] sm:$0xff] }
 0x254   : > { %1463 = vst.msk [vmem:[%s3005_s14 + $0x238] sm:$0xff] %vm230_vm0, %v1350_v50  ;;  %v1241_v4 = vmul.f32 0.01, %v1015_v52  ;;  %vm1129_vm12 = vcmp.ge.f32.partialorder %v1016_v58, 0.0  ;;  %v1242_v16 = vmul.f32 0.01, %v1016_v58  ;;  %v1019_v19 = vmul.f32 %v2982_v3, %v3828_v33 }
 0x255   : > { %1464 = vst.msk [vmem:[%s3005_s14 + $0x240] sm:$0xff] %vm230_vm0, %v1351_v41  ;;  %v1353_v22 = vsel %vm1127_vm10, %v1014_v49, %v1240_v42  ;;  %vm1130_vm13 = vcmp.ge.f32.partialorder %v1017_v24, 0.0  ;;  %v1243_v25 = vmul.f32 0.01, %v1017_v24  ;;  %vm1131_vm14 = vcmp.ge.f32.partialorder %v1018_v47, 0.0 }
 0x256   : > { %1465 = vst.msk [vmem:[%s3005_s14 + $0x248] sm:$0xff] %vm230_vm0, %v1352_v32  ;;  %v1354_v8 = vsel %vm1128_vm11, %v1015_v52, %v1241_v4  ;;  %v1355_v60 = vsel %vm1129_vm12, %v1016_v58, %v1242_v16  ;;  %v1244_v12 = vmul.f32 0.01, %v1018_v47  ;;  %vm1132_vm15 = vcmp.ge.f32.partialorder %v1019_v19, 0.0  ;;  %v3842_v32 = vld [vmem:[#allocation50_spill] sm:$0xff]  ;;  %v3843_v16 = vld [vmem:[#allocation51_spill] sm:$0xff] }
 0x257   : > { %1466 = vst.msk [vmem:[%s3005_s14 + $0x250] sm:$0xff] %vm230_vm0, %v1353_v22  ;;  %v1356_v27 = vsel %vm1130_vm13, %v1017_v24, %v1243_v25  ;;  %v1245_v17 = vmul.f32 0.01, %v1019_v19  ;;  %v1020_v26 = vmul.f32 %v2982_v3, %v3829_v21  ;;  %v1021_v45 = vmul.f32 %v2982_v3, %v3830_v23  ;;  %v3845_v25 = vld [vmem:[#allocation53_spill] sm:$0xff]  ;;  %v3846_v21 = vld [vmem:[#allocation54_spill] sm:$0xff] }
 0x258   : > { %1467 = vst.msk [vmem:[%s3005_s14 + $0x258] sm:$0xff] %vm230_vm0, %v1354_v8  ;;  %v1357_v0 = vsel %vm1131_vm14, %v1018_v47, %v1244_v12  ;;  %v1022_v54 = vmul.f32 %v2982_v3, %v3831_v28  ;;  %v1023_v11 = vmul.f32 %v2982_v3, %v3832_v30  ;;  %v1024_v29 = vmul.f32 %v2982_v3, %v3833_v15  ;;  %v3847_v15 = vld [vmem:[#allocation55_spill] sm:$0xff] }
 0x259   : > { %1468 = vst.msk [vmem:[%s3005_s14 + $0x260] sm:$0xff] %vm230_vm0, %v1355_v60  ;;  %v1358_v18 = vsel %vm1132_vm15, %v1019_v19, %v1245_v17  ;;  %vm1133_vm2 = vcmp.ge.f32.partialorder %v1020_v26, 0.0  ;;  %v1246_v31 = vmul.f32 0.01, %v1020_v26  ;;  %vm1134_vm3 = vcmp.ge.f32.partialorder %v1021_v45, 0.0  ;;  %v3844_v19 = vld [vmem:[#allocation52_spill] sm:$0xff] }
 0x25a   : > { %1469 = vst.msk [vmem:[%s3005_s14 + $0x268] sm:$0xff] %vm230_vm0, %v1356_v27  ;;  %v1247_v35 = vmul.f32 0.01, %v1021_v45  ;;  %vm1135_vm4 = vcmp.ge.f32.partialorder %v1022_v54, 0.0  ;;  %v1248_v9 = vmul.f32 0.01, %v1022_v54  ;;  %v1025_v34 = vmul.f32 %v2982_v3, %v3834_v39 }
 0x25b   : > { %1470 = vst.msk [vmem:[%s3005_s14 + $0x270] sm:$0xff] %vm230_vm0, %v1357_v0  ;;  %v1359_v44 = vsel %vm1133_vm2, %v1020_v26, %v1246_v31  ;;  %vm1136_vm5 = vcmp.ge.f32.partialorder %v1023_v11, 0.0  ;;  %v1249_v48 = vmul.f32 0.01, %v1023_v11  ;;  %vm1137_vm6 = vcmp.ge.f32.partialorder %v1024_v29, 0.0 }
 0x25c   : > { %1471 = vst.msk [vmem:[%s3005_s14 + $0x278] sm:$0xff] %vm230_vm0, %v1358_v18  ;;  %v1360_v53 = vsel %vm1134_vm3, %v1021_v45, %v1247_v35  ;;  %v1361_v2 = vsel %vm1135_vm4, %v1022_v54, %v1248_v9  ;;  %v1250_v37 = vmul.f32 0.01, %v1024_v29  ;;  %vm1138_vm7 = vcmp.ge.f32.partialorder %v1025_v34, 0.0  ;;  %v3848_v18 = vld [vmem:[#allocation56_spill] sm:$0xff]  ;;  %v3849_v9 = vld [vmem:[#allocation57_spill] sm:$0xff] }
 0x25d   : > { %1472 = vst.msk [vmem:[%s3005_s14 + $0x280] sm:$0xff] %vm230_vm0, %v1359_v44  ;;  %v1362_v40 = vsel %vm1136_vm5, %v1023_v11, %v1249_v48  ;;  %v1251_v43 = vmul.f32 0.01, %v1025_v34  ;;  %v1026_v57 = vmul.f32 %v2982_v3, %v3835_v7  ;;  %v1027_v38 = vmul.f32 %v2982_v3, %v3836_v10  ;;  %v3851_v48 = vld [vmem:[#allocation59_spill] sm:$0xff]  ;;  %v3852_v7 = vld [vmem:[#allocation60_spill] sm:$0xff] }
 0x25e   : > { %1473 = vst.msk [vmem:[%s3005_s14 + $0x288] sm:$0xff] %vm230_vm0, %v1360_v53  ;;  %v1363_v63 = vsel %vm1137_vm6, %v1024_v29, %v1250_v37  ;;  %v1028_v46 = vmul.f32 %v2982_v3, %v3837_v56  ;;  %v1029_v62 = vmul.f32 %v2982_v3, %v3838_v1  ;;  %v1030_v6 = vmul.f32 %v2982_v3, %v3839_v36  ;;  %v3853_v36 = vld [vmem:[#allocation61_spill] sm:$0xff] }
 0x25f   : > { %1474 = vst.msk [vmem:[%s3005_s14 + $0x290] sm:$0xff] %vm230_vm0, %v1361_v2  ;;  %v1364_v51 = vsel %vm1138_vm7, %v1025_v34, %v1251_v43  ;;  %vm1139_vm8 = vcmp.ge.f32.partialorder %v1026_v57, 0.0  ;;  %v1252_v14 = vmul.f32 0.01, %v1026_v57  ;;  %vm1140_vm9 = vcmp.ge.f32.partialorder %v1027_v38, 0.0  ;;  %v3850_v34 = vld [vmem:[#allocation58_spill] sm:$0xff] }
 0x260   : > { %1475 = vst.msk [vmem:[%s3005_s14 + $0x298] sm:$0xff] %vm230_vm0, %v1362_v40  ;;  %v1253_v50 = vmul.f32 0.01, %v1027_v38  ;;  %vm1141_vm10 = vcmp.ge.f32.partialorder %v1028_v46, 0.0  ;;  %v1254_v20 = vmul.f32 0.01, %v1028_v46  ;;  %v1031_v49 = vmul.f32 %v2982_v3, %v3840_v5 }
 0x261   : > { %1476 = vst.msk [vmem:[%s3005_s14 + $0x2a0] sm:$0xff] %vm230_vm0, %v1363_v63  ;;  %v1365_v13 = vsel %vm1139_vm8, %v1026_v57, %v1252_v14  ;;  %vm1142_vm11 = vcmp.ge.f32.partialorder %v1029_v62, 0.0  ;;  %v1255_v52 = vmul.f32 0.01, %v1029_v62  ;;  %vm1143_vm12 = vcmp.ge.f32.partialorder %v1030_v6, 0.0 }
 0x262   : > { %1477 = vst.msk [vmem:[%s3005_s14 + $0x2a8] sm:$0xff] %vm230_vm0, %v1364_v51  ;;  %v1366_v41 = vsel %vm1140_vm9, %v1027_v38, %v1253_v50  ;;  %v1367_v55 = vsel %vm1141_vm10, %v1028_v46, %v1254_v20  ;;  %v1256_v58 = vmul.f32 0.01, %v1030_v6  ;;  %vm1144_vm13 = vcmp.ge.f32.partialorder %v1031_v49, 0.0  ;;  %v3854_v51 = vld [vmem:[#allocation62_spill] sm:$0xff]  ;;  %v3855_v20 = vld [vmem:[#allocation63_spill] sm:$0xff] }
 0x263   : > { %1478 = vst.msk [vmem:[%s3005_s14 + $0x2b0] sm:$0xff] %vm230_vm0, %v1365_v13  ;;  %v1368_v61 = vsel %vm1142_vm11, %v1029_v62, %v1255_v52  ;;  %v1257_v24 = vmul.f32 0.01, %v1031_v49  ;;  %v1032_v47 = vmul.f32 %v2982_v3, %v3841_v59  ;;  %v1033_v42 = vmul.f32 %v2982_v3, %v3842_v32  ;;  %v3857_v52 = vld [vmem:[#allocation65_spill] sm:$0xff]  ;;  %v3858_v59 = vld [vmem:[#allocation66_spill] sm:$0xff] }
 0x264   : > { %1479 = vst.msk [vmem:[%s3005_s14 + $0x2b8] sm:$0xff] %vm230_vm0, %v1366_v41  ;;  %v1369_v4 = vsel %vm1143_vm12, %v1030_v6, %v1256_v58  ;;  %v1034_v33 = vmul.f32 %v2982_v3, %v3843_v16  ;;  %v1035_v22 = vmul.f32 %v2982_v3, %v3844_v19  ;;  %v1036_v8 = vmul.f32 %v2982_v3, %v3845_v25  ;;  %v3859_v25 = vld [vmem:[#allocation67_spill] sm:$0xff] }
 0x265   : > { %1480 = vst.msk [vmem:[%s3005_s14 + $0x2c0] sm:$0xff] %vm230_vm0, %v1367_v55  ;;  %v1370_v60 = vsel %vm1144_vm13, %v1031_v49, %v1257_v24  ;;  %vm1145_vm14 = vcmp.ge.f32.partialorder %v1032_v47, 0.0  ;;  %v1258_v12 = vmul.f32 0.01, %v1032_v47  ;;  %vm1146_vm15 = vcmp.ge.f32.partialorder %v1033_v42, 0.0  ;;  %v3856_v49 = vld [vmem:[#allocation64_spill] sm:$0xff] }
 0x266   : > { %1481 = vst.msk [vmem:[%s3005_s14 + $0x2c8] sm:$0xff] %vm230_vm0, %v1368_v61  ;;  %v1259_v27 = vmul.f32 0.01, %v1033_v42  ;;  %vm1147_vm2 = vcmp.ge.f32.partialorder %v1034_v33, 0.0  ;;  %v1260_v17 = vmul.f32 0.01, %v1034_v33  ;;  %v1037_v26 = vmul.f32 %v2982_v3, %v3846_v21 }
 0x267   : > { %1482 = vst.msk [vmem:[%s3005_s14 + $0x2d0] sm:$0xff] %vm230_vm0, %v1369_v4  ;;  %v1371_v23 = vsel %vm1145_vm14, %v1032_v47, %v1258_v12  ;;  %vm1148_vm3 = vcmp.ge.f32.partialorder %v1035_v22, 0.0  ;;  %v1261_v45 = vmul.f32 0.01, %v1035_v22  ;;  %vm1149_vm4 = vcmp.ge.f32.partialorder %v1036_v8, 0.0 }
 0x268   : > { %1483 = vst.msk [vmem:[%s3005_s14 + $0x2d8] sm:$0xff] %vm230_vm0, %v1370_v60  ;;  %v1372_v0 = vsel %vm1146_vm15, %v1033_v42, %v1259_v27  ;;  %v1373_v28 = vsel %vm1147_vm2, %v1034_v33, %v1260_v17  ;;  %v1262_v54 = vmul.f32 0.01, %v1036_v8  ;;  %vm1150_vm5 = vcmp.ge.f32.partialorder %v1037_v26, 0.0  ;;  %v3860_v60 = vld [vmem:[#allocation68_spill] sm:$0xff] }
 0x269   : > { %1484 = vst.msk [vmem:[%s3005_s14 + $0x2e0] sm:$0xff] %vm230_vm0, %v1371_v23  ;;  %v1374_v30 = vsel %vm1148_vm3, %v1035_v22, %v1261_v45  ;;  %v1263_v11 = vmul.f32 0.01, %v1037_v26  ;;  %v1038_v29 = vmul.f32 %v2982_v3, %v3847_v15  ;;  %v1039_v31 = vmul.f32 %v2982_v3, %v3848_v18  ;;  %v3861_v17 = vld [vmem:[#allocation72_spill] sm:$0xff] }
 0x26a   : > { %1485 = vst.msk [vmem:[%s3005_s14 + $0x2e8] sm:$0xff] %vm230_vm0, %v1372_v0  ;;  %v1375_v35 = vsel %vm1149_vm4, %v1036_v8, %v1262_v54  ;;  %v1040_v39 = vmul.f32 %v2982_v3, %v3849_v9  ;;  %v1041_v44 = vmul.f32 %v2982_v3, %v3850_v34  ;;  %v1042_v53 = vmul.f32 %v2982_v3, %v3851_v48 }
 0x26b   : > { %1486 = vst.msk [vmem:[%s3005_s14 + $0x2f0] sm:$0xff] %vm230_vm0, %v1373_v28  ;;  %v1376_v2 = vsel %vm1150_vm5, %v1037_v26, %v1263_v11  ;;  %vm1151_vm6 = vcmp.ge.f32.partialorder %v1038_v29, 0.0  ;;  %v1264_v37 = vmul.f32 0.01, %v1038_v29  ;;  %vm1152_vm7 = vcmp.ge.f32.partialorder %v1039_v31, 0.0 }
 0x26c   : > { %1487 = vst.msk [vmem:[%s3005_s14 + $0x2f8] sm:$0xff] %vm230_vm0, %v1374_v30  ;;  %v1265_v40 = vmul.f32 0.01, %v1039_v31  ;;  %vm1153_vm8 = vcmp.ge.f32.partialorder %v1040_v39, 0.0  ;;  %v1266_v43 = vmul.f32 0.01, %v1040_v39  ;;  %v1043_v57 = vmul.f32 %v2982_v3, %v3852_v7 }
 0x26d   : > { %1488 = vst.msk [vmem:[%s3005_s14 + $0x300] sm:$0xff] %vm230_vm0, %v1375_v35  ;;  %v1377_v10 = vsel %vm1151_vm6, %v1038_v29, %v1264_v37  ;;  %vm1154_vm9 = vcmp.ge.f32.partialorder %v1041_v44, 0.0  ;;  %v1267_v38 = vmul.f32 0.01, %v1041_v44  ;;  %vm1155_vm10 = vcmp.ge.f32.partialorder %v1042_v53, 0.0 }
 0x26e   : > { %1489 = vst.msk [vmem:[%s3005_s14 + $0x308] sm:$0xff] %vm230_vm0, %v1376_v2  ;;  %v1378_v63 = vsel %vm1152_vm7, %v1039_v31, %v1265_v40  ;;  %v1379_v56 = vsel %vm1153_vm8, %v1040_v39, %v1266_v43  ;;  %v1268_v46 = vmul.f32 0.01, %v1042_v53  ;;  %vm1156_vm11 = vcmp.ge.f32.partialorder %v1043_v57, 0.0 }
 0x26f   : > { %1490 = vst.msk [vmem:[%s3005_s14 + $0x310] sm:$0xff] %vm230_vm0, %v1377_v10  ;;  %v1380_v1 = vsel %vm1154_vm9, %v1041_v44, %v1267_v38  ;;  %v1269_v62 = vmul.f32 0.01, %v1043_v57  ;;  %v1044_v6 = vmul.f32 %v2982_v3, %v3853_v36  ;;  %v1045_v14 = vmul.f32 %v2982_v3, %v3854_v51 }
 0x270   : > { %1491 = vst.msk [vmem:[%s3005_s14 + $0x318] sm:$0xff] %vm230_vm0, %v1378_v63  ;;  %v1381_v50 = vsel %vm1155_vm10, %v1042_v53, %v1268_v46  ;;  %v1046_v5 = vmul.f32 %v2982_v3, %v3855_v20  ;;  %v1047_v13 = vmul.f32 %v2982_v3, %v3856_v49  ;;  %v1048_v41 = vmul.f32 %v2982_v3, %v3857_v52 }
 0x271   : > { %1492 = vst.msk [vmem:[%s3005_s14 + $0x320] sm:$0xff] %vm230_vm0, %v1379_v56  ;;  %v1382_v55 = vsel %vm1156_vm11, %v1043_v57, %v1269_v62  ;;  %vm1157_vm12 = vcmp.ge.f32.partialorder %v1044_v6, 0.0  ;;  %v1270_v58 = vmul.f32 0.01, %v1044_v6  ;;  %vm1158_vm13 = vcmp.ge.f32.partialorder %v1045_v14, 0.0 }
 0x272   : > { %1493 = vst.msk [vmem:[%s3005_s14 + $0x328] sm:$0xff] %vm230_vm0, %v1380_v1  ;;  %v1271_v61 = vmul.f32 0.01, %v1045_v14  ;;  %vm1159_vm14 = vcmp.ge.f32.partialorder %v1046_v5, 0.0  ;;  %v1272_v24 = vmul.f32 0.01, %v1046_v5  ;;  %v1049_v47 = vmul.f32 %v2982_v3, %v3858_v59 }
 0x273   : > { %1494 = vst.msk [vmem:[%s3005_s14 + $0x330] sm:$0xff] %vm230_vm0, %v1381_v50  ;;  %v1383_v32 = vsel %vm1157_vm12, %v1044_v6, %v1270_v58  ;;  %vm1160_vm15 = vcmp.ge.f32.partialorder %v1047_v13, 0.0  ;;  %v1273_v42 = vmul.f32 0.01, %v1047_v13  ;;  %vm1161_vm2 = vcmp.ge.f32.partialorder %v1048_v41, 0.0 }
 0x274   : > { %1495 = vst.msk [vmem:[%s3005_s14 + $0x338] sm:$0xff] %vm230_vm0, %v1382_v55  ;;  %v1384_v4 = vsel %vm1158_vm13, %v1045_v14, %v1271_v61  ;;  %v1385_v16 = vsel %vm1159_vm14, %v1046_v5, %v1272_v24  ;;  %v1274_v33 = vmul.f32 0.01, %v1048_v41  ;;  %vm1162_vm3 = vcmp.ge.f32.partialorder %v1049_v47, 0.0 }
 0x275   : > { %1496 = vst.msk [vmem:[%s3005_s14 + $0x340] sm:$0xff] %vm230_vm0, %v1383_v32  ;;  %v1386_v19 = vsel %vm1160_vm15, %v1047_v13, %v1273_v42  ;;  %v1275_v22 = vmul.f32 0.01, %v1049_v47  ;;  %v1050_v8 = vmul.f32 %v2982_v3, %v3859_v25  ;;  %v1051_v12 = vmul.f32 %v2982_v3, %v3860_v60 }
 0x276   : > { %1497 = vst.msk [vmem:[%s3005_s14 + $0x348] sm:$0xff] %vm230_vm0, %v1384_v4  ;;  %v1387_v27 = vsel %vm1161_vm2, %v1048_v41, %v1274_v33  ;;  %v1052_v21 = vmul.f32 %v2982_v3, %v3861_v17 }
 0x277   : > { %1498 = vst.msk [vmem:[%s3005_s14 + $0x350] sm:$0xff] %vm230_vm0, %v1385_v16  ;;  %v1388_v26 = vsel %vm1162_vm3, %v1049_v47, %v1275_v22  ;;  %vm1163_vm4 = vcmp.ge.f32.partialorder %v1050_v8, 0.0  ;;  %v1276_v23 = vmul.f32 0.01, %v1050_v8  ;;  %vm1164_vm5 = vcmp.ge.f32.partialorder %v1051_v12, 0.0 }
 0x278   : > { %1499 = vst.msk [vmem:[%s3005_s14 + $0x358] sm:$0xff] %vm230_vm0, %v1386_v19  ;;  %v1277_v45 = vmul.f32 0.01, %v1051_v12  ;;  %vm1165_vm6 = vcmp.ge.f32.partialorder %v1052_v21, 0.0  ;;  %v1278_v0 = vmul.f32 0.01, %v1052_v21 }
 0x279   : > { %1500 = vst.msk [vmem:[%s3005_s14 + $0x360] sm:$0xff] %vm230_vm0, %v1387_v27  ;;  %v1389_v28 = vsel %vm1163_vm4, %v1050_v8, %v1276_v23 }
 0x27a   : > { %1501 = vst.msk [vmem:[%s3005_s14 + $0x368] sm:$0xff] %vm230_vm0, %v1388_v26  ;;  %v1390_v54 = vsel %vm1164_vm5, %v1051_v12, %v1277_v45  ;;  %v1391_v3 = vsel %vm1165_vm6, %v1052_v21, %v1278_v0 }
 0x27b   : > { %1502 = vst.msk [vmem:[%s3005_s14 + $0x370] sm:$0xff] %vm230_vm0, %v1389_v28 }
 0x27c   : > { %1503 = vst.msk [vmem:[%s3005_s14 + $0x378] sm:$0xff] %vm230_vm0, %v1390_v54 }
 0x27d   : > { %1504 = vst.msk [vmem:[%s3005_s14 + $0x380] sm:$0xf] %vm454_vm1, %v1391_v3 }
 0x27e PF: > { %s11_s6 = sadd.s32 1, %s1589_s6  }
 0x27f   : > { %p8_p4 = scmp.ge.s32.totalorder %s11_s6, 4  }
 0x281   :  { %10 = sbr.rel (!%p8_p4) target bundleno = 1 (0x1), region = 54 }

// kernel: dis_content_forward.10
= control target key start
LH: loop header
LB: loop body
LE: loop exit
PB: predicated region body
PF: predicated region fallthrough
CT: control target
= control target key end

     0   :  { %s1127_s12 = smov 0   ;;  %s1129_s13 = smov 0   ;;  %s1412_s0 = inlined_call_operand.vmem [shape: f32[512,1664], index: 0, kind: input, shape index: {}]   ;;  %s1413_s1 = inlined_call_operand.vmem [shape: f32[1664,128], index: 1, kind: input, shape index: {}]   ;;  %s1414_s2 = inlined_call_operand.vmem [shape: f32[1,128], index: 2, kind: input, shape index: {}]   ;;  %s1415_s3 = inlined_call_operand.vmem [shape: f32[512,128], index: 3, kind: output, shape index: {}]  }
   0x1   :  { %s1131_s14 = smov 0   ;;  %s1133_s15 = smov 0  }
   0x2   :  { %s1135_s16 = smov 0   ;;  %s1137_s17 = smov 0  }
   0x3   :  { %s1139_s18 = smov 0  }
   0x4 LB: > { %s25_s19 = sadd.s32 1, %s1096_s16  ;;  %s32_s20 = sadd.s32 1, %s1100_s17  ;;  %s1104_s18 = sphi %s1139_s18, %s13_s18   ;;  %s1100_s17 = sphi %s1137_s17, %s1421_s17   ;;  %s1096_s16 = sphi %s1135_s16, %s1420_s16   ;;  %s1092_s15 = sphi %s1133_s15, %s1419_s15   ;;  %s1088_s14 = sphi %s1131_s14, %s1418_s14   ;;  %s1084_s13 = sphi %s1129_s13, %s1417_s13   ;;  %s1080_s12 = sphi %s1127_s12, %s1416_s12  }
   0x5   : > { %p26_p0 = scmp.ge.s32.totalorder %s25_s19, 13  ;;  %p48_p1 = scmp.ne.s32.totalorder %s1084_s13, %s1080_s12 }
   0x6   : > { %p49_p2 = scmp.eq.s32.totalorder %s1104_s18, 0  ;;  %s41_s24 = sadd.s32 1, %s1084_s13 }
   0x7   : > { %s1423_s19 = smov (%p26_p0, %s25_s19), 0  ;;  %s1425_s20 = smov (!%p26_p0, %s32_s20), %s1100_s17 }
   0x8   : > { %p50_p3 = por %p49_p2, %p48_p1  ;;  %p34_p4 = scmp.ge.s32.totalorder %s1425_s20, 2 }
   0x9   : > { %s37_s21 = ssub.s32 %s1096_s16, %s1423_s19  ;;  %p928_p6 = scmp.ge.s32.totalorder %s1104_s18, 26 }
   0xa   : > { %s1427_s20 = smov (%p34_p4, %s1425_s20), 0 }
   0xb   : > { %s36_s22 = ssub.s32 %s1100_s17, %s1427_s20  ;;  %162 = sbr.rel (%p928_p6) target bundleno = 55 (0x37), region = 20 }
   0xc   : > { %s38_s23 = sor.u32 %s37_s21, %s36_s22 }
   0xd   : > { %p39_p5 = scmp.eq.s32.totalorder %s38_s23, 0 }
   0xf   : > { %s1178_s25 = scalar_select %p39_p5, %s1084_s13, %s41_s24  }
  0x10   : > { %165 = sbr.rel (!%p50_p3) target bundleno = 55 (0x37), region = 24  ;;  %s167_s26 = sand.u32 (%p50_p3), 1, %s1084_s13  }
  0x11   : > { %s991_s27 = smul.u32 (%p50_p3), 416, %s1100_s17  ;;  %s929_s28 = sshll.u32 (%p50_p3), %s167_s26, 8 }
  0x12   : > { %s1192_s7 = scalar_lea.vmem (%p50_p3), [#allocation3], %s929_s28 }
  0x13   : > { %s172_s29 = sadd.s32 (%p50_p3), %s1096_s16, %s991_s27 }
  0x14   : > { %s932_s30 = sshll.u32 (%p50_p3), %s172_s29, 3 }
  0x15   : > { %s1187_s6 = scalar_lea.vmem %s1412_s0, %s932_s30 }
  0x16   : > { %v265_v0 = vld [vmem:[%s1187_s6] sm:$0xff]  ;;  %v267_v1 = vld [vmem:[%s1187_s6 + $0x68] sm:$0xff]  ;;  %v269_v2 = vld [vmem:[%s1187_s6 + $0xd0] sm:$0xff] }
  0x17   : > { %266 = vst [vmem:[%s1192_s7] sm:$0xff] %v265_v0  ;;  %v271_v3 = vld [vmem:[%s1187_s6 + $0x138] sm:$0xff]  ;;  %v273_v4 = vld [vmem:[%s1187_s6 + $0x1a0] sm:$0xff]  ;;  %v275_v5 = vld [vmem:[%s1187_s6 + $0x208] sm:$0xff] }
  0x18   : > { %268 = vst [vmem:[%s1192_s7 + $0x8] sm:$0xff] %v267_v1  ;;  %v277_v6 = vld [vmem:[%s1187_s6 + $0x270] sm:$0xff]  ;;  %v279_v7 = vld [vmem:[%s1187_s6 + $0x2d8] sm:$0xff]  ;;  %v281_v8 = vld [vmem:[%s1187_s6 + $0x340] sm:$0xff] }
  0x19   : > { %270 = vst [vmem:[%s1192_s7 + $0x10] sm:$0xff] %v269_v2  ;;  %v283_v9 = vld [vmem:[%s1187_s6 + $0x3a8] sm:$0xff]  ;;  %v285_v10 = vld [vmem:[%s1187_s6 + $0x410] sm:$0xff]  ;;  %v287_v11 = vld [vmem:[%s1187_s6 + $0x478] sm:$0xff] }
  0x1a   : > { %272 = vst [vmem:[%s1192_s7 + $0x18] sm:$0xff] %v271_v3  ;;  %v289_v12 = vld [vmem:[%s1187_s6 + $0x4e0] sm:$0xff]  ;;  %v291_v13 = vld [vmem:[%s1187_s6 + $0x548] sm:$0xff]  ;;  %v293_v14 = vld [vmem:[%s1187_s6 + $0x5b0] sm:$0xff] }
  0x1b   : > { %274 = vst [vmem:[%s1192_s7 + $0x20] sm:$0xff] %v273_v4  ;;  %v295_v15 = vld [vmem:[%s1187_s6 + $0x618] sm:$0xff]  ;;  %v297_v16 = vld [vmem:[%s1187_s6 + $0x680] sm:$0xff]  ;;  %v299_v17 = vld [vmem:[%s1187_s6 + $0x6e8] sm:$0xff] }
  0x1c   : > { %276 = vst [vmem:[%s1192_s7 + $0x28] sm:$0xff] %v275_v5  ;;  %v301_v18 = vld [vmem:[%s1187_s6 + $0x750] sm:$0xff]  ;;  %v303_v19 = vld [vmem:[%s1187_s6 + $0x7b8] sm:$0xff]  ;;  %v305_v20 = vld [vmem:[%s1187_s6 + $0x820] sm:$0xff] }
  0x1d   : > { %278 = vst [vmem:[%s1192_s7 + $0x30] sm:$0xff] %v277_v6  ;;  %v307_v21 = vld [vmem:[%s1187_s6 + $0x888] sm:$0xff]  ;;  %v309_v22 = vld [vmem:[%s1187_s6 + $0x8f0] sm:$0xff]  ;;  %v311_v23 = vld [vmem:[%s1187_s6 + $0x958] sm:$0xff] }
  0x1e   : > { %280 = vst [vmem:[%s1192_s7 + $0x38] sm:$0xff] %v279_v7  ;;  %v313_v24 = vld [vmem:[%s1187_s6 + $0x9c0] sm:$0xff]  ;;  %v315_v25 = vld [vmem:[%s1187_s6 + $0xa28] sm:$0xff]  ;;  %v317_v26 = vld [vmem:[%s1187_s6 + $0xa90] sm:$0xff] }
  0x1f   : > { %282 = vst [vmem:[%s1192_s7 + $0x40] sm:$0xff] %v281_v8  ;;  %v319_v27 = vld [vmem:[%s1187_s6 + $0xaf8] sm:$0xff]  ;;  %v321_v28 = vld [vmem:[%s1187_s6 + $0xb60] sm:$0xff]  ;;  %v323_v29 = vld [vmem:[%s1187_s6 + $0xbc8] sm:$0xff] }
  0x20   : > { %284 = vst [vmem:[%s1192_s7 + $0x48] sm:$0xff] %v283_v9  ;;  %v325_v30 = vld [vmem:[%s1187_s6 + $0xc30] sm:$0xff]  ;;  %v327_v31 = vld [vmem:[%s1187_s6 + $0xc98] sm:$0xff] }
  0x21   : > { %286 = vst [vmem:[%s1192_s7 + $0x50] sm:$0xff] %v285_v10 }
  0x22   : > { %288 = vst [vmem:[%s1192_s7 + $0x58] sm:$0xff] %v287_v11 }
  0x23   : > { %290 = vst [vmem:[%s1192_s7 + $0x60] sm:$0xff] %v289_v12 }
  0x24   : > { %292 = vst [vmem:[%s1192_s7 + $0x68] sm:$0xff] %v291_v13 }
  0x25   : > { %294 = vst [vmem:[%s1192_s7 + $0x70] sm:$0xff] %v293_v14 }
  0x26   : > { %296 = vst [vmem:[%s1192_s7 + $0x78] sm:$0xff] %v295_v15 }
  0x27   : > { %298 = vst [vmem:[%s1192_s7 + $0x80] sm:$0xff] %v297_v16 }
  0x28   : > { %300 = vst [vmem:[%s1192_s7 + $0x88] sm:$0xff] %v299_v17 }
  0x29   : > { %302 = vst [vmem:[%s1192_s7 + $0x90] sm:$0xff] %v301_v18 }
  0x2a   : > { %304 = vst [vmem:[%s1192_s7 + $0x98] sm:$0xff] %v303_v19 }
  0x2b   : > { %306 = vst [vmem:[%s1192_s7 + $0xa0] sm:$0xff] %v305_v20 }
  0x2c   : > { %308 = vst [vmem:[%s1192_s7 + $0xa8] sm:$0xff] %v307_v21 }
  0x2d   : > { %310 = vst [vmem:[%s1192_s7 + $0xb0] sm:$0xff] %v309_v22 }
  0x2e   : > { %312 = vst [vmem:[%s1192_s7 + $0xb8] sm:$0xff] %v311_v23 }
  0x2f   : > { %314 = vst [vmem:[%s1192_s7 + $0xc0] sm:$0xff] %v313_v24 }
  0x30   : > { %316 = vst [vmem:[%s1192_s7 + $0xc8] sm:$0xff] %v315_v25 }
  0x31   : > { %318 = vst [vmem:[%s1192_s7 + $0xd0] sm:$0xff] %v317_v26 }
  0x32   : > { %320 = vst [vmem:[%s1192_s7 + $0xd8] sm:$0xff] %v319_v27 }
  0x33   : > { %322 = vst [vmem:[%s1192_s7 + $0xe0] sm:$0xff] %v321_v28 }
  0x34   : > { %324 = vst [vmem:[%s1192_s7 + $0xe8] sm:$0xff] %v323_v29 }
  0x35   : > { %326 = vst [vmem:[%s1192_s7 + $0xf0] sm:$0xff] %v325_v30 }
  0x36   : > { %328 = vst [vmem:[%s1192_s7 + $0xf8] sm:$0xff] %v327_v31 }
  0x37 PF: > { %p933_p7 = scmp.ge.s32.totalorder %s1104_s18, 1  ;;  %p345_p8 = scmp.lt.s32.totalorder %s1104_s18, 27 }
  0x39   : > { %p346_p9 = pnand %p933_p7, %p345_p8 }
  0x3a   : > { %s352_s8 = sand.u32 (!%p346_p9), 1, %s1080_s12   ;;  %s935_s9 = sshll.u32 (!%p346_p9), %s1088_s14, 4 }
  0x3b   : > { %349 = sbr.rel (%p346_p9) target bundleno = 364 (0x16c), region = 66  ;;  %s934_s10 = sshll.u32 (!%p346_p9), %s352_s8, 8 }
  0x3c   : > { %p391_p10 = scmp.lt.s32.totalorder (!%p346_p9), %s935_s9, 207  ;;  %s937_s11 = sshll.u32 (!%p346_p9), %s1092_s15, 5 }
  0x3d   : > { %p403_p11 = scmp.lt.s32.totalorder (!%p346_p9), %s937_s11, 63  ;;  %s1270_s12 = scalar_lea.vmem (!%p346_p9), [#allocation3], %s934_s10 }
  0x3e   : > { %p939_p12 = scmp.ne.s32.totalorder (!%p346_p9), %s1088_s14, 0 }
  0x40   : > { %s1429_s9 = smov (!%p391_p10, %s935_s9), 207  ;;  %s1431_s11 = smov (!%p403_p11, %s937_s11), 63 }
  0x41   : > { %s936_s21 = sshll.u32 %s1429_s9, 3  ;;  %s938_s26 = sshll.u32 %s1431_s11, 3 }
  0x42   : > { %s1263_s24 = scalar_lea.vmem %s1413_s1, %s936_s21  ;;  %s1268_s29 = scalar_lea.vmem %s1415_s3, %s938_s26 }
  0x43   : > { %414 = sbr.rel (%p939_p12) target bundleno = 105 (0x69), region = 74 }
  0x48   : > { %v1106_v32 = vmov 0.0  }
  0x49   : > { %415 = vst [vmem:[#allocation2 + $0xb0] sm:$0xff] %v1106_v32 }
  0x4a   : > { %416 = vst [vmem:[#allocation2] sm:$0xff] %v1106_v32 }
  0x4b   : > { %417 = vst [vmem:[#allocation2 + $0xd8] sm:$0xff] %v1106_v32 }
  0x4c   : > { %418 = vst [vmem:[#allocation2 + $0x18] sm:$0xff] %v1106_v32 }
  0x4d   : > { %419 = vst [vmem:[#allocation2 + $0x50] sm:$0xff] %v1106_v32 }
  0x4e   : > { %420 = vst [vmem:[#allocation2 + $0x68] sm:$0xff] %v1106_v32 }
  0x4f   : > { %421 = vst [vmem:[#allocation2 + $0x30] sm:$0xff] %v1106_v32 }
  0x50   : > { %422 = vst [vmem:[#allocation2 + $0x48] sm:$0xff] %v1106_v32 }
  0x51   : > { %423 = vst [vmem:[#allocation2 + $0x80] sm:$0xff] %v1106_v32 }
  0x52   : > { %424 = vst [vmem:[#allocation2 + $0x88] sm:$0xff] %v1106_v32 }
  0x53   : > { %425 = vst [vmem:[#allocation2 + $0xe8] sm:$0xff] %v1106_v32 }
  0x54   : > { %426 = vst [vmem:[#allocation2 + $0xb8] sm:$0xff] %v1106_v32 }
  0x55   : > { %427 = vst [vmem:[#allocation2 + $0x60] sm:$0xff] %v1106_v32 }
  0x56   : > { %428 = vst [vmem:[#allocation2 + $0xf0] sm:$0xff] %v1106_v32 }
  0x57   : > { %429 = vst [vmem:[#allocation2 + $0x8] sm:$0xff] %v1106_v32 }
  0x58   : > { %430 = vst [vmem:[#allocation2 + $0x78] sm:$0xff] %v1106_v32 }
  0x59   : > { %431 = vst [vmem:[#allocation2 + $0x38] sm:$0xff] %v1106_v32 }
  0x5a   : > { %432 = vst [vmem:[#allocation2 + $0x58] sm:$0xff] %v1106_v32 }
  0x5b   : > { %433 = vst [vmem:[#allocation2 + $0x40] sm:$0xff] %v1106_v32 }
  0x5c   : > { %434 = vst [vmem:[#allocation2 + $0xc8] sm:$0xff] %v1106_v32 }
  0x5d   : > { %435 = vst [vmem:[#allocation2 + $0xe0] sm:$0xff] %v1106_v32 }
  0x5e   : > { %436 = vst [vmem:[#allocation2 + $0x90] sm:$0xff] %v1106_v32 }
  0x5f   : > { %437 = vst [vmem:[#allocation2 + $0x70] sm:$0xff] %v1106_v32 }
  0x60   : > { %438 = vst [vmem:[#allocation2 + $0xc0] sm:$0xff] %v1106_v32 }
  0x61   : > { %439 = vst [vmem:[#allocation2 + $0xa8] sm:$0xff] %v1106_v32 }
  0x62   : > { %440 = vst [vmem:[#allocation2 + $0xd0] sm:$0xff] %v1106_v32 }
  0x63   : > { %441 = vst [vmem:[#allocation2 + $0x10] sm:$0xff] %v1106_v32 }
  0x64   : > { %442 = vst [vmem:[#allocation2 + $0x28] sm:$0xff] %v1106_v32 }
  0x65   : > { %443 = vst [vmem:[#allocation2 + $0xa0] sm:$0xff] %v1106_v32 }
  0x66   : > { %444 = vst [vmem:[#allocation2 + $0xf8] sm:$0xff] %v1106_v32 }
  0x67   : > { %445 = vst [vmem:[#allocation2 + $0x20] sm:$0xff] %v1106_v32 }
  0x68   : > { %446 = vst [vmem:[#allocation2 + $0x98] sm:$0xff] %v1106_v32 }
  0x69 PF: > { %v526_v33 = vld [vmem:[%s1263_s24 + $0x78] sm:$0xff]  ;;  %v525_v34 = vld [vmem:[%s1263_s24 + $0x70] sm:$0xff]  ;;  %v524_v35 = vld [vmem:[%s1263_s24 + $0x68] sm:$0xff]  ;;  %p940_p13 = scmp.ne.s32.totalorder %s1088_s14, 12 }
  0x6a   : > { %944 = vmatpush.msra.mxu2 %v526_v33  ;;  %945 = vmatpush.msra.mxu3 %v526_v33  ;;  %v523_v36 = vld [vmem:[%s1263_s24 + $0x60] sm:$0xff]  ;;  %v522_v37 = vld [vmem:[%s1263_s24 + $0x58] sm:$0xff]  ;;  %v521_v38 = vld [vmem:[%s1263_s24 + $0x50] sm:$0xff] }
  0x6b   : > { %527 = vmatpush.msra.mxu0 %v526_v33  ;;  %943 = vmatpush.msra.mxu1 %v526_v33  ;;  %v520_v39 = vld [vmem:[%s1263_s24 + $0x48] sm:$0xff]  ;;  %v519_v40 = vld [vmem:[%s1263_s24 + $0x40] sm:$0xff]  ;;  %v518_v41 = vld [vmem:[%s1263_s24 + $0x38] sm:$0xff] }
  0x6c   : > { %947 = vmatpush.msra.mxu2 %v525_v34  ;;  %948 = vmatpush.msra.mxu3 %v525_v34  ;;  %v517_v42 = vld [vmem:[%s1263_s24 + $0x30] sm:$0xff]  ;;  %v516_v43 = vld [vmem:[%s1263_s24 + $0x28] sm:$0xff]  ;;  %v515_v44 = vld [vmem:[%s1263_s24 + $0x20] sm:$0xff] }
  0x6d   : > { %528 = vmatpush.msra.mxu0 %v525_v34  ;;  %946 = vmatpush.msra.mxu1 %v525_v34  ;;  %v514_v45 = vld [vmem:[%s1263_s24 + $0x18] sm:$0xff]  ;;  %v513_v46 = vld [vmem:[%s1263_s24 + $0x10] sm:$0xff]  ;;  %v512_v47 = vld [vmem:[%s1263_s24 + $0x8] sm:$0xff] }
  0x6e   : > { %950 = vmatpush.msra.mxu2 %v524_v35  ;;  %951 = vmatpush.msra.mxu3 %v524_v35  ;;  %v511_v48 = vld [vmem:[%s1263_s24] sm:$0xff]  ;;  %v496_v53 = vld [vmem:[%s1270_s12 + $0x88] sm:$0xff]  ;;  %v497_v57 = vld [vmem:[%s1270_s12 + $0x90] sm:$0xff] }
  0x6f   : > { %529 = vmatpush.msra.mxu0 %v524_v35  ;;  %949 = vmatpush.msra.mxu1 %v524_v35  ;;  %v495_v49 = vld [vmem:[%s1270_s12 + $0x80] sm:$0xff]  ;;  %v504_v54 = vld [vmem:[%s1270_s12 + $0xc8] sm:$0xff]  ;;  %v505_v58 = vld [vmem:[%s1270_s12 + $0xd0] sm:$0xff] }
  0x70   : > { %953 = vmatpush.msra.mxu2 %v523_v36  ;;  %954 = vmatpush.msra.mxu3 %v523_v36  ;;  %v503_v50 = vld [vmem:[%s1270_s12 + $0xc0] sm:$0xff]  ;;  %v480_v55 = vld [vmem:[%s1270_s12 + $0x8] sm:$0xff]  ;;  %v481_v59 = vld [vmem:[%s1270_s12 + $0x10] sm:$0xff] }
  0x71   : > { %530 = vmatpush.msra.mxu0 %v523_v36  ;;  %952 = vmatpush.msra.mxu1 %v523_v36  ;;  %v479_v51 = vld [vmem:[%s1270_s12] sm:$0xff]  ;;  %v488_v56 = vld [vmem:[%s1270_s12 + $0x48] sm:$0xff]  ;;  %v489_v60 = vld [vmem:[%s1270_s12 + $0x50] sm:$0xff] }
  0x72   : > { %956 = vmatpush.msra.mxu2 %v522_v37  ;;  %957 = vmatpush.msra.mxu3 %v522_v37  ;;  %v487_v52 = vld [vmem:[%s1270_s12 + $0x40] sm:$0xff]  ;;  %v498_v61 = vld [vmem:[%s1270_s12 + $0x98] sm:$0xff]  ;;  %v500_v5 = vld [vmem:[%s1270_s12 + $0xa8] sm:$0xff] }
  0x73   : > { %531 = vmatpush.msra.mxu0 %v522_v37  ;;  %955 = vmatpush.msra.mxu1 %v522_v37  ;;  %v506_v62 = vld [vmem:[%s1270_s12 + $0xd8] sm:$0xff]  ;;  %v499_v1 = vld [vmem:[%s1270_s12 + $0xa0] sm:$0xff]  ;;  %v508_v6 = vld [vmem:[%s1270_s12 + $0xe8] sm:$0xff] }
  0x74   : > { %959 = vmatpush.msra.mxu2 %v521_v38  ;;  %960 = vmatpush.msra.mxu3 %v521_v38  ;;  %v482_v63 = vld [vmem:[%s1270_s12 + $0x18] sm:$0xff]  ;;  %v507_v2 = vld [vmem:[%s1270_s12 + $0xe0] sm:$0xff]  ;;  %v484_v7 = vld [vmem:[%s1270_s12 + $0x28] sm:$0xff] }
  0x75   : > { %532 = vmatpush.msra.mxu0 %v521_v38  ;;  %958 = vmatpush.msra.mxu1 %v521_v38  ;;  %v490_v0 = vld [vmem:[%s1270_s12 + $0x58] sm:$0xff]  ;;  %v483_v3 = vld [vmem:[%s1270_s12 + $0x20] sm:$0xff]  ;;  %v492_v8 = vld [vmem:[%s1270_s12 + $0x68] sm:$0xff] }
  0x76   : > { %962 = vmatpush.msra.mxu2 %v520_v39  ;;  %963 = vmatpush.msra.mxu3 %v520_v39  ;;  %v491_v4 = vld [vmem:[%s1270_s12 + $0x60] sm:$0xff]  ;;  %v501_v9 = vld [vmem:[%s1270_s12 + $0xb0] sm:$0xff]  ;;  %v502_v13 = vld [vmem:[%s1270_s12 + $0xb8] sm:$0xff] }
  0x77   : > { %533 = vmatpush.msra.mxu0 %v520_v39  ;;  %961 = vmatpush.msra.mxu1 %v520_v39  ;;  %v509_v10 = vld [vmem:[%s1270_s12 + $0xf0] sm:$0xff]  ;;  %v510_v14 = vld [vmem:[%s1270_s12 + $0xf8] sm:$0xff]  ;;  %v455_v18 = vld [vmem:[#allocation2 + $0x80] sm:$0xff] }
  0x78   : > { %965 = vmatpush.msra.mxu2 %v519_v40  ;;  %966 = vmatpush.msra.mxu3 %v519_v40  ;;  %v485_v11 = vld [vmem:[%s1270_s12 + $0x30] sm:$0xff]  ;;  %v486_v15 = vld [vmem:[%s1270_s12 + $0x38] sm:$0xff]  ;;  %v471_v24 = vld [vmem:[#allocation2 + $0xa8] sm:$0xff] }
  0x79   : > { %534 = vmatpush.msra.mxu0 %v519_v40  ;;  %964 = vmatpush.msra.mxu1 %v519_v40  ;;  %v493_v12 = vld [vmem:[%s1270_s12 + $0x70] sm:$0xff]  ;;  %v494_v16 = vld [vmem:[%s1270_s12 + $0x78] sm:$0xff]  ;;  %v448_v29 = vld [vmem:[#allocation2] sm:$0xff] }
  0x7a   : > { %968 = vmatpush.msra.mxu2 %v518_v41  ;;  %969 = vmatpush.msra.mxu3 %v518_v41  ;;  %v447_v17 = vld [vmem:[#allocation2 + $0xb0] sm:$0xff]  ;;  %v463_v23 = vld [vmem:[#allocation2 + $0x38] sm:$0xff]  ;;  %v456_v30 = vld [vmem:[#allocation2 + $0x88] sm:$0xff] }
  0x7b   : > { %535 = vmatpush.msra.mxu0 %v518_v41  ;;  %967 = vmatpush.msra.mxu1 %v518_v41  ;;  %v464_v35 = vld [vmem:[#allocation2 + $0x58] sm:$0xff]  ;;  %v472_v36 = vld [vmem:[#allocation2 + $0xd0] sm:$0xff] }
  0x7c   : > { %971 = vmatpush.msra.mxu2 %v517_v42  ;;  %972 = vmatpush.msra.mxu3 %v517_v42  ;;  %v449_v41 = vld [vmem:[#allocation2 + $0xd8] sm:$0xff] }
  0x7d   : > { %536 = vmatpush.msra.mxu0 %v517_v42  ;;  %970 = vmatpush.msra.mxu1 %v517_v42  ;;  %v457_v42 = vld [vmem:[#allocation2 + $0xe8] sm:$0xff] }
  0x7e   : > { %974 = vmatpush.msra.mxu2 %v516_v43  ;;  %975 = vmatpush.msra.mxu3 %v516_v43 }
  0x7f   : > { %537 = vmatpush.msra.mxu0 %v516_v43  ;;  %973 = vmatpush.msra.mxu1 %v516_v43 }
  0x80   : > { %977 = vmatpush.msra.mxu2 %v515_v44  ;;  %978 = vmatpush.msra.mxu3 %v515_v44 }
  0x81   : > { %538 = vmatpush.msra.mxu0 %v515_v44  ;;  %976 = vmatpush.msra.mxu1 %v515_v44 }
  0x82   : > { %980 = vmatpush.msra.mxu2 %v514_v45  ;;  %981 = vmatpush.msra.mxu3 %v514_v45 }
  0x83   : > { %539 = vmatpush.msra.mxu0 %v514_v45  ;;  %979 = vmatpush.msra.mxu1 %v514_v45 }
  0x84   : > { %983 = vmatpush.msra.mxu2 %v513_v46  ;;  %984 = vmatpush.msra.mxu3 %v513_v46 }
  0x85   : > { %540 = vmatpush.msra.mxu0 %v513_v46  ;;  %982 = vmatpush.msra.mxu1 %v513_v46 }
  0x86   : > { %986 = vmatpush.msra.mxu2 %v512_v47  ;;  %987 = vmatpush.msra.mxu3 %v512_v47 }
  0x87   : > { %541 = vmatpush.msra.mxu0 %v512_v47  ;;  %985 = vmatpush.msra.mxu1 %v512_v47  ;;  %v465_v47 = vld [vmem:[#allocation2 + $0x40] sm:$0xff] }
  0x88   : > { %989 = vmatpush.msra.mxu2 %v511_v48  ;;  %990 = vmatpush.msra.mxu3 %v511_v48 }
  0x89   : > { %591 = vmatmul.f32.vlgmr.msra.gmra.mxu2 %v495_v49  ;;  %615 = vmatmul.f32.vlgmr.msra.gmra.mxu3 %v503_v50 }
  0x8a   : > { %542 = vmatpush.msra.mxu0 %v511_v48  ;;  %988 = vmatpush.msra.mxu1 %v511_v48  ;;  %v473_v48 = vld [vmem:[#allocation2 + $0x10] sm:$0xff] }
  0x8b   : > { %543 = vmatmul.f32.vlgmr.msra.gmra.mxu0 %v479_v51  ;;  %567 = vmatmul.f32.vlgmr.msra.gmra.mxu1 %v487_v52 }
  0x91   : > { %594 = vmatmul.f32.gmra.mxu2 %v496_v53  ;;  %618 = vmatmul.f32.gmra.mxu3 %v504_v54  ;;  %v450_v53 = vld [vmem:[#allocation2 + $0x18] sm:$0xff] }
  0x92   : > { %v458_v54 = vld [vmem:[#allocation2 + $0xb8] sm:$0xff] }
  0x93   : > { %546 = vmatmul.f32.gmra.mxu0 %v480_v55  ;;  %570 = vmatmul.f32.gmra.mxu1 %v488_v56 }
  0x99   : > { %597 = vmatmul.f32.gmra.mxu2 %v497_v57  ;;  %621 = vmatmul.f32.gmra.mxu3 %v505_v58 }
  0x9b   : > { %549 = vmatmul.f32.gmra.mxu0 %v481_v59  ;;  %573 = vmatmul.f32.gmra.mxu1 %v489_v60  ;;  %v466_v59 = vld [vmem:[#allocation2 + $0xc8] sm:$0xff] }
  0x9c   : > { %v474_v60 = vld [vmem:[#allocation2 + $0x28] sm:$0xff] }
  0xa1   : > { %600 = vmatmul.f32.gmra.mxu2 %v498_v61  ;;  %624 = vmatmul.f32.gmra.mxu3 %v506_v62 }
  0xa3   : > { %552 = vmatmul.f32.gmra.mxu0 %v482_v63  ;;  %576 = vmatmul.f32.gmra.mxu1 %v490_v0 }
  0xa9   : > { %603 = vmatmul.f32.gmra.mxu2 %v499_v1  ;;  %627 = vmatmul.f32.gmra.mxu3 %v507_v2  ;;  %v451_v1 = vld [vmem:[#allocation2 + $0x50] sm:$0xff]  ;;  %v459_v2 = vld [vmem:[#allocation2 + $0x60] sm:$0xff] }
  0xab   : > { %555 = vmatmul.f32.gmra.mxu0 %v483_v3  ;;  %579 = vmatmul.f32.gmra.mxu1 %v491_v4 }
  0xb1   : > { %606 = vmatmul.f32.gmra.mxu2 %v500_v5  ;;  %630 = vmatmul.f32.gmra.mxu3 %v508_v6 }
  0xb3   : > { %558 = vmatmul.f32.gmra.mxu0 %v484_v7  ;;  %582 = vmatmul.f32.gmra.mxu1 %v492_v8  ;;  %v467_v7 = vld [vmem:[#allocation2 + $0xe0] sm:$0xff] }
  0xb4   : > { %v475_v8 = vld [vmem:[#allocation2 + $0xa0] sm:$0xff] }
  0xb9   : > { %609 = vmatmul.f32.gmra.mxu2 %v501_v9  ;;  %633 = vmatmul.f32.gmra.mxu3 %v509_v10 }
  0xbb   : > { %561 = vmatmul.f32.gmra.mxu0 %v485_v11  ;;  %585 = vmatmul.f32.gmra.mxu1 %v493_v12 }
  0xc1   : > { %612 = vmatmul.f32.gmra.mxu2 %v502_v13  ;;  %636 = vmatmul.f32.gmra.mxu3 %v510_v14  ;;  %v452_v13 = vld [vmem:[#allocation2 + $0x68] sm:$0xff]  ;;  %v460_v14 = vld [vmem:[#allocation2 + $0xf0] sm:$0xff] }
  0xc3   : > { %564 = vmatmul.f32.gmra.mxu0 %v486_v15  ;;  %588 = vmatmul.f32.gmra.mxu1 %v494_v16 }
 0x108   : > { %v544_v19 = vpop.f32.mrf.mxu0  ;;  %v568_v20 = vpop.f32.mrf.mxu1 }
 0x109   : > { %v640_v21 = vadd.f32 %v544_v19, %v447_v17  ;;  %v648_v22 = vadd.f32 %v568_v20, %v455_v18  ;;  %v468_v19 = vld [vmem:[#allocation2 + $0x90] sm:$0xff]  ;;  %v476_v20 = vld [vmem:[#allocation2 + $0xf8] sm:$0xff] }
 0x10b   : > { %672 = vst [vmem:[#allocation2 + $0xb0] sm:$0xff] %v640_v21 }
 0x10c   : > { %680 = vst [vmem:[#allocation2 + $0x80] sm:$0xff] %v648_v22  ;;  %v592_v25 = vpop.f32.mrf.mxu2  ;;  %v616_v26 = vpop.f32.mrf.mxu3 }
 0x10d   : > { %v656_v27 = vadd.f32 %v592_v25, %v463_v23  ;;  %v664_v28 = vadd.f32 %v616_v26, %v471_v24  ;;  %v453_v25 = vld [vmem:[#allocation2 + $0x30] sm:$0xff]  ;;  %v461_v26 = vld [vmem:[#allocation2 + $0x8] sm:$0xff] }
 0x10f   : > { %688 = vst [vmem:[#allocation2 + $0x38] sm:$0xff] %v656_v27 }
 0x110   : > { %696 = vst [vmem:[#allocation2 + $0xa8] sm:$0xff] %v664_v28  ;;  %v547_v31 = vpop.f32.mrf.mxu0  ;;  %v571_v32 = vpop.f32.mrf.mxu1 }
 0x111   : > { %v641_v33 = vadd.f32 %v547_v31, %v448_v29  ;;  %v649_v34 = vadd.f32 %v571_v32, %v456_v30  ;;  %v469_v31 = vld [vmem:[#allocation2 + $0x70] sm:$0xff]  ;;  %v477_v32 = vld [vmem:[#allocation2 + $0x20] sm:$0xff] }
 0x113   : > { %673 = vst [vmem:[#allocation2] sm:$0xff] %v641_v33 }
 0x114   : > { %681 = vst [vmem:[#allocation2 + $0x88] sm:$0xff] %v649_v34  ;;  %v595_v37 = vpop.f32.mrf.mxu2  ;;  %v619_v38 = vpop.f32.mrf.mxu3 }
 0x115   : > { %v657_v39 = vadd.f32 %v595_v37, %v464_v35  ;;  %v665_v40 = vadd.f32 %v619_v38, %v472_v36  ;;  %v454_v37 = vld [vmem:[#allocation2 + $0x48] sm:$0xff]  ;;  %v462_v38 = vld [vmem:[#allocation2 + $0x78] sm:$0xff] }
 0x117   : > { %689 = vst [vmem:[#allocation2 + $0x58] sm:$0xff] %v657_v39 }
 0x118   : > { %697 = vst [vmem:[#allocation2 + $0xd0] sm:$0xff] %v665_v40  ;;  %v550_v43 = vpop.f32.mrf.mxu0  ;;  %v574_v44 = vpop.f32.mrf.mxu1 }
 0x119   : > { %v642_v45 = vadd.f32 %v550_v43, %v449_v41  ;;  %v650_v46 = vadd.f32 %v574_v44, %v457_v42  ;;  %v470_v43 = vld [vmem:[#allocation2 + $0xc0] sm:$0xff]  ;;  %v478_v44 = vld [vmem:[#allocation2 + $0x98] sm:$0xff] }
 0x11b   : > { %674 = vst [vmem:[#allocation2 + $0xd8] sm:$0xff] %v642_v45 }
 0x11c   : > { %682 = vst [vmem:[#allocation2 + $0xe8] sm:$0xff] %v650_v46  ;;  %v598_v49 = vpop.f32.mrf.mxu2  ;;  %v622_v50 = vpop.f32.mrf.mxu3 }
 0x11d   : > { %v658_v51 = vadd.f32 %v598_v49, %v465_v47  ;;  %v666_v52 = vadd.f32 %v622_v50, %v473_v48 }
 0x11f   : > { %690 = vst [vmem:[#allocation2 + $0x40] sm:$0xff] %v658_v51 }
 0x120   : > { %698 = vst [vmem:[#allocation2 + $0x10] sm:$0xff] %v666_v52  ;;  %v553_v55 = vpop.f32.mrf.mxu0  ;;  %v577_v56 = vpop.f32.mrf.mxu1 }
 0x121   : > { %v643_v57 = vadd.f32 %v553_v55, %v450_v53  ;;  %v651_v58 = vadd.f32 %v577_v56, %v458_v54 }
 0x123   : > { %675 = vst [vmem:[#allocation2 + $0x18] sm:$0xff] %v643_v57 }
 0x124   : > { %683 = vst [vmem:[#allocation2 + $0xb8] sm:$0xff] %v651_v58  ;;  %v601_v61 = vpop.f32.mrf.mxu2  ;;  %v625_v62 = vpop.f32.mrf.mxu3 }
 0x125   : > { %v659_v63 = vadd.f32 %v601_v61, %v466_v59  ;;  %v667_v0 = vadd.f32 %v625_v62, %v474_v60 }
 0x127   : > { %691 = vst [vmem:[#allocation2 + $0xc8] sm:$0xff] %v659_v63 }
 0x128   : > { %699 = vst [vmem:[#allocation2 + $0x28] sm:$0xff] %v667_v0  ;;  %v556_v3 = vpop.f32.mrf.mxu0  ;;  %v580_v4 = vpop.f32.mrf.mxu1 }
 0x129   : > { %v644_v5 = vadd.f32 %v556_v3, %v451_v1  ;;  %v652_v6 = vadd.f32 %v580_v4, %v459_v2 }
 0x12b   : > { %676 = vst [vmem:[#allocation2 + $0x50] sm:$0xff] %v644_v5 }
 0x12c   : > { %684 = vst [vmem:[#allocation2 + $0x60] sm:$0xff] %v652_v6  ;;  %v604_v9 = vpop.f32.mrf.mxu2  ;;  %v628_v10 = vpop.f32.mrf.mxu3 }
 0x12d   : > { %v660_v11 = vadd.f32 %v604_v9, %v467_v7  ;;  %v668_v12 = vadd.f32 %v628_v10, %v475_v8 }
 0x12f   : > { %692 = vst [vmem:[#allocation2 + $0xe0] sm:$0xff] %v660_v11 }
 0x130   : > { %700 = vst [vmem:[#allocation2 + $0xa0] sm:$0xff] %v668_v12  ;;  %v559_v15 = vpop.f32.mrf.mxu0  ;;  %v583_v16 = vpop.f32.mrf.mxu1 }
 0x131   : > { %v645_v17 = vadd.f32 %v559_v15, %v452_v13  ;;  %v653_v18 = vadd.f32 %v583_v16, %v460_v14 }
 0x133   : > { %677 = vst [vmem:[#allocation2 + $0x68] sm:$0xff] %v645_v17 }
 0x134   : > { %685 = vst [vmem:[#allocation2 + $0xf0] sm:$0xff] %v653_v18  ;;  %v607_v21 = vpop.f32.mrf.mxu2  ;;  %v631_v22 = vpop.f32.mrf.mxu3 }
 0x135   : > { %v661_v23 = vadd.f32 %v607_v21, %v468_v19  ;;  %v669_v24 = vadd.f32 %v631_v22, %v476_v20 }
 0x137   : > { %693 = vst [vmem:[#allocation2 + $0x90] sm:$0xff] %v661_v23 }
 0x138   : > { %701 = vst [vmem:[#allocation2 + $0xf8] sm:$0xff] %v669_v24  ;;  %v562_v27 = vpop.f32.mrf.mxu0  ;;  %v586_v28 = vpop.f32.mrf.mxu1 }
 0x139   : > { %v646_v29 = vadd.f32 %v562_v27, %v453_v25  ;;  %v654_v30 = vadd.f32 %v586_v28, %v461_v26 }
 0x13b   : > { %678 = vst [vmem:[#allocation2 + $0x30] sm:$0xff] %v646_v29 }
 0x13c   : > { %686 = vst [vmem:[#allocation2 + $0x8] sm:$0xff] %v654_v30  ;;  %v610_v33 = vpop.f32.mrf.mxu2  ;;  %v634_v34 = vpop.f32.mrf.mxu3 }
 0x13d   : > { %v662_v35 = vadd.f32 %v610_v33, %v469_v31  ;;  %v670_v36 = vadd.f32 %v634_v34, %v477_v32 }
 0x13f   : > { %694 = vst [vmem:[#allocation2 + $0x70] sm:$0xff] %v662_v35 }
 0x140   : > { %702 = vst [vmem:[#allocation2 + $0x20] sm:$0xff] %v670_v36  ;;  %v565_v39 = vpop.f32.mrf.mxu0  ;;  %v589_v40 = vpop.f32.mrf.mxu1 }
 0x141   : > { %v647_v41 = vadd.f32 %v565_v39, %v454_v37  ;;  %v655_v42 = vadd.f32 %v589_v40, %v462_v38 }
 0x143   : > { %679 = vst [vmem:[#allocation2 + $0x48] sm:$0xff] %v647_v41 }
 0x144   : > { %687 = vst [vmem:[#allocation2 + $0x78] sm:$0xff] %v655_v42  ;;  %v613_v45 = vpop.f32.mrf.mxu2  ;;  %v637_v46 = vpop.f32.mrf.mxu3  ;;  %707 = sbr.rel (%p940_p13) target bundleno = 364 (0x16c), region = 78 }
 0x145   : > { %v663_v47 = vadd.f32 %v613_v45, %v470_v43  ;;  %v671_v48 = vadd.f32 %v637_v46, %v478_v44 }
 0x147   : > { %695 = vst [vmem:[#allocation2 + $0xc0] sm:$0xff] %v663_v47 }
 0x148   : > { %703 = vst [vmem:[#allocation2 + $0x98] sm:$0xff] %v671_v48 }
 0x149   : > { %v708_v49 = vld [vmem:[#allocation2 + $0xb0] sm:$0xff]  ;;  %v1325_v50 = vld [vmem:[%s1414_s2] ss:$0 sm:$0xff]  ;;  %v710_v52 = vld [vmem:[#allocation2 + $0xd8] sm:$0xff] }
 0x14a   : > { %v709_v51 = vld [vmem:[#allocation2] sm:$0xff]  ;;  %v711_v53 = vld [vmem:[#allocation2 + $0x18] sm:$0xff]  ;;  %v744_v54 = vadd.f32 %v1325_v50, %v708_v49  ;;  %v746_v56 = vadd.f32 %v1325_v50, %v710_v52  ;;  %v712_v57 = vld [vmem:[#allocation2 + $0x50] sm:$0xff] }
 0x14b   : > { %v745_v55 = vadd.f32 %v1325_v50, %v709_v51  ;;  %v713_v58 = vld [vmem:[#allocation2 + $0x68] sm:$0xff]  ;;  %v747_v59 = vadd.f32 %v1325_v50, %v711_v53  ;;  %v714_v60 = vld [vmem:[#allocation2 + $0x30] sm:$0xff]  ;;  %v748_v61 = vadd.f32 %v1325_v50, %v712_v57  ;;  %v716_v0 = vld [vmem:[#allocation2 + $0x80] sm:$0xff] }
 0x14c   : > { %776 = vst [vmem:[%s1268_s29] sm:$0xff] %v744_v54  ;;  %v715_v62 = vld [vmem:[#allocation2 + $0x48] sm:$0xff]  ;;  %v749_v63 = vadd.f32 %v1325_v50, %v713_v58  ;;  %v750_v1 = vadd.f32 %v1325_v50, %v714_v60  ;;  %v752_v5 = vadd.f32 %v1325_v50, %v716_v0  ;;  %v719_v6 = vld [vmem:[#allocation2 + $0xb8] sm:$0xff]  ;;  %v720_v8 = vld [vmem:[#allocation2 + $0x60] sm:$0xff] }
 0x14d   : > { %777 = vst [vmem:[%s1268_s29 + $0x8] sm:$0xff] %v745_v55  ;;  %v717_v2 = vld [vmem:[#allocation2 + $0x88] sm:$0xff]  ;;  %v751_v3 = vadd.f32 %v1325_v50, %v715_v62  ;;  %v721_v10 = vld [vmem:[#allocation2 + $0xf0] sm:$0xff]  ;;  %v755_v11 = vadd.f32 %v1325_v50, %v719_v6  ;;  %v756_v13 = vadd.f32 %v1325_v50, %v720_v8  ;;  %v723_v14 = vld [vmem:[#allocation2 + $0x78] sm:$0xff] }
 0x14e   : > { %778 = vst [vmem:[%s1268_s29 + $0x10] sm:$0xff] %v746_v56  ;;  %v718_v4 = vld [vmem:[#allocation2 + $0xe8] sm:$0xff]  ;;  %v753_v7 = vadd.f32 %v1325_v50, %v717_v2  ;;  %v757_v15 = vadd.f32 %v1325_v50, %v721_v10  ;;  %v724_v16 = vld [vmem:[#allocation2 + $0x38] sm:$0xff]  ;;  %v759_v19 = vadd.f32 %v1325_v50, %v723_v14  ;;  %v726_v20 = vld [vmem:[#allocation2 + $0x40] sm:$0xff] }
 0x14f   : > { %779 = vst [vmem:[%s1268_s29 + $0x18] sm:$0xff] %v747_v59  ;;  %v754_v9 = vadd.f32 %v1325_v50, %v718_v4  ;;  %v722_v12 = vld [vmem:[#allocation2 + $0x8] sm:$0xff]  ;;  %v725_v18 = vld [vmem:[#allocation2 + $0x58] sm:$0xff]  ;;  %v760_v21 = vadd.f32 %v1325_v50, %v724_v16  ;;  %v728_v24 = vld [vmem:[#allocation2 + $0xe0] sm:$0xff]  ;;  %v762_v25 = vadd.f32 %v1325_v50, %v726_v20 }
 0x150   : > { %780 = vst [vmem:[%s1268_s29 + $0x20] sm:$0xff] %v748_v61  ;;  %v758_v17 = vadd.f32 %v1325_v50, %v722_v12  ;;  %v727_v22 = vld [vmem:[#allocation2 + $0xc8] sm:$0xff]  ;;  %v761_v23 = vadd.f32 %v1325_v50, %v725_v18  ;;  %v729_v26 = vld [vmem:[#allocation2 + $0x90] sm:$0xff]  ;;  %v764_v29 = vadd.f32 %v1325_v50, %v728_v24  ;;  %v731_v30 = vld [vmem:[#allocation2 + $0xc0] sm:$0xff] }
 0x151   : > { %781 = vst [vmem:[%s1268_s29 + $0x28] sm:$0xff] %v749_v63  ;;  %v763_v27 = vadd.f32 %v1325_v50, %v727_v22  ;;  %v730_v28 = vld [vmem:[#allocation2 + $0x70] sm:$0xff]  ;;  %v765_v31 = vadd.f32 %v1325_v50, %v729_v26  ;;  %v732_v32 = vld [vmem:[#allocation2 + $0xa8] sm:$0xff]  ;;  %v767_v35 = vadd.f32 %v1325_v50, %v731_v30  ;;  %v736_v40 = vld [vmem:[#allocation2 + $0xa0] sm:$0xff] }
 0x152   : > { %782 = vst [vmem:[%s1268_s29 + $0x30] sm:$0xff] %v750_v1  ;;  %v766_v33 = vadd.f32 %v1325_v50, %v730_v28  ;;  %v733_v34 = vld [vmem:[#allocation2 + $0xd0] sm:$0xff]  ;;  %v768_v37 = vadd.f32 %v1325_v50, %v732_v32  ;;  %v735_v38 = vld [vmem:[#allocation2 + $0x28] sm:$0xff]  ;;  %v737_v42 = vld [vmem:[#allocation2 + $0xf8] sm:$0xff]  ;;  %v772_v45 = vadd.f32 %v1325_v50, %v736_v40 }
 0x153   : > { %783 = vst [vmem:[%s1268_s29 + $0x38] sm:$0xff] %v751_v3  ;;  %v734_v36 = vld [vmem:[#allocation2 + $0x10] sm:$0xff]  ;;  %v769_v39 = vadd.f32 %v1325_v50, %v733_v34  ;;  %v771_v43 = vadd.f32 %v1325_v50, %v735_v38  ;;  %v738_v44 = vld [vmem:[#allocation2 + $0x20] sm:$0xff]  ;;  %v739_v46 = vld [vmem:[#allocation2 + $0x98] sm:$0xff]  ;;  %v773_v47 = vadd.f32 %v1325_v50, %v737_v42 }
 0x154   : > { %784 = vst [vmem:[%s1268_s29 + $0x40] sm:$0xff] %v752_v5  ;;  %v770_v41 = vadd.f32 %v1325_v50, %v734_v36  ;;  %v774_v48 = vadd.f32 %v1325_v50, %v738_v44  ;;  %v775_v49 = vadd.f32 %v1325_v50, %v739_v46 }
 0x155   : > { %785 = vst [vmem:[%s1268_s29 + $0x48] sm:$0xff] %v753_v7 }
 0x156   : > { %786 = vst [vmem:[%s1268_s29 + $0x50] sm:$0xff] %v754_v9 }
 0x157   : > { %787 = vst [vmem:[%s1268_s29 + $0x58] sm:$0xff] %v755_v11 }
 0x158   : > { %788 = vst [vmem:[%s1268_s29 + $0x60] sm:$0xff] %v756_v13 }
 0x159   : > { %789 = vst [vmem:[%s1268_s29 + $0x68] sm:$0xff] %v757_v15 }
 0x15a   : > { %790 = vst [vmem:[%s1268_s29 + $0x70] sm:$0xff] %v758_v17 }
 0x15b   : > { %791 = vst [vmem:[%s1268_s29 + $0x78] sm:$0xff] %v759_v19 }
 0x15c   : > { %792 = vst [vmem:[%s1268_s29 + $0x80] sm:$0xff] %v760_v21 }
 0x15d   : > { %793 = vst [vmem:[%s1268_s29 + $0x88] sm:$0xff] %v761_v23 }
 0x15e   : > { %794 = vst [vmem:[%s1268_s29 + $0x90] sm:$0xff] %v762_v25 }
 0x15f   : > { %795 = vst [vmem:[%s1268_s29 + $0x98] sm:$0xff] %v763_v27 }
 0x160   : > { %796 = vst [vmem:[%s1268_s29 + $0xa0] sm:$0xff] %v764_v29 }
 0x161   : > { %797 = vst [vmem:[%s1268_s29 + $0xa8] sm:$0xff] %v765_v31 }
 0x162   : > { %798 = vst [vmem:[%s1268_s29 + $0xb0] sm:$0xff] %v766_v33 }
 0x163   : > { %799 = vst [vmem:[%s1268_s29 + $0xb8] sm:$0xff] %v767_v35 }
 0x164   : > { %800 = vst [vmem:[%s1268_s29 + $0xc0] sm:$0xff] %v768_v37 }
 0x165   : > { %801 = vst [vmem:[%s1268_s29 + $0xc8] sm:$0xff] %v769_v39 }
 0x166   : > { %802 = vst [vmem:[%s1268_s29 + $0xd0] sm:$0xff] %v770_v41 }
 0x167   : > { %803 = vst [vmem:[%s1268_s29 + $0xd8] sm:$0xff] %v771_v43 }
 0x168   : > { %804 = vst [vmem:[%s1268_s29 + $0xe0] sm:$0xff] %v772_v45 }
 0x169   : > { %805 = vst [vmem:[%s1268_s29 + $0xe8] sm:$0xff] %v773_v47 }
 0x16a   : > { %806 = vst [vmem:[%s1268_s29 + $0xf0] sm:$0xff] %v774_v48 }
 0x16b   : > { %807 = vst [vmem:[%s1268_s29 + $0xf8] sm:$0xff] %v775_v49 }
 0x16c PF: > { %s13_s18 = sadd.s32 1, %s1104_s18   ;;  %s1416_s12 = smov %s1084_s13 }
 0x16d   : > { %p10_p0 = scmp.ge.s32.totalorder %s13_s18, 28   ;;  %s1417_s13 = smov %s1178_s25 }
 0x16e   : > { %s1418_s14 = smov %s1096_s16  ;;  %s1419_s15 = smov %s1100_s17 }
 0x16f   : > { %s1420_s16 = smov %s1423_s19  ;;  %s1421_s17 = smov %s1427_s20 }
 0x170   :  { %12 = sbr.rel (!%p10_p0) target bundleno = 4 (0x4), region = 119 }

// kernel: dis_content_forward.11
= control target key start
LH: loop header
LB: loop body
LE: loop exit
PB: predicated region body
PF: predicated region fallthrough
CT: control target
= control target key end

     0   :  { %s510_s6 = smov 0   ;;  %s898_s0 = inlined_call_operand.vmem [shape: f32[2,169,32], index: 0, kind: input, shape index: {}]   ;;  %s899_s1 = inlined_call_operand.vmem [shape: f32[2,169,32], index: 1, kind: output, shape index: {}]  }
   0x1 LB: > { %s468_s7 = sadd.s32 4294967295, %s497_s6   ;;  %p472_p0 = scmp.ge.s32.totalorder %s497_s6, 1  ;;  %s497_s6 = sphi %s510_s6, %s11_s6  }
   0x2   : > { %p87_p1 = scmp.lt.s32.totalorder %s497_s6, 3 }
   0x4   : > { %p88_p2 = pnand %p472_p0, %p87_p1 }
   0x5   : > { %p107_p3 = scmp.lt.s32.totalorder (!%p88_p2), %s468_s7, 1 }
   0x6   : > { %91 = sbr.rel (%p88_p2) target bundleno = 181 (0xb5), region = 24 }
   0xb   : > { %s901_s7 = smov (!%p107_p3, %s468_s7), 1  ;;  %vm139_vm0 = vcmask 261120   ;;  %v499_v49 = vmov 169.0   ;;  %vm181_vm1 = vcmask 253952  }
   0xc   : > { %s477_s8 = smul.u32 176, %s901_s7  ;;  %487 = vrcp.f32 %v499_v49 }
   0xe   : > { %s526_s11 = scalar_lea.vmem %s898_s0, %s477_s8  ;;  %s821_s14 = scalar_lea.vmem %s899_s1, %s477_s8 }
   0xf   : > { %v529_v0 = vld [vmem:[%s526_s11] sm:$0xff]  ;;  %v532_v1 = vld [vmem:[%s526_s11 + $0x8] sm:$0xff]  ;;  %v535_v2 = vld [vmem:[%s526_s11 + $0x10] sm:$0xff] }
  0x10   : > { %v538_v3 = vld [vmem:[%s526_s11 + $0x18] sm:$0xff]  ;;  %v140_v4 = vsel %vm139_vm0, %v529_v0, 0.0  ;;  %v141_v5 = vsel %vm139_vm0, %v532_v1, 0.0  ;;  %v143_v6 = vsel %vm139_vm0, %v535_v2, 0.0  ;;  %v547_v7 = vld [vmem:[%s526_s11 + $0x20] sm:$0xff]  ;;  %v552_v10 = vld [vmem:[%s526_s11 + $0x28] sm:$0xff] }
  0x11   : > { %v142_v8 = vadd.f32 %v141_v5, %v140_v4  ;;  %v145_v9 = vsel %vm139_vm0, %v538_v3, 0.0  ;;  %v147_v12 = vsel %vm139_vm0, %v547_v7, 0.0  ;;  %v557_v13 = vld [vmem:[%s526_s11 + $0x30] sm:$0xff]  ;;  %v149_v15 = vsel %vm139_vm0, %v552_v10, 0.0  ;;  %v562_v16 = vld [vmem:[%s526_s11 + $0x38] sm:$0xff]  ;;  %v567_v19 = vld [vmem:[%s526_s11 + $0x40] sm:$0xff] }
  0x12   : > { %v151_v18 = vsel %vm139_vm0, %v557_v13, 0.0  ;;  %v153_v21 = vsel %vm139_vm0, %v562_v16, 0.0  ;;  %v572_v22 = vld [vmem:[%s526_s11 + $0x48] sm:$0xff]  ;;  %v155_v24 = vsel %vm139_vm0, %v567_v19, 0.0  ;;  %v577_v25 = vld [vmem:[%s526_s11 + $0x50] sm:$0xff]  ;;  %v582_v28 = vld [vmem:[%s526_s11 + $0x58] sm:$0xff]  ;;  %v488_v58 = vpop.eup %487 }
  0x13   : > { %v144_v11 = vadd.f32 %v143_v6, %v142_v8  ;;  %v157_v27 = vsel %vm139_vm0, %v572_v22, 0.0  ;;  %v159_v30 = vsel %vm139_vm0, %v577_v25, 0.0  ;;  %v587_v31 = vld [vmem:[%s526_s11 + $0x60] sm:$0xff]  ;;  %v161_v33 = vsel %vm139_vm0, %v582_v28, 0.0  ;;  %v592_v34 = vld [vmem:[%s526_s11 + $0x68] sm:$0xff]  ;;  %v597_v37 = vld [vmem:[%s526_s11 + $0x70] sm:$0xff] }
  0x14   : > { %v163_v36 = vsel %vm139_vm0, %v587_v31, 0.0  ;;  %v165_v39 = vsel %vm139_vm0, %v592_v34, 0.0  ;;  %v602_v40 = vld [vmem:[%s526_s11 + $0x78] sm:$0xff]  ;;  %v167_v42 = vsel %vm139_vm0, %v597_v37, 0.0  ;;  %v607_v43 = vld [vmem:[%s526_s11 + $0x80] sm:$0xff]  ;;  %v612_v46 = vld [vmem:[%s526_s11 + $0x88] sm:$0xff]  ;;  %vm195_vm2 = vweird.f32 %v488_v58 }
  0x15   : > { %v146_v14 = vadd.f32 %v145_v9, %v144_v11  ;;  %v169_v45 = vsel %vm139_vm0, %v602_v40, 0.0  ;;  %v171_v48 = vsel %vm139_vm0, %v607_v43, 0.0  ;;  %v617_v50 = vld [vmem:[%s526_s11 + $0x90] sm:$0xff]  ;;  %v173_v52 = vsel %vm139_vm0, %v612_v46, 0.0  ;;  %v622_v53 = vld [vmem:[%s526_s11 + $0x98] sm:$0xff]  ;;  %v627_v56 = vld [vmem:[%s526_s11 + $0xa0] sm:$0xff] }
  0x16   : > { %v175_v55 = vsel %vm139_vm0, %v617_v50, 0.0  ;;  %v177_v59 = vsel %vm139_vm0, %v622_v53, 0.0  ;;  %v632_v60 = vld [vmem:[%s526_s11 + $0xa8] sm:$0x1]  ;;  %v179_v62 = vsel %vm139_vm0, %v627_v56, 0.0  ;;  %v191_v4 = vmul.f32 169.0, %v488_v58 }
  0x17   : > { %v148_v17 = vadd.f32 %v147_v12, %v146_v14  ;;  %v182_v5 = vsel %vm181_vm1, %v632_v60, 0.0 }
  0x18   : > { %v192_v9 = vsub.f32 1.0, %v191_v4 }
  0x19   : > { %v150_v20 = vadd.f32 %v149_v15, %v148_v17 }
  0x1a   : > { %v193_v14 = vmul.f32 %v488_v58, %v192_v9 }
  0x1b   : > { %v152_v23 = vadd.f32 %v151_v18, %v150_v20 }
  0x1c   : > { %v194_v18 = vadd.f32 %v488_v58, %v193_v14 }
  0x1d   : > { %v154_v26 = vadd.f32 %v153_v21, %v152_v23 }
  0x1e   : > { %v638_v23 = vsel %vm195_vm2, %v488_v58, %v194_v18 }
  0x1f   : > { %v156_v29 = vadd.f32 %v155_v24, %v154_v26 }
  0x21   : > { %v158_v32 = vadd.f32 %v157_v27, %v156_v29 }
  0x23   : > { %v160_v35 = vadd.f32 %v159_v30, %v158_v32 }
  0x25   : > { %v162_v38 = vadd.f32 %v161_v33, %v160_v35 }
  0x27   : > { %v164_v41 = vadd.f32 %v163_v36, %v162_v38 }
  0x29   : > { %v166_v44 = vadd.f32 %v165_v39, %v164_v41 }
  0x2b   : > { %v168_v47 = vadd.f32 %v167_v42, %v166_v44 }
  0x2d   : > { %v170_v51 = vadd.f32 %v169_v45, %v168_v47 }
  0x2f   : > { %v172_v54 = vadd.f32 %v171_v48, %v170_v51 }
  0x31   : > { %v174_v57 = vadd.f32 %v173_v52, %v172_v54 }
  0x33   : > { %v176_v61 = vadd.f32 %v175_v55, %v174_v57 }
  0x35   : > { %v178_v63 = vadd.f32 %v177_v59, %v176_v61 }
  0x37   : > { %v180_v6 = vadd.f32 %v179_v62, %v178_v63 }
  0x39   : > { %v183_v8 = vadd.f32 %v182_v5, %v180_v6 }
  0x3b   : > { %v184_v11 = vrot.slane %v183_v8, 4 }
  0x3d   : > { %v185_v12 = vadd.f32 %v184_v11, %v183_v8 }
  0x3f   : > { %v186_v15 = vrot.slane %v185_v12, 2 }
  0x41   : > { %v187_v17 = vadd.f32 %v186_v15, %v185_v12 }
  0x43   : > { %v188_v20 = vrot.slane %v187_v17, 1 }
  0x45   : > { %v189_v21 = vadd.f32 %v188_v20, %v187_v17 }
  0x47   : > { %v641_v24 = vmul.f32 %v638_v23, %v189_v21 }
  0x49   : > { %v645_v26 = vsub.f32 %v529_v0, %v641_v24  ;;  %v649_v27 = vsub.f32 %v532_v1, %v641_v24  ;;  %v653_v29 = vsub.f32 %v535_v2, %v641_v24  ;;  %v657_v30 = vsub.f32 %v538_v3, %v641_v24 }
  0x4a   : > { %v661_v32 = vsub.f32 %v547_v7, %v641_v24  ;;  %v671_v2 = vsub.f32 %v552_v10, %v641_v24  ;;  %v677_v7 = vsub.f32 %v557_v13, %v641_v24  ;;  %v686_v10 = vsub.f32 %v562_v16, %v641_v24 }
  0x4b   : > { %v220_v0 = vmul.f32 %v645_v26, %v645_v26  ;;  %v221_v33 = vmul.f32 %v649_v27, %v649_v27  ;;  %v222_v1 = vmul.f32 %v653_v29, %v653_v29  ;;  %v223_v3 = vmul.f32 %v657_v30, %v657_v30 }
  0x4c   : > { %v224_v35 = vmul.f32 %v661_v32, %v661_v32  ;;  %v225_v42 = vmul.f32 %v671_v2, %v671_v2  ;;  %v693_v45 = vsub.f32 %v567_v19, %v641_v24  ;;  %v226_v47 = vmul.f32 %v677_v7, %v677_v7 }
  0x4d   : > { %v242_v36 = vsel %vm139_vm0, %v220_v0, 0.0  ;;  %v243_v38 = vsel %vm139_vm0, %v221_v33, 0.0  ;;  %v245_v39 = vsel %vm139_vm0, %v222_v1, 0.0  ;;  %v247_v13 = vsel %vm139_vm0, %v223_v3, 0.0 }
  0x4e   : > { %v244_v41 = vadd.f32 %v243_v38, %v242_v36  ;;  %v249_v48 = vsel %vm139_vm0, %v224_v35, 0.0  ;;  %v700_v16 = vsub.f32 %v572_v22, %v641_v24  ;;  %v227_v51 = vmul.f32 %v686_v10, %v686_v10 }
  0x4f   : > { %v251_v52 = vsel %vm139_vm0, %v225_v42, 0.0  ;;  %v707_v19 = vsub.f32 %v577_v25, %v641_v24  ;;  %v228_v55 = vmul.f32 %v693_v45, %v693_v45  ;;  %v253_v57 = vsel %vm139_vm0, %v226_v47, 0.0 }
  0x50   : > { %v246_v44 = vadd.f32 %v245_v39, %v244_v41  ;;  %v714_v22 = vsub.f32 %v582_v28, %v641_v24  ;;  %v229_v59 = vmul.f32 %v700_v16, %v700_v16  ;;  %v255_v61 = vsel %vm139_vm0, %v227_v51, 0.0 }
  0x51   : > { %v721_v25 = vsub.f32 %v587_v31, %v641_v24  ;;  %v230_v63 = vmul.f32 %v707_v19, %v707_v19  ;;  %v257_v4 = vsel %vm139_vm0, %v228_v55, 0.0  ;;  %v728_v28 = vsub.f32 %v592_v34, %v641_v24 }
  0x52   : > { %v248_v49 = vadd.f32 %v247_v13, %v246_v44  ;;  %v231_v6 = vmul.f32 %v714_v22, %v714_v22  ;;  %v259_v8 = vsel %vm139_vm0, %v229_v59, 0.0  ;;  %v735_v31 = vsub.f32 %v597_v37, %v641_v24 }
  0x53   : > { %v232_v11 = vmul.f32 %v721_v25, %v721_v25  ;;  %v261_v12 = vsel %vm139_vm0, %v230_v63, 0.0  ;;  %v742_v34 = vsub.f32 %v602_v40, %v641_v24  ;;  %v233_v15 = vmul.f32 %v728_v28, %v728_v28 }
  0x54   : > { %v250_v54 = vadd.f32 %v249_v48, %v248_v49  ;;  %v263_v17 = vsel %vm139_vm0, %v231_v6, 0.0  ;;  %v749_v37 = vsub.f32 %v607_v43, %v641_v24  ;;  %v234_v20 = vmul.f32 %v735_v31, %v735_v31 }
  0x55   : > { %v265_v21 = vsel %vm139_vm0, %v232_v11, 0.0  ;;  %v756_v40 = vsub.f32 %v612_v46, %v641_v24  ;;  %v235_v33 = vmul.f32 %v742_v34, %v742_v34  ;;  %v267_v1 = vsel %vm139_vm0, %v233_v15, 0.0 }
  0x56   : > { %v252_v58 = vadd.f32 %v251_v52, %v250_v54  ;;  %v763_v43 = vsub.f32 %v617_v50, %v641_v24  ;;  %v236_v35 = vmul.f32 %v749_v37, %v749_v37  ;;  %v269_v36 = vsel %vm139_vm0, %v234_v20, 0.0 }
  0x57   : > { %v770_v46 = vsub.f32 %v622_v53, %v641_v24  ;;  %v237_v39 = vmul.f32 %v756_v40, %v756_v40  ;;  %v271_v41 = vsel %vm139_vm0, %v235_v33, 0.0  ;;  %v777_v50 = vsub.f32 %v627_v56, %v641_v24 }
  0x58   : > { %v254_v62 = vadd.f32 %v253_v57, %v252_v58  ;;  %v238_v13 = vmul.f32 %v763_v43, %v763_v43  ;;  %v273_v44 = vsel %vm139_vm0, %v236_v35, 0.0  ;;  %v784_v53 = vsub.f32 %v632_v60, %v641_v24 }
  0x59   : > { %v239_v48 = vmul.f32 %v770_v46, %v770_v46  ;;  %v275_v49 = vsel %vm139_vm0, %v237_v39, 0.0  ;;  %v240_v56 = vmul.f32 %v777_v50, %v777_v50 }
  0x5a   : > { %v256_v5 = vadd.f32 %v255_v61, %v254_v62  ;;  %v277_v52 = vsel %vm139_vm0, %v238_v13, 0.0  ;;  %v241_v55 = vmul.f32 %v784_v53, %v784_v53 }
  0x5b   : > { %v279_v57 = vsel %vm139_vm0, %v239_v48, 0.0  ;;  %v281_v60 = vsel %vm139_vm0, %v240_v56, 0.0 }
  0x5c   : > { %v258_v9 = vadd.f32 %v257_v4, %v256_v5  ;;  %v283_v59 = vsel %vm181_vm1, %v241_v55, 0.0 }
  0x5e   : > { %v260_v14 = vadd.f32 %v259_v8, %v258_v9 }
  0x60   : > { %v262_v18 = vadd.f32 %v261_v12, %v260_v14 }
  0x62   : > { %v264_v0 = vadd.f32 %v263_v17, %v262_v18 }
  0x64   : > { %v266_v3 = vadd.f32 %v265_v21, %v264_v0 }
  0x66   : > { %v268_v38 = vadd.f32 %v267_v1, %v266_v3 }
  0x68   : > { %v270_v42 = vadd.f32 %v269_v36, %v268_v38 }
  0x6a   : > { %v272_v47 = vadd.f32 %v271_v41, %v270_v42 }
  0x6c   : > { %v274_v51 = vadd.f32 %v273_v44, %v272_v47 }
  0x6e   : > { %v276_v54 = vadd.f32 %v275_v49, %v274_v51 }
  0x70   : > { %v278_v58 = vadd.f32 %v277_v52, %v276_v54 }
  0x72   : > { %v280_v24 = vadd.f32 %v279_v57, %v278_v58 }
  0x74   : > { %v282_v61 = vadd.f32 %v281_v60, %v280_v24 }
  0x76   : > { %v284_v62 = vadd.f32 %v283_v59, %v282_v61 }
  0x78   : > { %v285_v63 = vrot.slane %v284_v62, 4 }
  0x7a   : > { %v286_v4 = vadd.f32 %v285_v63, %v284_v62 }
  0x7c   : > { %v287_v5 = vrot.slane %v286_v4, 2 }
  0x7e   : > { %v288_v6 = vadd.f32 %v287_v5, %v286_v4 }
  0x80   : > { %v289_v8 = vrot.slane %v288_v6, 1 }
  0x82   : > { %v290_v9 = vadd.f32 %v289_v8, %v288_v6 }
  0x84   : > { %v291_v11 = vmul.f32 %v290_v9, %v638_v23 }
  0x86   : > { %v292_v12 = vadd.f32 1e-05, %v291_v11 }
  0x88   : > { %489 = vrsqrt.f32 %v292_v12  ;;  %vm299_vm3 = vweird.f32 %v292_v12 }
  0x8e   : > { %v490_v14 = vpop.eup %489 }
  0x8f   : > { %v294_v15 = vmul.f32 %v490_v14, %v292_v12  ;;  %vm300_vm4 = vweird.f32 %v490_v14 }
  0x90   : > { %vm301_vm5 = vmor %vm299_vm3, %vm300_vm4 }
  0x91   : > { %v295_v17 = vmul.f32 %v490_v14, %v294_v15 }
  0x93   : > { %v296_v18 = vmul.f32 0.5, %v295_v17 }
  0x95   : > { %v297_v20 = vsub.f32 1.5, %v296_v18 }
  0x97   : > { %v298_v21 = vmul.f32 %v490_v14, %v297_v20 }
  0x99   : > { %v798_v0 = vsel %vm301_vm5, %v490_v14, %v298_v21 }
  0x9a   : > { %v303_v33 = vmul.f32 %v798_v0, %v645_v26  ;;  %v304_v23 = vmul.f32 %v798_v0, %v649_v27  ;;  %v305_v1 = vmul.f32 %v798_v0, %v653_v29  ;;  %v306_v3 = vmul.f32 %v798_v0, %v657_v30 }
  0x9b   : > { %v307_v35 = vmul.f32 %v798_v0, %v661_v32  ;;  %v308_v36 = vmul.f32 %v798_v0, %v671_v2  ;;  %v309_v38 = vmul.f32 %v798_v0, %v677_v7  ;;  %v310_v26 = vmul.f32 %v798_v0, %v686_v10 }
  0x9c   : > { %vm325_vm6 = vcmp.ge.f32.partialorder %v303_v33, 0.0  ;;  %v347_v27 = vmul.f32 0.01, %v303_v33  ;;  %vm326_vm7 = vcmp.ge.f32.partialorder %v304_v23, 0.0  ;;  %v348_v29 = vmul.f32 0.01, %v304_v23 }
  0x9d   : > { %vm327_vm8 = vcmp.ge.f32.partialorder %v305_v1, 0.0  ;;  %v349_v30 = vmul.f32 0.01, %v305_v1  ;;  %vm328_vm9 = vcmp.ge.f32.partialorder %v306_v3, 0.0  ;;  %v350_v32 = vmul.f32 0.01, %v306_v3 }
  0x9e   : > { %v369_v2 = vsel %vm325_vm6, %v303_v33, %v347_v27  ;;  %v370_v7 = vsel %vm326_vm7, %v304_v23, %v348_v29  ;;  %vm329_vm10 = vcmp.ge.f32.partialorder %v307_v35, 0.0  ;;  %v351_v10 = vmul.f32 0.01, %v307_v35 }
  0x9f   : > { %391 = vst.msk [vmem:[%s821_s14] sm:$0xff] %vm139_vm0, %v369_v2  ;;  %v371_v39 = vsel %vm327_vm8, %v305_v1, %v349_v30  ;;  %v372_v41 = vsel %vm328_vm9, %v306_v3, %v350_v32  ;;  %vm330_vm11 = vcmp.ge.f32.partialorder %v308_v36, 0.0  ;;  %v352_v42 = vmul.f32 0.01, %v308_v36 }
  0xa0   : > { %392 = vst.msk [vmem:[%s821_s14 + $0x8] sm:$0xff] %vm139_vm0, %v370_v7  ;;  %v373_v13 = vsel %vm329_vm10, %v307_v35, %v351_v10  ;;  %vm331_vm12 = vcmp.ge.f32.partialorder %v309_v38, 0.0  ;;  %v353_v44 = vmul.f32 0.01, %v309_v38  ;;  %vm332_vm13 = vcmp.ge.f32.partialorder %v310_v26, 0.0 }
  0xa1   : > { %393 = vst.msk [vmem:[%s821_s14 + $0x10] sm:$0xff] %vm139_vm0, %v371_v39  ;;  %v374_v47 = vsel %vm330_vm11, %v308_v36, %v352_v42  ;;  %v354_v48 = vmul.f32 0.01, %v310_v26  ;;  %v311_v49 = vmul.f32 %v798_v0, %v693_v45  ;;  %v312_v51 = vmul.f32 %v798_v0, %v700_v16 }
  0xa2   : > { %394 = vst.msk [vmem:[%s821_s14 + $0x18] sm:$0xff] %vm139_vm0, %v372_v41  ;;  %v375_v56 = vsel %vm331_vm12, %v309_v38, %v353_v44  ;;  %v313_v52 = vmul.f32 %v798_v0, %v707_v19  ;;  %v314_v54 = vmul.f32 %v798_v0, %v714_v22  ;;  %v315_v55 = vmul.f32 %v798_v0, %v721_v25 }
  0xa3   : > { %395 = vst.msk [vmem:[%s821_s14 + $0x20] sm:$0xff] %vm139_vm0, %v373_v13  ;;  %v376_v45 = vsel %vm332_vm13, %v310_v26, %v354_v48  ;;  %vm333_vm14 = vcmp.ge.f32.partialorder %v311_v49, 0.0  ;;  %v355_v57 = vmul.f32 0.01, %v311_v49  ;;  %vm334_vm15 = vcmp.ge.f32.partialorder %v312_v51, 0.0 }
  0xa4   : > { %396 = vst.msk [vmem:[%s821_s14 + $0x28] sm:$0xff] %vm139_vm0, %v374_v47  ;;  %v356_v16 = vmul.f32 0.01, %v312_v51  ;;  %vm335_vm2 = vcmp.ge.f32.partialorder %v313_v52, 0.0  ;;  %v357_v58 = vmul.f32 0.01, %v313_v52  ;;  %v316_v19 = vmul.f32 %v798_v0, %v728_v28 }
  0xa5   : > { %397 = vst.msk [vmem:[%s821_s14 + $0x30] sm:$0xff] %vm139_vm0, %v375_v56  ;;  %v377_v22 = vsel %vm333_vm14, %v311_v49, %v355_v57  ;;  %vm336_vm3 = vcmp.ge.f32.partialorder %v314_v54, 0.0  ;;  %v358_v25 = vmul.f32 0.01, %v314_v54  ;;  %vm337_vm4 = vcmp.ge.f32.partialorder %v315_v55, 0.0 }
  0xa6   : > { %398 = vst.msk [vmem:[%s821_s14 + $0x38] sm:$0xff] %vm139_vm0, %v376_v45  ;;  %v378_v60 = vsel %vm334_vm15, %v312_v51, %v356_v16  ;;  %v379_v24 = vsel %vm335_vm2, %v313_v52, %v357_v58  ;;  %v359_v59 = vmul.f32 0.01, %v315_v55  ;;  %vm338_vm5 = vcmp.ge.f32.partialorder %v316_v19, 0.0 }
  0xa7   : > { %399 = vst.msk [vmem:[%s821_s14 + $0x40] sm:$0xff] %vm139_vm0, %v377_v22  ;;  %v380_v61 = vsel %vm336_vm3, %v314_v54, %v358_v25  ;;  %v360_v62 = vmul.f32 0.01, %v316_v19  ;;  %v317_v28 = vmul.f32 %v798_v0, %v735_v31  ;;  %v318_v63 = vmul.f32 %v798_v0, %v742_v34 }
  0xa8   : > { %400 = vst.msk [vmem:[%s821_s14 + $0x48] sm:$0xff] %vm139_vm0, %v378_v60  ;;  %v381_v4 = vsel %vm337_vm4, %v315_v55, %v359_v59  ;;  %v319_v5 = vmul.f32 %v798_v0, %v749_v37  ;;  %v320_v6 = vmul.f32 %v798_v0, %v756_v40  ;;  %v321_v8 = vmul.f32 %v798_v0, %v763_v43 }
  0xa9   : > { %401 = vst.msk [vmem:[%s821_s14 + $0x50] sm:$0xff] %vm139_vm0, %v379_v24  ;;  %v382_v31 = vsel %vm338_vm5, %v316_v19, %v360_v62  ;;  %vm339_vm6 = vcmp.ge.f32.partialorder %v317_v28, 0.0  ;;  %v361_v9 = vmul.f32 0.01, %v317_v28  ;;  %vm340_vm7 = vcmp.ge.f32.partialorder %v318_v63, 0.0 }
  0xaa   : > { %402 = vst.msk [vmem:[%s821_s14 + $0x58] sm:$0xff] %vm139_vm0, %v380_v61  ;;  %v362_v34 = vmul.f32 0.01, %v318_v63  ;;  %vm341_vm8 = vcmp.ge.f32.partialorder %v319_v5, 0.0  ;;  %v363_v11 = vmul.f32 0.01, %v319_v5  ;;  %v322_v37 = vmul.f32 %v798_v0, %v770_v46 }
  0xab   : > { %403 = vst.msk [vmem:[%s821_s14 + $0x60] sm:$0xff] %vm139_vm0, %v381_v4  ;;  %v383_v40 = vsel %vm339_vm6, %v317_v28, %v361_v9  ;;  %vm342_vm9 = vcmp.ge.f32.partialorder %v320_v6, 0.0  ;;  %v364_v43 = vmul.f32 0.01, %v320_v6  ;;  %vm343_vm10 = vcmp.ge.f32.partialorder %v321_v8, 0.0 }
  0xac   : > { %404 = vst.msk [vmem:[%s821_s14 + $0x68] sm:$0xff] %vm139_vm0, %v382_v31  ;;  %v384_v12 = vsel %vm340_vm7, %v318_v63, %v362_v34  ;;  %v385_v14 = vsel %vm341_vm8, %v319_v5, %v363_v11  ;;  %v365_v15 = vmul.f32 0.01, %v321_v8  ;;  %vm344_vm11 = vcmp.ge.f32.partialorder %v322_v37, 0.0 }
  0xad   : > { %405 = vst.msk [vmem:[%s821_s14 + $0x70] sm:$0xff] %vm139_vm0, %v383_v40  ;;  %v386_v46 = vsel %vm342_vm9, %v320_v6, %v364_v43  ;;  %v366_v17 = vmul.f32 0.01, %v322_v37  ;;  %v323_v18 = vmul.f32 %v798_v0, %v777_v50  ;;  %v324_v20 = vmul.f32 %v798_v0, %v784_v53 }
  0xae   : > { %406 = vst.msk [vmem:[%s821_s14 + $0x78] sm:$0xff] %vm139_vm0, %v384_v12  ;;  %v387_v21 = vsel %vm343_vm10, %v321_v8, %v365_v15 }
  0xaf   : > { %407 = vst.msk [vmem:[%s821_s14 + $0x80] sm:$0xff] %vm139_vm0, %v385_v14  ;;  %v388_v33 = vsel %vm344_vm11, %v322_v37, %v366_v17  ;;  %vm345_vm12 = vcmp.ge.f32.partialorder %v323_v18, 0.0  ;;  %v367_v23 = vmul.f32 0.01, %v323_v18  ;;  %vm346_vm13 = vcmp.ge.f32.partialorder %v324_v20, 0.0 }
  0xb0   : > { %408 = vst.msk [vmem:[%s821_s14 + $0x88] sm:$0xff] %vm139_vm0, %v386_v46  ;;  %v368_v1 = vmul.f32 0.01, %v324_v20 }
  0xb1   : > { %409 = vst.msk [vmem:[%s821_s14 + $0x90] sm:$0xff] %vm139_vm0, %v387_v21  ;;  %v389_v3 = vsel %vm345_vm12, %v323_v18, %v367_v23 }
  0xb2   : > { %410 = vst.msk [vmem:[%s821_s14 + $0x98] sm:$0xff] %vm139_vm0, %v388_v33  ;;  %v390_v50 = vsel %vm346_vm13, %v324_v20, %v368_v1 }
  0xb3   : > { %411 = vst.msk [vmem:[%s821_s14 + $0xa0] sm:$0xff] %vm139_vm0, %v389_v3 }
  0xb4   : > { %412 = vst.msk [vmem:[%s821_s14 + $0xa8] sm:$0x1] %vm181_vm1, %v390_v50 }
  0xb5 PF: > { %s11_s6 = sadd.s32 1, %s497_s6  }
  0xb6   : > { %p8_p4 = scmp.ge.s32.totalorder %s11_s6, 4  }
  0xb8   :  { %10 = sbr.rel (!%p8_p4) target bundleno = 1 (0x1), region = 54 }

// kernel: dis_content_forward.13
= control target key start
LH: loop header
LB: loop body
LE: loop exit
PB: predicated region body
PF: predicated region fallthrough
CT: control target
= control target key end

     0   :  { %s297_s6 = smov 0   ;;  %s333_s0 = inlined_call_operand.vmem [shape: f32[2,25,32], index: 0, kind: input, shape index: {}]   ;;  %s334_s1 = inlined_call_operand.vmem [shape: f32[2,25,32], index: 1, kind: output, shape index: {}]  }
   0x1 LB: > { %s252_s7 = sadd.s32 4294967295, %s284_s6   ;;  %p256_p0 = scmp.ge.s32.totalorder %s284_s6, 1  ;;  %s284_s6 = sphi %s297_s6, %s11_s6  }
   0x2   : > { %p87_p1 = scmp.lt.s32.totalorder %s284_s6, 3 }
   0x4   : > { %p88_p2 = pnand %p256_p0, %p87_p1 }
   0x5   : > { %p107_p3 = scmp.lt.s32.totalorder (!%p88_p2), %s252_s7, 1 }
   0x6   : > { %91 = sbr.rel (%p88_p2) target bundleno = 90 (0x5a), region = 24 }
   0xb   : > { %v286_v0 = vmov 25.0   ;;  %s336_s7 = smov (!%p107_p3, %s252_s7), 1  ;;  %vm121_vm0 = vcmask 261120   ;;  %vm127_vm1 = vcmask 253952  }
   0xc   : > { %274 = vrcp.f32 %v286_v0  ;;  %s263_s8 = sshll.u32 %s336_s7, 5 }
   0xd   : > { %s111_s11 = scalar_lea.vmem %s333_s0, %s263_s8  ;;  %s116_s14 = scalar_lea.vmem %s334_s1, %s263_s8 }
   0xe   : > { %v117_v1 = vld [vmem:[%s111_s11] sm:$0xff]  ;;  %v118_v2 = vld [vmem:[%s111_s11 + $0x8] sm:$0xff]  ;;  %v119_v3 = vld [vmem:[%s111_s11 + $0x10] sm:$0xff] }
   0xf   : > { %v120_v5 = vld [vmem:[%s111_s11 + $0x18] sm:$0x1]  ;;  %v122_v6 = vsel %vm121_vm0, %v117_v1, 0.0  ;;  %v123_v7 = vsel %vm121_vm0, %v118_v2, 0.0  ;;  %v125_v8 = vsel %vm121_vm0, %v119_v3, 0.0 }
  0x10   : > { %v124_v9 = vadd.f32 %v123_v7, %v122_v6  ;;  %v128_v11 = vsel %vm127_vm1, %v120_v5, 0.0 }
  0x12   : > { %v275_v4 = vpop.eup %274  ;;  %v126_v12 = vadd.f32 %v125_v8, %v124_v9 }
  0x13   : > { %v137_v10 = vmul.f32 25.0, %v275_v4  ;;  %vm141_vm2 = vweird.f32 %v275_v4 }
  0x14   : > { %v129_v14 = vadd.f32 %v128_v11, %v126_v12 }
  0x15   : > { %v138_v13 = vsub.f32 1.0, %v137_v10 }
  0x16   : > { %v130_v15 = vrot.slane %v129_v14, 4 }
  0x17   : > { %v139_v16 = vmul.f32 %v275_v4, %v138_v13 }
  0x18   : > { %v131_v17 = vadd.f32 %v130_v15, %v129_v14 }
  0x19   : > { %v140_v19 = vadd.f32 %v275_v4, %v139_v16 }
  0x1a   : > { %v132_v18 = vrot.slane %v131_v17, 2 }
  0x1b   : > { %v142_v22 = vsel %vm141_vm2, %v275_v4, %v140_v19 }
  0x1c   : > { %v133_v20 = vadd.f32 %v132_v18, %v131_v17 }
  0x1e   : > { %v134_v21 = vrot.slane %v133_v20, 1 }
  0x20   : > { %v135_v23 = vadd.f32 %v134_v21, %v133_v20 }
  0x22   : > { %v143_v24 = vmul.f32 %v142_v22, %v135_v23 }
  0x24   : > { %v144_v25 = vsub.f32 %v117_v1, %v143_v24  ;;  %v145_v26 = vsub.f32 %v118_v2, %v143_v24  ;;  %v146_v27 = vsub.f32 %v119_v3, %v143_v24  ;;  %v147_v28 = vsub.f32 %v120_v5, %v143_v24 }
  0x26   : > { %v148_v29 = vmul.f32 %v144_v25, %v144_v25  ;;  %v149_v30 = vmul.f32 %v145_v26, %v145_v26  ;;  %v150_v31 = vmul.f32 %v146_v27, %v146_v27  ;;  %v151_v32 = vmul.f32 %v147_v28, %v147_v28 }
  0x28   : > { %v152_v33 = vsel %vm121_vm0, %v148_v29, 0.0  ;;  %v153_v34 = vsel %vm121_vm0, %v149_v30, 0.0  ;;  %v155_v35 = vsel %vm121_vm0, %v150_v31, 0.0  ;;  %v157_v37 = vsel %vm127_vm1, %v151_v32, 0.0 }
  0x29   : > { %v154_v36 = vadd.f32 %v153_v34, %v152_v33 }
  0x2b   : > { %v156_v38 = vadd.f32 %v155_v35, %v154_v36 }
  0x2d   : > { %v158_v39 = vadd.f32 %v157_v37, %v156_v38 }
  0x2f   : > { %v159_v40 = vrot.slane %v158_v39, 4 }
  0x31   : > { %v160_v41 = vadd.f32 %v159_v40, %v158_v39 }
  0x33   : > { %v161_v42 = vrot.slane %v160_v41, 2 }
  0x35   : > { %v162_v43 = vadd.f32 %v161_v42, %v160_v41 }
  0x37   : > { %v163_v44 = vrot.slane %v162_v43, 1 }
  0x39   : > { %v164_v45 = vadd.f32 %v163_v44, %v162_v43 }
  0x3b   : > { %v165_v46 = vmul.f32 %v164_v45, %v142_v22 }
  0x3d   : > { %v166_v47 = vadd.f32 1e-05, %v165_v46 }
  0x3f   : > { %276 = vrsqrt.f32 %v166_v47  ;;  %vm173_vm3 = vweird.f32 %v166_v47 }
  0x45   : > { %v277_v48 = vpop.eup %276 }
  0x46   : > { %v168_v49 = vmul.f32 %v277_v48, %v166_v47  ;;  %vm174_vm4 = vweird.f32 %v277_v48 }
  0x47   : > { %vm175_vm5 = vmor %vm173_vm3, %vm174_vm4 }
  0x48   : > { %v169_v50 = vmul.f32 %v277_v48, %v168_v49 }
  0x4a   : > { %v170_v51 = vmul.f32 0.5, %v169_v50 }
  0x4c   : > { %v171_v52 = vsub.f32 1.5, %v170_v51 }
  0x4e   : > { %v172_v53 = vmul.f32 %v277_v48, %v171_v52 }
  0x50   : > { %v176_v54 = vsel %vm175_vm5, %v277_v48, %v172_v53 }
  0x51   : > { %v177_v55 = vmul.f32 %v176_v54, %v144_v25  ;;  %v178_v56 = vmul.f32 %v176_v54, %v145_v26  ;;  %v179_v57 = vmul.f32 %v176_v54, %v146_v27  ;;  %v180_v58 = vmul.f32 %v176_v54, %v147_v28 }
  0x53   : > { %vm181_vm6 = vcmp.ge.f32.partialorder %v177_v55, 0.0  ;;  %v185_v59 = vmul.f32 0.01, %v177_v55  ;;  %vm182_vm7 = vcmp.ge.f32.partialorder %v178_v56, 0.0  ;;  %v186_v60 = vmul.f32 0.01, %v178_v56 }
  0x54   : > { %vm183_vm8 = vcmp.ge.f32.partialorder %v179_v57, 0.0  ;;  %v187_v61 = vmul.f32 0.01, %v179_v57  ;;  %vm184_vm9 = vcmp.ge.f32.partialorder %v180_v58, 0.0  ;;  %v188_v62 = vmul.f32 0.01, %v180_v58 }
  0x55   : > { %v189_v63 = vsel %vm181_vm6, %v177_v55, %v185_v59  ;;  %v190_v0 = vsel %vm182_vm7, %v178_v56, %v186_v60 }
  0x56   : > { %193 = vst.msk [vmem:[%s116_s14] sm:$0xff] %vm121_vm0, %v189_v63  ;;  %v191_v1 = vsel %vm183_vm8, %v179_v57, %v187_v61  ;;  %v192_v2 = vsel %vm184_vm9, %v180_v58, %v188_v62 }
  0x57   : > { %194 = vst.msk [vmem:[%s116_s14 + $0x8] sm:$0xff] %vm121_vm0, %v190_v0 }
  0x58   : > { %195 = vst.msk [vmem:[%s116_s14 + $0x10] sm:$0xff] %vm121_vm0, %v191_v1 }
  0x59   : > { %196 = vst.msk [vmem:[%s116_s14 + $0x18] sm:$0x1] %vm127_vm1, %v192_v2 }
  0x5a PF: > { %s11_s6 = sadd.s32 1, %s284_s6  }
  0x5b   : > { %p8_p4 = scmp.ge.s32.totalorder %s11_s6, 4  }
  0x5d   :  { %10 = sbr.rel (!%p8_p4) target bundleno = 1 (0x1), region = 54 }

// kernel: dis_content_forward.12
= control target key start
LH: loop header
LB: loop body
LE: loop exit
PB: predicated region body
PF: predicated region fallthrough
CT: control target
= control target key end

     0   :  { %s710_s12 = smov 0   ;;  %s712_s13 = smov 0   ;;  %s828_s0 = inlined_call_operand.vmem [shape: f32[56,1664], index: 0, kind: input, shape index: {}]   ;;  %s829_s1 = inlined_call_operand.vmem [shape: f32[1664,128], index: 1, kind: input, shape index: {}]   ;;  %s830_s2 = inlined_call_operand.vmem [shape: f32[1,128], index: 2, kind: input, shape index: {}]   ;;  %s831_s3 = inlined_call_operand.vmem [shape: f32[56,128], index: 3, kind: output, shape index: {}]  }
   0x1   :  { %s714_s14 = smov 0   ;;  %s716_s15 = smov 0  }
   0x2   :  { %s718_s16 = smov 0  }
   0x3 LB: > { %s25_s17 = sadd.s32 1, %s683_s15  ;;  %p48_p1 = scmp.ne.s32.totalorder %s675_s13, %s671_s12  ;;  %s687_s16 = sphi %s718_s16, %s13_s16   ;;  %s683_s15 = sphi %s716_s15, %s835_s15   ;;  %s679_s14 = sphi %s714_s14, %s834_s14   ;;  %s675_s13 = sphi %s712_s13, %s833_s13   ;;  %s671_s12 = sphi %s710_s12, %s832_s12  }
   0x4   : > { %p26_p0 = scmp.ge.s32.totalorder %s25_s17, 13  ;;  %p49_p2 = scmp.eq.s32.totalorder %s687_s16, 0 }
   0x5   : > { %s41_s19 = sadd.s32 1, %s675_s13  ;;  %p546_p5 = scmp.ge.s32.totalorder %s687_s16, 13 }
   0x6   : > { %s837_s17 = smov (%p26_p0, %s25_s17), 0  ;;  %p50_p3 = por %p49_p2, %p48_p1 }
   0x7   : > { %s37_s18 = ssub.s32 %s683_s15, %s837_s17  ;;  %162 = sbr.rel (%p546_p5) target bundleno = 23 (0x17), region = 20 }
   0x8   : > { %p39_p4 = scmp.eq.s32.totalorder %s37_s18, 0 }
   0xa   : > { %s745_s20 = scalar_select %p39_p4, %s675_s13, %s41_s19  }
   0xc   : > { %165 = sbr.rel (!%p50_p3) target bundleno = 23 (0x17), region = 24  ;;  %s167_s21 = sand.u32 (%p50_p3), 1, %s675_s13  }
   0xd   : > { %s547_s22 = sshll.u32 (%p50_p3), %s683_s15, 3  ;;  %s605_s23 = smul.u32 (%p50_p3), 56, %s167_s21 }
   0xe   : > { %s174_s26 = scalar_lea.vmem (%p50_p3), %s828_s0, %s547_s22 }
   0xf   : > { %v215_v0 = vld [vmem:[%s174_s26] sm:$0xff] (%p50_p3)  ;;  %v217_v1 = vld [vmem:[%s174_s26 + $0x68] sm:$0xff] (%p50_p3)  ;;  %v219_v2 = vld [vmem:[%s174_s26 + $0xd0] sm:$0xff] (%p50_p3)  ;;  %s169_s27 = scalar_lea.vmem (%p50_p3), [#allocation3], %s605_s23 }
  0x10   : > { %216 = vst [vmem:[%s169_s27] sm:$0xff] (%p50_p3), %v215_v0  ;;  %v221_v3 = vld [vmem:[%s174_s26 + $0x138] sm:$0xff] (%p50_p3)  ;;  %v223_v4 = vld [vmem:[%s174_s26 + $0x1a0] sm:$0xff] (%p50_p3)  ;;  %v225_v5 = vld [vmem:[%s174_s26 + $0x208] sm:$0xff] (%p50_p3) }
  0x11   : > { %218 = vst [vmem:[%s169_s27 + $0x8] sm:$0xff] %v217_v1  ;;  %v227_v6 = vld [vmem:[%s174_s26 + $0x270] sm:$0xff] }
  0x12   : > { %220 = vst [vmem:[%s169_s27 + $0x10] sm:$0xff] %v219_v2 }
  0x13   : > { %222 = vst [vmem:[%s169_s27 + $0x18] sm:$0xff] %v221_v3 }
  0x14   : > { %224 = vst [vmem:[%s169_s27 + $0x20] sm:$0xff] %v223_v4 }
  0x15   : > { %226 = vst [vmem:[%s169_s27 + $0x28] sm:$0xff] %v225_v5 }
  0x16   : > { %228 = vst [vmem:[%s169_s27 + $0x30] sm:$0xff] %v227_v6 }
  0x17 PF: > { %p548_p6 = scmp.ge.s32.totalorder %s687_s16, 1  ;;  %p245_p7 = scmp.lt.s32.totalorder %s687_s16, 14 }
  0x19   : > { %p246_p8 = pnand %p548_p6, %p245_p7 }
  0x1a   : > { %s252_s28 = sand.u32 (!%p246_p8), 1, %s671_s12   ;;  %s549_s29 = sshll.u32 (!%p246_p8), %s679_s14, 4 }
  0x1b   : > { %249 = sbr.rel (%p246_p8) target bundleno = 231 (0xe7), region = 66  ;;  %p291_p9 = scmp.lt.s32.totalorder (!%p246_p8), %s549_s29, 207 }
  0x1c   : > { %s606_s30 = smul.u32 (!%p246_p8), 56, %s252_s28  ;;  %p551_p10 = scmp.ne.s32.totalorder (!%p246_p8), %s679_s14, 0 }
  0x1e   : > { %s762_s8 = scalar_lea.vmem (!%p246_p8), [#allocation3], %s606_s30 }
  0x20   : > { %s839_s29 = smov (!%p291_p9, %s549_s29), 207  ;;  %314 = sbr.rel (%p551_p10) target bundleno = 45 (0x2d), region = 74 }
  0x21   : > { %s550_s4 = sshll.u32 %s839_s29, 3 }
  0x22   : > { %s760_s7 = scalar_lea.vmem %s829_s1, %s550_s4 }
  0x25   : > { %v689_v7 = vmov 0.0  }
  0x26   : > { %315 = vst [vmem:[#allocation2 + $0x30] sm:$0xff] %v689_v7 }
  0x27   : > { %316 = vst [vmem:[#allocation2] sm:$0xff] %v689_v7 }
  0x28   : > { %317 = vst [vmem:[#allocation2 + $0x18] sm:$0xff] %v689_v7 }
  0x29   : > { %318 = vst [vmem:[#allocation2 + $0x10] sm:$0xff] %v689_v7 }
  0x2a   : > { %319 = vst [vmem:[#allocation2 + $0x8] sm:$0xff] %v689_v7 }
  0x2b   : > { %320 = vst [vmem:[#allocation2 + $0x20] sm:$0xff] %v689_v7 }
  0x2c   : > { %321 = vst [vmem:[#allocation2 + $0x28] sm:$0xff] %v689_v7 }
  0x2d PF: > { %v351_v8 = vld [vmem:[%s760_s7 + $0x78] sm:$0xff]  ;;  %v350_v9 = vld [vmem:[%s760_s7 + $0x70] sm:$0xff]  ;;  %v349_v10 = vld [vmem:[%s760_s7 + $0x68] sm:$0xff]  ;;  %p552_p11 = scmp.ne.s32.totalorder %s679_s14, 12 }
  0x2e   : > { %558 = vmatpush.msra.mxu2 %v351_v8  ;;  %559 = vmatpush.msra.mxu3 %v351_v8  ;;  %v348_v11 = vld [vmem:[%s760_s7 + $0x60] sm:$0xff]  ;;  %v347_v12 = vld [vmem:[%s760_s7 + $0x58] sm:$0xff]  ;;  %v346_v13 = vld [vmem:[%s760_s7 + $0x50] sm:$0xff] }
  0x2f   : > { %352 = vmatpush.msra.mxu0 %v351_v8  ;;  %557 = vmatpush.msra.mxu1 %v351_v8  ;;  %v345_v14 = vld [vmem:[%s760_s7 + $0x48] sm:$0xff]  ;;  %v344_v15 = vld [vmem:[%s760_s7 + $0x40] sm:$0xff]  ;;  %v343_v16 = vld [vmem:[%s760_s7 + $0x38] sm:$0xff] }
  0x30   : > { %561 = vmatpush.msra.mxu2 %v350_v9  ;;  %562 = vmatpush.msra.mxu3 %v350_v9  ;;  %v342_v17 = vld [vmem:[%s760_s7 + $0x30] sm:$0xff]  ;;  %v341_v18 = vld [vmem:[%s760_s7 + $0x28] sm:$0xff]  ;;  %v340_v19 = vld [vmem:[%s760_s7 + $0x20] sm:$0xff] }
  0x31   : > { %353 = vmatpush.msra.mxu0 %v350_v9  ;;  %560 = vmatpush.msra.mxu1 %v350_v9  ;;  %v339_v20 = vld [vmem:[%s760_s7 + $0x18] sm:$0xff]  ;;  %v338_v21 = vld [vmem:[%s760_s7 + $0x10] sm:$0xff]  ;;  %v337_v22 = vld [vmem:[%s760_s7 + $0x8] sm:$0xff] }
  0x32   : > { %564 = vmatpush.msra.mxu2 %v349_v10  ;;  %565 = vmatpush.msra.mxu3 %v349_v10  ;;  %v336_v23 = vld [vmem:[%s760_s7] sm:$0xff]  ;;  %v332_v24 = vld [vmem:[%s762_s8 + $0x18] sm:$0xff]  ;;  %v329_v26 = vld [vmem:[%s762_s8] sm:$0xff] }
  0x33   : > { %354 = vmatpush.msra.mxu0 %v349_v10  ;;  %563 = vmatpush.msra.mxu1 %v349_v10  ;;  %v334_v25 = vld [vmem:[%s762_s8 + $0x28] sm:$0xff]  ;;  %v331_v27 = vld [vmem:[%s762_s8 + $0x10] sm:$0xff]  ;;  %v333_v28 = vld [vmem:[%s762_s8 + $0x20] sm:$0xff] }
  0x34   : > { %567 = vmatpush.msra.mxu2 %v348_v11  ;;  %568 = vmatpush.msra.mxu3 %v348_v11  ;;  %v335_v29 = vld [vmem:[%s762_s8 + $0x30] sm:$0xff]  ;;  %v330_v30 = vld [vmem:[%s762_s8 + $0x8] sm:$0xff]  ;;  %v322_v31 = vld [vmem:[#allocation2 + $0x30] sm:$0xff] }
  0x35   : > { %355 = vmatpush.msra.mxu0 %v348_v11  ;;  %566 = vmatpush.msra.mxu1 %v348_v11  ;;  %v324_v32 = vld [vmem:[#allocation2 + $0x18] sm:$0xff]  ;;  %v325_v37 = vld [vmem:[#allocation2 + $0x10] sm:$0xff]  ;;  %v327_v38 = vld [vmem:[#allocation2 + $0x20] sm:$0xff] }
  0x36   : > { %570 = vmatpush.msra.mxu2 %v347_v12  ;;  %571 = vmatpush.msra.mxu3 %v347_v12  ;;  %v323_v43 = vld [vmem:[#allocation2] sm:$0xff]  ;;  %v326_v46 = vld [vmem:[#allocation2 + $0x8] sm:$0xff] }
  0x37   : > { %356 = vmatpush.msra.mxu0 %v347_v12  ;;  %569 = vmatpush.msra.mxu1 %v347_v12  ;;  %v328_v47 = vld [vmem:[#allocation2 + $0x28] sm:$0xff] }
  0x38   : > { %573 = vmatpush.msra.mxu2 %v346_v13  ;;  %574 = vmatpush.msra.mxu3 %v346_v13 }
  0x39   : > { %357 = vmatpush.msra.mxu0 %v346_v13  ;;  %572 = vmatpush.msra.mxu1 %v346_v13 }
  0x3a   : > { %576 = vmatpush.msra.mxu2 %v345_v14  ;;  %577 = vmatpush.msra.mxu3 %v345_v14 }
  0x3b   : > { %358 = vmatpush.msra.mxu0 %v345_v14  ;;  %575 = vmatpush.msra.mxu1 %v345_v14 }
  0x3c   : > { %579 = vmatpush.msra.mxu2 %v344_v15  ;;  %580 = vmatpush.msra.mxu3 %v344_v15 }
  0x3d   : > { %359 = vmatpush.msra.mxu0 %v344_v15  ;;  %578 = vmatpush.msra.mxu1 %v344_v15 }
  0x3e   : > { %582 = vmatpush.msra.mxu2 %v343_v16  ;;  %583 = vmatpush.msra.mxu3 %v343_v16 }
  0x3f   : > { %360 = vmatpush.msra.mxu0 %v343_v16  ;;  %581 = vmatpush.msra.mxu1 %v343_v16 }
  0x40   : > { %585 = vmatpush.msra.mxu2 %v342_v17  ;;  %586 = vmatpush.msra.mxu3 %v342_v17 }
  0x41   : > { %361 = vmatpush.msra.mxu0 %v342_v17  ;;  %584 = vmatpush.msra.mxu1 %v342_v17 }
  0x42   : > { %588 = vmatpush.msra.mxu2 %v341_v18  ;;  %589 = vmatpush.msra.mxu3 %v341_v18 }
  0x43   : > { %362 = vmatpush.msra.mxu0 %v341_v18  ;;  %587 = vmatpush.msra.mxu1 %v341_v18 }
  0x44   : > { %591 = vmatpush.msra.mxu2 %v340_v19  ;;  %592 = vmatpush.msra.mxu3 %v340_v19 }
  0x45   : > { %363 = vmatpush.msra.mxu0 %v340_v19  ;;  %590 = vmatpush.msra.mxu1 %v340_v19 }
  0x46   : > { %594 = vmatpush.msra.mxu2 %v339_v20  ;;  %595 = vmatpush.msra.mxu3 %v339_v20 }
  0x47   : > { %364 = vmatpush.msra.mxu0 %v339_v20  ;;  %593 = vmatpush.msra.mxu1 %v339_v20 }
  0x48   : > { %597 = vmatpush.msra.mxu2 %v338_v21  ;;  %598 = vmatpush.msra.mxu3 %v338_v21 }
  0x49   : > { %365 = vmatpush.msra.mxu0 %v338_v21  ;;  %596 = vmatpush.msra.mxu1 %v338_v21 }
  0x4a   : > { %600 = vmatpush.msra.mxu2 %v337_v22  ;;  %601 = vmatpush.msra.mxu3 %v337_v22 }
  0x4b   : > { %366 = vmatpush.msra.mxu0 %v337_v22  ;;  %599 = vmatpush.msra.mxu1 %v337_v22 }
  0x4c   : > { %603 = vmatpush.msra.mxu2 %v336_v23  ;;  %604 = vmatpush.msra.mxu3 %v336_v23 }
  0x4d   : > { %377 = vmatmul.f32.vlgmr.msra.gmra.mxu2 %v332_v24  ;;  %383 = vmatmul.f32.vlgmr.msra.gmra.mxu3 %v334_v25 }
  0x4e   : > { %367 = vmatpush.msra.mxu0 %v336_v23  ;;  %602 = vmatpush.msra.mxu1 %v336_v23 }
  0x4f   : > { %368 = vmatmul.f32.vlgmr.msra.gmra.mxu0 %v329_v26  ;;  %374 = vmatmul.f32.vlgmr.msra.gmra.mxu1 %v331_v27 }
  0x55   : > { %380 = vmatmul.f32.gmra.mxu2 %v333_v28  ;;  %386 = vmatmul.f32.gmra.mxu3 %v335_v29 }
  0x57   : > { %371 = vmatmul.f32.gmra.mxu0 %v330_v30 }
  0xcc   : > { %v369_v33 = vpop.f32.mrf.mxu0  ;;  %v375_v34 = vpop.f32.mrf.mxu1 }
  0xcd   : > { %v390_v35 = vadd.f32 %v369_v33, %v322_v31  ;;  %v392_v36 = vadd.f32 %v375_v34, %v324_v32 }
  0xcf   : > { %397 = vst [vmem:[#allocation2 + $0x30] sm:$0xff] %v390_v35 }
  0xd0   : > { %v378_v39 = vpop.f32.mrf.mxu2  ;;  %v384_v40 = vpop.f32.mrf.mxu3  ;;  %399 = vst [vmem:[#allocation2 + $0x18] sm:$0xff] %v392_v36 }
  0xd1   : > { %v393_v41 = vadd.f32 %v378_v39, %v325_v37  ;;  %v395_v42 = vadd.f32 %v384_v40, %v327_v38 }
  0xd3   : > { %400 = vst [vmem:[#allocation2 + $0x10] sm:$0xff] %v393_v41 }
  0xd4   : > { %402 = vst [vmem:[#allocation2 + $0x20] sm:$0xff] %v395_v42  ;;  %v372_v44 = vpop.f32.mrf.mxu0 }
  0xd5   : > { %v391_v45 = vadd.f32 %v372_v44, %v323_v43 }
  0xd7   : > { %398 = vst [vmem:[#allocation2] sm:$0xff] %v391_v45 }
  0xd8   : > { %v381_v48 = vpop.f32.mrf.mxu2  ;;  %v387_v49 = vpop.f32.mrf.mxu3  ;;  %407 = sbr.rel (%p552_p11) target bundleno = 231 (0xe7), region = 78 }
  0xd9   : > { %v394_v50 = vadd.f32 %v381_v48, %v326_v46  ;;  %v396_v51 = vadd.f32 %v387_v49, %v328_v47 }
  0xdb   : > { %401 = vst [vmem:[#allocation2 + $0x8] sm:$0xff] %v394_v50 }
  0xdc   : > { %403 = vst [vmem:[#allocation2 + $0x28] sm:$0xff] %v396_v51 }
  0xdd   : > { %v408_v52 = vld [vmem:[#allocation2 + $0x30] sm:$0xff]  ;;  %v648_v53 = vld [vmem:[%s830_s2] ss:$0 sm:$0xff]  ;;  %v410_v55 = vld [vmem:[#allocation2 + $0x18] sm:$0xff] }
  0xde   : > { %v409_v54 = vld [vmem:[#allocation2] sm:$0xff]  ;;  %v411_v56 = vld [vmem:[#allocation2 + $0x10] sm:$0xff]  ;;  %v419_v57 = vadd.f32 %v648_v53, %v408_v52  ;;  %v421_v59 = vadd.f32 %v648_v53, %v410_v55 }
  0xdf   : > { %v420_v58 = vadd.f32 %v648_v53, %v409_v54  ;;  %v413_v61 = vld [vmem:[#allocation2 + $0x20] sm:$0xff]  ;;  %v422_v62 = vadd.f32 %v648_v53, %v411_v56 }
  0xe0   : > { %426 = vst [vmem:[%s831_s3] sm:$0xff] %v419_v57  ;;  %v424_v1 = vadd.f32 %v648_v53, %v413_v61 }
  0xe1   : > { %427 = vst [vmem:[%s831_s3 + $0x8] sm:$0xff] %v420_v58 }
  0xe2   : > { %v412_v60 = vld [vmem:[#allocation2 + $0x8] sm:$0xff]  ;;  %428 = vst [vmem:[%s831_s3 + $0x10] sm:$0xff] %v421_v59 }
  0xe3   : > { %v414_v63 = vld [vmem:[#allocation2 + $0x28] sm:$0xff]  ;;  %v423_v0 = vadd.f32 %v648_v53, %v412_v60  ;;  %429 = vst [vmem:[%s831_s3 + $0x18] sm:$0xff] %v422_v62 }
  0xe4   : > { %v425_v2 = vadd.f32 %v648_v53, %v414_v63  ;;  %431 = vst [vmem:[%s831_s3 + $0x28] sm:$0xff] %v424_v1 }
  0xe5   : > { %430 = vst [vmem:[%s831_s3 + $0x20] sm:$0xff] %v423_v0 }
  0xe6   : > { %432 = vst [vmem:[%s831_s3 + $0x30] sm:$0xff] %v425_v2 }
  0xe7 PF: > { %s13_s16 = sadd.s32 1, %s687_s16   ;;  %s832_s12 = smov %s675_s13 }
  0xe8   : > { %p10_p12 = scmp.ge.s32.totalorder %s13_s16, 15   ;;  %s833_s13 = smov %s745_s20 }
  0xe9   : > { %s834_s14 = smov %s683_s15  ;;  %s835_s15 = smov %s837_s17 }
  0xea   :  { %12 = sbr.rel (!%p10_p12) target bundleno = 3 (0x3), region = 119 }

// kernel: dis_content_forward.14
= control target key start
LH: loop header
LB: loop body
LE: loop exit
PB: predicated region body
PF: predicated region fallthrough
CT: control target
= control target key end

     0   :  { %s418_s1 = inlined_call_operand.vmem [shape: f32[512,128], index: 1, kind: input, shape index: {}]   ;;  %s419_s0 = inlined_call_operand.vmem [shape: f32[8,512], index: 0, kind: input, shape index: {}]   ;;  %s420_s2 = inlined_call_operand.vmem [shape: f32[1,128], index: 2, kind: input, shape index: {}]   ;;  %s421_s3 = inlined_call_operand.vmem [shape: f32[8,128], index: 3, kind: output, shape index: {}]  }
   0x1   :  { %v71_v0 = vld [vmem:[%s418_s1 + $0x178] sm:$0xff]  ;;  %v70_v1 = vld [vmem:[%s418_s1 + $0x170] sm:$0xff]  ;;  %v69_v5 = vld [vmem:[%s418_s1 + $0x168] sm:$0xff] }
   0x2   :  { %v87_v2 = vld [vmem:[%s418_s1 + $0x1f8] sm:$0xff]  ;;  %128 = vmatpush.msra.mxu2 %v71_v0  ;;  %v86_v6 = vld [vmem:[%s418_s1 + $0x1f0] sm:$0xff]  ;;  %v85_v9 = vld [vmem:[%s418_s1 + $0x1e8] sm:$0xff] }
   0x3   :  { %148 = vmatpush.msra.mxu3 %v87_v2  ;;  %v39_v3 = vld [vmem:[%s418_s1 + $0x78] sm:$0xff]  ;;  %v38_v7 = vld [vmem:[%s418_s1 + $0x70] sm:$0xff]  ;;  %v37_v10 = vld [vmem:[%s418_s1 + $0x68] sm:$0xff] }
   0x4   :  { %v55_v4 = vld [vmem:[%s418_s1 + $0xf8] sm:$0xff]  ;;  %88 = vmatpush.msra.mxu0 %v39_v3  ;;  %v54_v8 = vld [vmem:[%s418_s1 + $0xf0] sm:$0xff]  ;;  %129 = vmatpush.msra.mxu2 %v70_v1  ;;  %v68_v11 = vld [vmem:[%s418_s1 + $0x160] sm:$0xff] }
   0x5   :  { %108 = vmatpush.msra.mxu1 %v55_v4  ;;  %149 = vmatpush.msra.mxu3 %v86_v6  ;;  %v53_v12 = vld [vmem:[%s418_s1 + $0xe8] sm:$0xff]  ;;  %v84_v13 = vld [vmem:[%s418_s1 + $0x1e0] sm:$0xff]  ;;  %v67_v16 = vld [vmem:[%s418_s1 + $0x158] sm:$0xff] }
   0x6   :  { %89 = vmatpush.msra.mxu0 %v38_v7  ;;  %130 = vmatpush.msra.mxu2 %v69_v5  ;;  %v36_v14 = vld [vmem:[%s418_s1 + $0x60] sm:$0xff]  ;;  %v83_v17 = vld [vmem:[%s418_s1 + $0x1d8] sm:$0xff]  ;;  %v66_v20 = vld [vmem:[%s418_s1 + $0x150] sm:$0xff] }
   0x7   :  { %109 = vmatpush.msra.mxu1 %v54_v8  ;;  %150 = vmatpush.msra.mxu3 %v85_v9  ;;  %v52_v15 = vld [vmem:[%s418_s1 + $0xe0] sm:$0xff]  ;;  %v35_v18 = vld [vmem:[%s418_s1 + $0x58] sm:$0xff]  ;;  %v82_v21 = vld [vmem:[%s418_s1 + $0x1d0] sm:$0xff] }
   0x8   :  { %90 = vmatpush.msra.mxu0 %v37_v10  ;;  %131 = vmatpush.msra.mxu2 %v68_v11  ;;  %v51_v19 = vld [vmem:[%s418_s1 + $0xd8] sm:$0xff]  ;;  %v34_v22 = vld [vmem:[%s418_s1 + $0x50] sm:$0xff]  ;;  %v65_v24 = vld [vmem:[%s418_s1 + $0x148] sm:$0xff] }
   0x9   :  { %110 = vmatpush.msra.mxu1 %v53_v12  ;;  %151 = vmatpush.msra.mxu3 %v84_v13  ;;  %v50_v23 = vld [vmem:[%s418_s1 + $0xd0] sm:$0xff]  ;;  %v81_v25 = vld [vmem:[%s418_s1 + $0x1c8] sm:$0xff]  ;;  %v64_v28 = vld [vmem:[%s418_s1 + $0x140] sm:$0xff] }
   0xa   :  { %91 = vmatpush.msra.mxu0 %v36_v14  ;;  %132 = vmatpush.msra.mxu2 %v67_v16  ;;  %v33_v26 = vld [vmem:[%s418_s1 + $0x48] sm:$0xff]  ;;  %v80_v29 = vld [vmem:[%s418_s1 + $0x1c0] sm:$0xff]  ;;  %v63_v32 = vld [vmem:[%s418_s1 + $0x138] sm:$0xff] }
   0xb   :  { %111 = vmatpush.msra.mxu1 %v52_v15  ;;  %152 = vmatpush.msra.mxu3 %v83_v17  ;;  %v49_v27 = vld [vmem:[%s418_s1 + $0xc8] sm:$0xff]  ;;  %v32_v30 = vld [vmem:[%s418_s1 + $0x40] sm:$0xff]  ;;  %v79_v33 = vld [vmem:[%s418_s1 + $0x1b8] sm:$0xff] }
   0xc   :  { %92 = vmatpush.msra.mxu0 %v35_v18  ;;  %133 = vmatpush.msra.mxu2 %v66_v20  ;;  %v48_v31 = vld [vmem:[%s418_s1 + $0xc0] sm:$0xff]  ;;  %v31_v34 = vld [vmem:[%s418_s1 + $0x38] sm:$0xff]  ;;  %v62_v36 = vld [vmem:[%s418_s1 + $0x130] sm:$0xff] }
   0xd   :  { %112 = vmatpush.msra.mxu1 %v51_v19  ;;  %153 = vmatpush.msra.mxu3 %v82_v21  ;;  %v47_v35 = vld [vmem:[%s418_s1 + $0xb8] sm:$0xff]  ;;  %v78_v37 = vld [vmem:[%s418_s1 + $0x1b0] sm:$0xff]  ;;  %v61_v40 = vld [vmem:[%s418_s1 + $0x128] sm:$0xff] }
   0xe   :  { %93 = vmatpush.msra.mxu0 %v34_v22  ;;  %134 = vmatpush.msra.mxu2 %v65_v24  ;;  %v30_v38 = vld [vmem:[%s418_s1 + $0x30] sm:$0xff]  ;;  %v77_v41 = vld [vmem:[%s418_s1 + $0x1a8] sm:$0xff]  ;;  %v60_v44 = vld [vmem:[%s418_s1 + $0x120] sm:$0xff] }
   0xf   :  { %113 = vmatpush.msra.mxu1 %v50_v23  ;;  %154 = vmatpush.msra.mxu3 %v81_v25  ;;  %v46_v39 = vld [vmem:[%s418_s1 + $0xb0] sm:$0xff]  ;;  %v29_v42 = vld [vmem:[%s418_s1 + $0x28] sm:$0xff]  ;;  %v76_v45 = vld [vmem:[%s418_s1 + $0x1a0] sm:$0xff] }
  0x10   :  { %94 = vmatpush.msra.mxu0 %v33_v26  ;;  %135 = vmatpush.msra.mxu2 %v64_v28  ;;  %v45_v43 = vld [vmem:[%s418_s1 + $0xa8] sm:$0xff]  ;;  %v28_v46 = vld [vmem:[%s418_s1 + $0x20] sm:$0xff]  ;;  %v59_v48 = vld [vmem:[%s418_s1 + $0x118] sm:$0xff] }
  0x11   :  { %114 = vmatpush.msra.mxu1 %v49_v27  ;;  %155 = vmatpush.msra.mxu3 %v80_v29  ;;  %v44_v47 = vld [vmem:[%s418_s1 + $0xa0] sm:$0xff]  ;;  %v75_v49 = vld [vmem:[%s418_s1 + $0x198] sm:$0xff]  ;;  %v58_v52 = vld [vmem:[%s418_s1 + $0x110] sm:$0xff] }
  0x12   :  { %95 = vmatpush.msra.mxu0 %v32_v30  ;;  %136 = vmatpush.msra.mxu2 %v63_v32  ;;  %v27_v50 = vld [vmem:[%s418_s1 + $0x18] sm:$0xff]  ;;  %v74_v53 = vld [vmem:[%s418_s1 + $0x190] sm:$0xff]  ;;  %v57_v56 = vld [vmem:[%s418_s1 + $0x108] sm:$0xff] }
  0x13   :  { %115 = vmatpush.msra.mxu1 %v48_v31  ;;  %156 = vmatpush.msra.mxu3 %v79_v33  ;;  %v43_v51 = vld [vmem:[%s418_s1 + $0x98] sm:$0xff]  ;;  %v26_v54 = vld [vmem:[%s418_s1 + $0x10] sm:$0xff]  ;;  %v73_v57 = vld [vmem:[%s418_s1 + $0x188] sm:$0xff] }
  0x14   :  { %96 = vmatpush.msra.mxu0 %v31_v34  ;;  %137 = vmatpush.msra.mxu2 %v62_v36  ;;  %v42_v55 = vld [vmem:[%s418_s1 + $0x90] sm:$0xff]  ;;  %v25_v58 = vld [vmem:[%s418_s1 + $0x8] sm:$0xff]  ;;  %v56_v60 = vld [vmem:[%s418_s1 + $0x100] sm:$0xff] }
  0x15   :  { %116 = vmatpush.msra.mxu1 %v47_v35  ;;  %157 = vmatpush.msra.mxu3 %v78_v37  ;;  %v41_v59 = vld [vmem:[%s418_s1 + $0x88] sm:$0xff]  ;;  %v72_v61 = vld [vmem:[%s418_s1 + $0x180] sm:$0xff]  ;;  %v22_v62 = vld [vmem:[%s419_s0 + $0x10] sm:$0xff] }
  0x16   :  { %97 = vmatpush.msra.mxu0 %v30_v38  ;;  %138 = vmatpush.msra.mxu2 %v61_v40  ;;  %v23_v63 = vld [vmem:[%s419_s0 + $0x18] sm:$0xff]  ;;  %v24_v0 = vld [vmem:[%s418_s1] sm:$0xff]  ;;  %v21_v3 = vld [vmem:[%s419_s0 + $0x8] sm:$0xff] }
  0x17   :  { %117 = vmatpush.msra.mxu1 %v46_v39  ;;  %158 = vmatpush.msra.mxu3 %v77_v41  ;;  %v40_v1 = vld [vmem:[%s418_s1 + $0x80] sm:$0xff] }
  0x18   :  { %98 = vmatpush.msra.mxu0 %v29_v42  ;;  %139 = vmatpush.msra.mxu2 %v60_v44  ;;  %v20_v2 = vld [vmem:[%s419_s0] sm:$0xff] }
  0x19   :  { %118 = vmatpush.msra.mxu1 %v45_v43  ;;  %159 = vmatpush.msra.mxu3 %v76_v45  ;;  %v187_v10 = vld [vmem:[%s420_s2] ss:$0 sm:$0xff] }
  0x1a   :  { %99 = vmatpush.msra.mxu0 %v28_v46  ;;  %140 = vmatpush.msra.mxu2 %v59_v48 }
  0x1b   :  { %119 = vmatpush.msra.mxu1 %v44_v47  ;;  %160 = vmatpush.msra.mxu3 %v75_v49 }
  0x1c   :  { %100 = vmatpush.msra.mxu0 %v27_v50  ;;  %141 = vmatpush.msra.mxu2 %v58_v52 }
  0x1d   :  { %120 = vmatpush.msra.mxu1 %v43_v51  ;;  %161 = vmatpush.msra.mxu3 %v74_v53 }
  0x1e   :  { %101 = vmatpush.msra.mxu0 %v26_v54  ;;  %142 = vmatpush.msra.mxu2 %v57_v56 }
  0x1f   :  { %121 = vmatpush.msra.mxu1 %v42_v55  ;;  %162 = vmatpush.msra.mxu3 %v73_v57 }
  0x20   :  { %102 = vmatpush.msra.mxu0 %v25_v58  ;;  %143 = vmatpush.msra.mxu2 %v56_v60 }
  0x21   :  { %122 = vmatpush.msra.mxu1 %v41_v59  ;;  %163 = vmatpush.msra.mxu3 %v72_v61 }
  0x22   :  { %144 = vmatmul.f32.vlgmr.msra.gmra.mxu2 %v22_v62  ;;  %164 = vmatmul.f32.vlgmr.msra.gmra.mxu3 %v23_v63 }
  0x23   :  { %103 = vmatpush.msra.mxu0 %v24_v0  ;;  %123 = vmatpush.msra.mxu1 %v40_v1 }
  0x24   :  { %104 = vmatmul.f32.vlgmr.msra.gmra.mxu0 %v20_v2  ;;  %124 = vmatmul.f32.vlgmr.msra.gmra.mxu1 %v21_v3 }
  0xa1   :  { %v105_v4 = vpop.f32.mrf.mxu0  ;;  %v125_v5 = vpop.f32.mrf.mxu1 }
  0xa2   :  { %v126_v6 = vadd.f32 %v125_v5, %v105_v4 }
  0xa5   :  { %v145_v7 = vpop.f32.mrf.mxu2  ;;  %v165_v8 = vpop.f32.mrf.mxu3 }
  0xa6   :  { %v146_v9 = vadd.f32 %v145_v7, %v126_v6 }
  0xa8   :  { %v166_v11 = vadd.f32 %v165_v8, %v146_v9 }
  0xaa   :  { %v178_v12 = vadd.f32 %v187_v10, %v166_v11 }
  0xac   :  { %vm179_vm0 = vcmp.ge.f32.partialorder %v178_v12, 0.0  ;;  %v180_v13 = vmul.f32 0.01, %v178_v12 }
  0xae   :  { %v181_v14 = vsel %vm179_vm0, %v178_v12, %v180_v13 }
  0xaf   :  { %182 = vst [vmem:[%s421_s3] sm:$0xff] %v181_v14 }

// kernel: dis_content_forward.15
= control target key start
LH: loop header
LB: loop body
LE: loop exit
PB: predicated region body
PF: predicated region fallthrough
CT: control target
= control target key end

     0   :  { %s151_s1 = inlined_call_operand.vmem [shape: f32[128,128], index: 1, kind: input, shape index: {}]   ;;  %s152_s2 = inlined_call_operand.vmem [shape: f32[1,128], index: 2, kind: input, shape index: {}]   ;;  %s153_s0 = inlined_call_operand.vmem [shape: f32[8,128], index: 0, kind: input, shape index: {}]   ;;  %s154_s3 = inlined_call_operand.vmem [shape: f32[8,128], index: 3, kind: output, shape index: {}]  }
   0x1   :  { %v36_v0 = vld [vmem:[%s151_s1 + $0x78] sm:$0xff]  ;;  %v35_v1 = vld [vmem:[%s151_s1 + $0x70] sm:$0xff]  ;;  %v34_v2 = vld [vmem:[%s151_s1 + $0x68] sm:$0xff] }
   0x2   :  { %37 = vmatpush.msra.mxu0 %v36_v0  ;;  %v33_v3 = vld [vmem:[%s151_s1 + $0x60] sm:$0xff]  ;;  %v32_v4 = vld [vmem:[%s151_s1 + $0x58] sm:$0xff]  ;;  %v31_v5 = vld [vmem:[%s151_s1 + $0x50] sm:$0xff] }
   0x3   :  { %v30_v6 = vld [vmem:[%s151_s1 + $0x48] sm:$0xff]  ;;  %v29_v7 = vld [vmem:[%s151_s1 + $0x40] sm:$0xff]  ;;  %v28_v8 = vld [vmem:[%s151_s1 + $0x38] sm:$0xff] }
   0x4   :  { %38 = vmatpush.msra.mxu0 %v35_v1  ;;  %v27_v9 = vld [vmem:[%s151_s1 + $0x30] sm:$0xff]  ;;  %v26_v10 = vld [vmem:[%s151_s1 + $0x28] sm:$0xff]  ;;  %v25_v11 = vld [vmem:[%s151_s1 + $0x20] sm:$0xff] }
   0x5   :  { %v24_v12 = vld [vmem:[%s151_s1 + $0x18] sm:$0xff]  ;;  %v23_v13 = vld [vmem:[%s151_s1 + $0x10] sm:$0xff]  ;;  %v22_v14 = vld [vmem:[%s151_s1 + $0x8] sm:$0xff] }
   0x6   :  { %39 = vmatpush.msra.mxu0 %v34_v2  ;;  %v21_v15 = vld [vmem:[%s151_s1] sm:$0xff] }
   0x7   :  { %v20_v16 = vld [vmem:[%s153_s0] sm:$0xff] }
   0x8   :  { %40 = vmatpush.msra.mxu0 %v33_v3  ;;  %v73_v17 = vld [vmem:[%s152_s2] ss:$0 sm:$0xff] }
   0xa   :  { %41 = vmatpush.msra.mxu0 %v32_v4 }
   0xc   :  { %42 = vmatpush.msra.mxu0 %v31_v5 }
   0xe   :  { %43 = vmatpush.msra.mxu0 %v30_v6 }
  0x10   :  { %44 = vmatpush.msra.mxu0 %v29_v7 }
  0x12   :  { %45 = vmatpush.msra.mxu0 %v28_v8 }
  0x14   :  { %46 = vmatpush.msra.mxu0 %v27_v9 }
  0x16   :  { %47 = vmatpush.msra.mxu0 %v26_v10 }
  0x18   :  { %48 = vmatpush.msra.mxu0 %v25_v11 }
  0x1a   :  { %49 = vmatpush.msra.mxu0 %v24_v12 }
  0x1c   :  { %50 = vmatpush.msra.mxu0 %v23_v13 }
  0x1e   :  { %51 = vmatpush.msra.mxu0 %v22_v14 }
  0x20   :  { %52 = vmatpush.msra.mxu0 %v21_v15 }
  0x21   :  { %53 = vmatmul.f32.vlgmr.msra.gmra.mxu0 %v20_v16 }
  0x9e   :  { %v54_v18 = vpop.f32.mrf.mxu0 }
  0x9f   :  { %v67_v19 = vadd.f32 %v73_v17, %v54_v18 }
  0xa1   :  { %68 = vst [vmem:[%s154_s3] sm:$0xff] %v67_v19 }

</bundles_post_ra>
